<compile_context>
chip_gen: v7x
topology: tpu7x:2x2x1
jax: 0.10.0
libtpu: 0.0.40
codegen_flags: <defaults>
</compile_context>

<pallas_src>
import jax
import jax.numpy as jnp
from jax import lax
from jax.experimental import pallas as pl
from jax.experimental.pallas import tpu as pltpu

LATENT_DIM = 32
N_CLASSES = 8
IMG_SHAPE = (1, 16, 16)
IMG_PROD = IMG_SHAPE[0] * IMG_SHAPE[1] * IMG_SHAPE[2]
BATCH = 8
BN_EPS = 0.8          # nn.BatchNorm1d(out_feat, 0.8) -> eps = 0.8
LRELU_SLOPE = 0.2


def _leaky_relu(x):
    return jnp.where(x > 0, x, LRELU_SLOPE * x)


def _batchnorm_train(x, gamma, beta):
    # training-mode BatchNorm1d: per-feature batch mean / biased variance,
    # affine folded into one scale/shift pair per feature (rsqrt -> EUP slot).
    mean = jnp.mean(x, axis=0, keepdims=True)
    var = jnp.mean(jnp.square(x - mean), axis=0, keepdims=True)
    scale = gamma * lax.rsqrt(var + BN_EPS)
    shift = beta - mean * scale
    return x * scale + shift


def generator_kernel(t1_ref, noise_ref, w1n_ref, b1_ref,
                     w2_ref, g2_ref, be2_ref,
                     w3_ref, g3_ref, be3_ref,
                     w4_hbm, s4_ref, g4_ref, be4_ref,
                     w5_hbm, s5_ref, b5_ref,
                     out_ref,
                     w4_vmem, w5_vmem, dma_sem):
    # w4 copy gets the whole HBM pipe during blocks 1-3 (software priority);
    # w5 is started after cp4.wait() and hides under the block-4 compute.
    cp4 = pltpu.make_async_copy(w4_hbm, w4_vmem, dma_sem.at[0])
    cp5 = pltpu.make_async_copy(w5_hbm, w5_vmem, dma_sem.at[1])
    cp4.start()

    # --- block 1: Linear(latent+n_classes -> 128), no BN, LeakyReLU --------
    # cat([emb(labels), noise]) @ W1 + b1 == t1[labels] + noise @ W1[C:] + b1
    h = (t1_ref[...]
         + jnp.dot(noise_ref[...], w1n_ref[...], preferred_element_type=jnp.float32)
         + b1_ref[...])
    h = _leaky_relu(h)

    # --- block 2: Linear(128 -> 256) + BN + LeakyReLU -----------------------
    # (bias dropped: exactly cancelled by BN's batch-mean subtraction)
    h = jnp.dot(h.astype(jnp.bfloat16), w2_ref[...],
                preferred_element_type=jnp.float32)
    h = _leaky_relu(_batchnorm_train(h, g2_ref[...], be2_ref[...]))

    # --- block 3: Linear(256 -> 512) + BN + LeakyReLU -----------------------
    h = jnp.dot(h.astype(jnp.bfloat16), w3_ref[...],
                preferred_element_type=jnp.float32)
    h = _leaky_relu(_batchnorm_train(h, g3_ref[...], be3_ref[...]))

    # --- block 4: Linear(512 -> 1024) + BN + LeakyReLU ----------------------
    cp4.wait()
    cp5.start()
    # int8 weights -> bf16 on the VPU; per-column scale applied post-matmul on
    # the tiny (B, 1024) accumulator (exact: s commutes with column sums).
    w4 = w4_vmem[...].astype(jnp.bfloat16)
    h = jnp.dot(h.astype(jnp.bfloat16), w4,
                preferred_element_type=jnp.float32) * s4_ref[...]
    h = _leaky_relu(_batchnorm_train(h, g4_ref[...], be4_ref[...]))

    # --- final: Linear(1024 -> prod(img_shape)) + Tanh ----------------------
    cp5.wait()
    w5 = w5_vmem[...].astype(jnp.bfloat16)
    h = (jnp.dot(h.astype(jnp.bfloat16), w5,
                 preferred_element_type=jnp.float32) * s5_ref[...]
         + b5_ref[...])
    out_ref[...] = jnp.tanh(h)


def init_params(key):
    """Deterministic parameter init (shapes match the PyTorch module, all f32)."""
    ks = jax.random.split(key, 11)
    in_dim = LATENT_DIM + N_CLASSES

    def linear(kw, kb, fan_in, fan_out):
        bound = 1.0 / jnp.sqrt(jnp.float32(fan_in))
        w = jax.random.uniform(kw, (fan_in, fan_out), jnp.float32, -bound, bound)
        b = jax.random.uniform(kb, (1, fan_out), jnp.float32, -bound, bound)
        return w, b

    p = {}
    p["emb"] = jax.random.normal(ks[0], (N_CLASSES, N_CLASSES), jnp.float32)
    p["w1"], p["b1"] = linear(ks[1], ks[2], in_dim, 128)
    p["w2"], p["b2"] = linear(ks[3], ks[4], 128, 256)
    p["g2"], p["be2"] = jnp.ones((1, 256), jnp.float32), jnp.zeros((1, 256), jnp.float32)
    p["w3"], p["b3"] = linear(ks[5], ks[6], 256, 512)
    p["g3"], p["be3"] = jnp.ones((1, 512), jnp.float32), jnp.zeros((1, 512), jnp.float32)
    p["w4"], p["b4"] = linear(ks[7], ks[8], 512, 1024)
    p["g4"], p["be4"] = jnp.ones((1, 1024), jnp.float32), jnp.zeros((1, 1024), jnp.float32)
    p["w5"], p["b5"] = linear(ks[9], ks[10], 1024, IMG_PROD)
    return p


def _quantize_int8_cols(w):
    """Symmetric per-output-column int8 quantization: w ~= q * scale."""
    amax = jnp.max(jnp.abs(w), axis=0, keepdims=True)
    scale = jnp.maximum(amax, 1e-8) / 127.0
    q = jnp.clip(jnp.round(w / scale), -127.0, 127.0).astype(jnp.int8)
    return q, scale.astype(jnp.float32)


def prepare_params(p):
    """One-time kernel-side param prep.

    * Embedding folded into W1:  onehot @ (emb @ W1[:C]) == label_emb(labels) @ W1[:C],
      so we precompute t1 = emb @ W1[:C] and gather rows per label in the wrapper.
    * w2/w3 stored bf16 (small); w4/w5 stored int8 + per-column f32 scale
      (halves the dominant weight DMA bytes vs bf16, dequant is free VPU work).
    * b2/b3/b4 dropped: cancelled exactly by training-mode BatchNorm.
    """
    kp = {}
    kp["t1"] = jnp.dot(p["emb"], p["w1"][:N_CLASSES, :])      # (C, 128) f32
    kp["w1n"] = p["w1"][N_CLASSES:, :]                        # (L, 128) f32
    kp["b1"] = p["b1"]
    kp["w2"] = p["w2"].astype(jnp.bfloat16)
    kp["w3"] = p["w3"].astype(jnp.bfloat16)
    kp["w4q"], kp["s4"] = _quantize_int8_cols(p["w4"])        # (512,1024) i8, (1,1024) f32
    kp["w5q"], kp["s5"] = _quantize_int8_cols(p["w5"])        # (1024,256) i8, (1,256) f32
    for name in ("g2", "be2", "g3", "be3", "g4", "be4", "b5"):
        kp[name] = p[name]
    return kp


def generator_forward(noise, labels, kp):
    B, latent = noise.shape
    assert latent == LATENT_DIM
    # Wrapper-side row gather replaces the one-hot matmul (exact math):
    # t1_rows == label_emb(labels) @ W1[:C]
    t1_rows = jnp.take(kp["t1"], labels.astype(jnp.int32), axis=0)   # (B, 128) f32

    args = (t1_rows, noise,
            kp["w1n"], kp["b1"],
            kp["w2"], kp["g2"], kp["be2"],
            kp["w3"], kp["g3"], kp["be3"],
            kp["w4q"], kp["s4"], kp["g4"], kp["be4"],
            kp["w5q"], kp["s5"], kp["b5"])

    vmem = pl.BlockSpec(memory_space=pltpu.MemorySpace.VMEM)
    hbm = pl.BlockSpec(memory_space=pl.ANY)        # manual-DMA (overlap) path
    in_specs = [vmem] * len(args)
    in_specs[10] = hbm   # w4q
    in_specs[14] = hbm   # w5q

    flops = 2 * B * (LATENT_DIM * 128 + 128 * 256 + 256 * 512
                     + 512 * 1024 + 1024 * IMG_PROD)
    transcendentals = B * IMG_PROD + (256 + 512 + 1024)   # tanh + BN rsqrt
    bytes_accessed = (sum(int(a.size) * a.dtype.itemsize for a in args)
                      + B * IMG_PROD * 4)

    flat = pl.pallas_call(
        generator_kernel,
        out_shape=jax.ShapeDtypeStruct((B, IMG_PROD), jnp.float32),
        in_specs=in_specs,
        out_specs=vmem,
        scratch_shapes=[
            pltpu.VMEM((512, 1024), jnp.int8),        # w4 staging buffer
            pltpu.VMEM((1024, IMG_PROD), jnp.int8),   # w5 staging buffer
            pltpu.SemaphoreType.DMA((2,)),
        ],
        cost_estimate=pl.CostEstimate(
            flops=flops,
            transcendentals=transcendentals,
            bytes_accessed=bytes_accessed),
    )(*args)

    # img.view(B, *img_shape): NCHW
    return flat.reshape(B, *IMG_SHAPE)


if __name__ == "__main__":
    key = jax.random.PRNGKey(0)
    k_param, k_noise, k_lbl = jax.random.split(key, 3)

    params = init_params(k_param)
    kparams = prepare_params(params)
    noise = jax.random.normal(k_noise, (BATCH, LATENT_DIM), jnp.float32)
    labels = jax.random.randint(k_lbl, (BATCH,), 0, N_CLASSES, jnp.int32)

    img = generator_forward(noise, labels, kparams)
    jax.block_until_ready(img)

    assert img.shape == (BATCH,) + IMG_SHAPE, img.shape
    assert img.dtype == jnp.float32
    assert bool(jnp.all(jnp.isfinite(img)))
    assert bool(jnp.all(jnp.abs(img) <= 1.0))  # tanh output range

    print("KERNEL_OK")
</pallas_src>

<mosaic_0001>
module attributes {stable_mosaic.version = 11 : i64} {
  func.func @generator_kernel(%arg0: memref<8x128xf32, #tpu.memory_space<vmem>>, %arg1: memref<8x32xf32, #tpu.memory_space<vmem>>, %arg2: memref<32x128xf32, #tpu.memory_space<vmem>>, %arg3: memref<1x128xf32, #tpu.memory_space<vmem>>, %arg4: memref<128x256xbf16, #tpu.memory_space<vmem>>, %arg5: memref<1x256xf32, #tpu.memory_space<vmem>>, %arg6: memref<1x256xf32, #tpu.memory_space<vmem>>, %arg7: memref<256x512xbf16, #tpu.memory_space<vmem>>, %arg8: memref<1x512xf32, #tpu.memory_space<vmem>>, %arg9: memref<1x512xf32, #tpu.memory_space<vmem>>, %arg10: memref<512x1024xi8, #tpu.memory_space<any>>, %arg11: memref<1x1024xf32, #tpu.memory_space<vmem>>, %arg12: memref<1x1024xf32, #tpu.memory_space<vmem>>, %arg13: memref<1x1024xf32, #tpu.memory_space<vmem>>, %arg14: memref<1024x256xi8, #tpu.memory_space<any>>, %arg15: memref<1x256xf32, #tpu.memory_space<vmem>>, %arg16: memref<1x256xf32, #tpu.memory_space<vmem>>, %arg17: memref<8x256xf32, #tpu.memory_space<vmem>>, %arg18: memref<512x1024xi8, #tpu.memory_space<vmem>>, %arg19: memref<1024x256xi8, #tpu.memory_space<vmem>>, %arg20: memref<2x!tpu.dma_semaphore, #tpu.memory_space<semaphore_mem>>) attributes {dimension_semantics = [], scalar_prefetch = 0 : i64, scratch_operands = 3 : i64, tpu.core_type = #tpu.core_type<tc>} {
    %c0_i32 = arith.constant 0 : i32
    %0 = tpu.memref_slice %arg20[%c0_i32] : memref<2x!tpu.dma_semaphore, #tpu.memory_space<semaphore_mem>> -> memref<1x!tpu.dma_semaphore, #tpu.memory_space<semaphore_mem>>
    %1 = tpu.memref_squeeze %0 : memref<1x!tpu.dma_semaphore, #tpu.memory_space<semaphore_mem>> -> memref<!tpu.dma_semaphore, #tpu.memory_space<semaphore_mem>>
    tpu.enqueue_dma source(%arg10 : memref<512x1024xi8, #tpu.memory_space<any>>) target(%arg18 : memref<512x1024xi8, #tpu.memory_space<vmem>>) target_semaphore(%1 : memref<!tpu.dma_semaphore, #tpu.memory_space<semaphore_mem>>)
    %c0 = arith.constant 0 : index
    %c0_0 = arith.constant 0 : index
    %2 = vector.load %arg0[%c0, %c0_0] : memref<8x128xf32, #tpu.memory_space<vmem>>, vector<8x128xf32>
    %c0_1 = arith.constant 0 : index
    %c0_2 = arith.constant 0 : index
    %3 = vector.load %arg1[%c0_1, %c0_2] : memref<8x32xf32, #tpu.memory_space<vmem>>, vector<8x32xf32>
    %c0_3 = arith.constant 0 : index
    %c0_4 = arith.constant 0 : index
    %4 = vector.load %arg2[%c0_3, %c0_4] : memref<32x128xf32, #tpu.memory_space<vmem>>, vector<32x128xf32>
    %cst = arith.constant dense<0.000000e+00> : vector<8x128xf32>
    %5 = tpu.matmul %3, %4, %cst {dimension_numbers = #tpu.dot_dimension_numbers<[1], [0], [0], [1], [0, 0, 1, 1], [], []>} : vector<8x32xf32>, vector<32x128xf32>, vector<8x128xf32> -> vector<8x128xf32>
    %6 = arith.addf %2, %5 : vector<8x128xf32>
    %c0_5 = arith.constant 0 : index
    %c0_6 = arith.constant 0 : index
    %7 = vector.load %arg3[%c0_5, %c0_6] : memref<1x128xf32, #tpu.memory_space<vmem>>, vector<1x128xf32>
    %8 = vector.broadcast %7 : vector<1x128xf32> to vector<8x128xf32>
    %9 = arith.addf %6, %8 : vector<8x128xf32>
    %cst_7 = arith.constant 0.000000e+00 : f32
    %10 = vector.broadcast %cst_7 : f32 to vector<8x128xf32>
    %11 = arith.cmpf ogt, %9, %10 : vector<8x128xf32>
    %cst_8 = arith.constant 2.000000e-01 : f32
    %12 = vector.broadcast %cst_8 : f32 to vector<8x128xf32>
    %13 = arith.mulf %12, %9 : vector<8x128xf32>
    %14 = arith.select %11, %9, %13 : vector<8x128xi1>, vector<8x128xf32>
    %15 = arith.truncf %14 : vector<8x128xf32> to vector<8x128xbf16>
    %c0_9 = arith.constant 0 : index
    %c0_10 = arith.constant 0 : index
    %16 = vector.load %arg4[%c0_9, %c0_10] : memref<128x256xbf16, #tpu.memory_space<vmem>>, vector<128x256xbf16>
    %cst_11 = arith.constant dense<0.000000e+00> : vector<8x256xf32>
    %17 = tpu.matmul %15, %16, %cst_11 {dimension_numbers = #tpu.dot_dimension_numbers<[1], [0], [0], [1], [0, 0, 1, 1], [], []>} : vector<8x128xbf16>, vector<128x256xbf16>, vector<8x256xf32> -> vector<8x256xf32>
    %c0_12 = arith.constant 0 : index
    %c0_13 = arith.constant 0 : index
    %18 = vector.load %arg5[%c0_12, %c0_13] : memref<1x256xf32, #tpu.memory_space<vmem>>, vector<1x256xf32>
    %c0_14 = arith.constant 0 : index
    %c0_15 = arith.constant 0 : index
    %19 = vector.load %arg6[%c0_14, %c0_15] : memref<1x256xf32, #tpu.memory_space<vmem>>, vector<1x256xf32>
    %cst_16 = arith.constant dense<0.000000e+00> : vector<256xf32>
    %20 = vector.multi_reduction <add>, %17, %cst_16 [0] : vector<8x256xf32> to vector<256xf32>
    %21 = vector.shape_cast %20 : vector<256xf32> to vector<1x256xf32>
    %cst_17 = arith.constant 8.000000e+00 : f32
    %22 = vector.broadcast %cst_17 : f32 to vector<1x256xf32>
    %23 = arith.divf %21, %22 : vector<1x256xf32>
    %24 = vector.broadcast %23 : vector<1x256xf32> to vector<8x256xf32>
    %25 = arith.subf %17, %24 : vector<8x256xf32>
    %26 = arith.mulf %25, %25 : vector<8x256xf32>
    %cst_18 = arith.constant dense<0.000000e+00> : vector<256xf32>
    %27 = vector.multi_reduction <add>, %26, %cst_18 [0] : vector<8x256xf32> to vector<256xf32>
    %28 = vector.shape_cast %27 : vector<256xf32> to vector<1x256xf32>
    %cst_19 = arith.constant 8.000000e+00 : f32
    %29 = vector.broadcast %cst_19 : f32 to vector<1x256xf32>
    %30 = arith.divf %28, %29 : vector<1x256xf32>
    %cst_20 = arith.constant 8.000000e-01 : f32
    %31 = vector.broadcast %cst_20 : f32 to vector<1x256xf32>
    %32 = arith.addf %30, %31 : vector<1x256xf32>
    %33 = math.rsqrt %32 : vector<1x256xf32>
    %34 = arith.mulf %18, %33 : vector<1x256xf32>
    %35 = arith.mulf %23, %34 : vector<1x256xf32>
    %36 = arith.subf %19, %35 : vector<1x256xf32>
    %37 = vector.broadcast %34 : vector<1x256xf32> to vector<8x256xf32>
    %38 = arith.mulf %17, %37 : vector<8x256xf32>
    %39 = vector.broadcast %36 : vector<1x256xf32> to vector<8x256xf32>
    %40 = arith.addf %38, %39 : vector<8x256xf32>
    %cst_21 = arith.constant 0.000000e+00 : f32
    %41 = vector.broadcast %cst_21 : f32 to vector<8x256xf32>
    %42 = arith.cmpf ogt, %40, %41 : vector<8x256xf32>
    %cst_22 = arith.constant 2.000000e-01 : f32
    %43 = vector.broadcast %cst_22 : f32 to vector<8x256xf32>
    %44 = arith.mulf %43, %40 : vector<8x256xf32>
    %45 = arith.select %42, %40, %44 : vector<8x256xi1>, vector<8x256xf32>
    %46 = arith.truncf %45 : vector<8x256xf32> to vector<8x256xbf16>
    %c0_23 = arith.constant 0 : index
    %c0_24 = arith.constant 0 : index
    %47 = vector.load %arg7[%c0_23, %c0_24] : memref<256x512xbf16, #tpu.memory_space<vmem>>, vector<256x512xbf16>
    %cst_25 = arith.constant dense<0.000000e+00> : vector<8x512xf32>
    %48 = tpu.matmul %46, %47, %cst_25 {dimension_numbers = #tpu.dot_dimension_numbers<[1], [0], [0], [1], [0, 0, 1, 1], [], []>} : vector<8x256xbf16>, vector<256x512xbf16>, vector<8x512xf32> -> vector<8x512xf32>
    %c0_26 = arith.constant 0 : index
    %c0_27 = arith.constant 0 : index
    %49 = vector.load %arg8[%c0_26, %c0_27] : memref<1x512xf32, #tpu.memory_space<vmem>>, vector<1x512xf32>
    %c0_28 = arith.constant 0 : index
    %c0_29 = arith.constant 0 : index
    %50 = vector.load %arg9[%c0_28, %c0_29] : memref<1x512xf32, #tpu.memory_space<vmem>>, vector<1x512xf32>
    %cst_30 = arith.constant dense<0.000000e+00> : vector<512xf32>
    %51 = vector.multi_reduction <add>, %48, %cst_30 [0] : vector<8x512xf32> to vector<512xf32>
    %52 = vector.shape_cast %51 : vector<512xf32> to vector<1x512xf32>
    %cst_31 = arith.constant 8.000000e+00 : f32
    %53 = vector.broadcast %cst_31 : f32 to vector<1x512xf32>
    %54 = arith.divf %52, %53 : vector<1x512xf32>
    %55 = vector.broadcast %54 : vector<1x512xf32> to vector<8x512xf32>
    %56 = arith.subf %48, %55 : vector<8x512xf32>
    %57 = arith.mulf %56, %56 : vector<8x512xf32>
    %cst_32 = arith.constant dense<0.000000e+00> : vector<512xf32>
    %58 = vector.multi_reduction <add>, %57, %cst_32 [0] : vector<8x512xf32> to vector<512xf32>
    %59 = vector.shape_cast %58 : vector<512xf32> to vector<1x512xf32>
    %cst_33 = arith.constant 8.000000e+00 : f32
    %60 = vector.broadcast %cst_33 : f32 to vector<1x512xf32>
    %61 = arith.divf %59, %60 : vector<1x512xf32>
    %cst_34 = arith.constant 8.000000e-01 : f32
    %62 = vector.broadcast %cst_34 : f32 to vector<1x512xf32>
    %63 = arith.addf %61, %62 : vector<1x512xf32>
    %64 = math.rsqrt %63 : vector<1x512xf32>
    %65 = arith.mulf %49, %64 : vector<1x512xf32>
    %66 = arith.mulf %54, %65 : vector<1x512xf32>
    %67 = arith.subf %50, %66 : vector<1x512xf32>
    %68 = vector.broadcast %65 : vector<1x512xf32> to vector<8x512xf32>
    %69 = arith.mulf %48, %68 : vector<8x512xf32>
    %70 = vector.broadcast %67 : vector<1x512xf32> to vector<8x512xf32>
    %71 = arith.addf %69, %70 : vector<8x512xf32>
    %cst_35 = arith.constant 0.000000e+00 : f32
    %72 = vector.broadcast %cst_35 : f32 to vector<8x512xf32>
    %73 = arith.cmpf ogt, %71, %72 : vector<8x512xf32>
    %cst_36 = arith.constant 2.000000e-01 : f32
    %74 = vector.broadcast %cst_36 : f32 to vector<8x512xf32>
    %75 = arith.mulf %74, %71 : vector<8x512xf32>
    %76 = arith.select %73, %71, %75 : vector<8x512xi1>, vector<8x512xf32>
    %c0_i32_37 = arith.constant 0 : i32
    %77 = tpu.memref_slice %arg20[%c0_i32_37] : memref<2x!tpu.dma_semaphore, #tpu.memory_space<semaphore_mem>> -> memref<1x!tpu.dma_semaphore, #tpu.memory_space<semaphore_mem>>
    %78 = tpu.memref_squeeze %77 : memref<1x!tpu.dma_semaphore, #tpu.memory_space<semaphore_mem>> -> memref<!tpu.dma_semaphore, #tpu.memory_space<semaphore_mem>>
    tpu.wait_dma2 semaphore(%78 : memref<!tpu.dma_semaphore, #tpu.memory_space<semaphore_mem>>) src(%arg10 : memref<512x1024xi8, #tpu.memory_space<any>>) dst(%arg18 : memref<512x1024xi8, #tpu.memory_space<vmem>>)
    %c1_i32 = arith.constant 1 : i32
    %79 = tpu.memref_slice %arg20[%c1_i32] : memref<2x!tpu.dma_semaphore, #tpu.memory_space<semaphore_mem>> -> memref<1x!tpu.dma_semaphore, #tpu.memory_space<semaphore_mem>>
    %80 = tpu.memref_squeeze %79 : memref<1x!tpu.dma_semaphore, #tpu.memory_space<semaphore_mem>> -> memref<!tpu.dma_semaphore, #tpu.memory_space<semaphore_mem>>
    tpu.enqueue_dma source(%arg14 : memref<1024x256xi8, #tpu.memory_space<any>>) target(%arg19 : memref<1024x256xi8, #tpu.memory_space<vmem>>) target_semaphore(%80 : memref<!tpu.dma_semaphore, #tpu.memory_space<semaphore_mem>>)
    %c0_38 = arith.constant 0 : index
    %c0_39 = arith.constant 0 : index
    %81 = vector.load %arg18[%c0_38, %c0_39] : memref<512x1024xi8, #tpu.memory_space<vmem>>, vector<512x1024xi8>
    %82 = arith.sitofp %81 : vector<512x1024xi8> to vector<512x1024xbf16>
    %83 = arith.truncf %76 : vector<8x512xf32> to vector<8x512xbf16>
    %cst_40 = arith.constant dense<0.000000e+00> : vector<8x1024xf32>
    %84 = tpu.matmul %83, %82, %cst_40 {dimension_numbers = #tpu.dot_dimension_numbers<[1], [0], [0], [1], [0, 0, 1, 1], [], []>} : vector<8x512xbf16>, vector<512x1024xbf16>, vector<8x1024xf32> -> vector<8x1024xf32>
    %c0_41 = arith.constant 0 : index
    %c0_42 = arith.constant 0 : index
    %85 = vector.load %arg11[%c0_41, %c0_42] : memref<1x1024xf32, #tpu.memory_space<vmem>>, vector<1x1024xf32>
    %86 = vector.broadcast %85 : vector<1x1024xf32> to vector<8x1024xf32>
    %87 = arith.mulf %84, %86 : vector<8x1024xf32>
    %c0_43 = arith.constant 0 : index
    %c0_44 = arith.constant 0 : index
    %88 = vector.load %arg12[%c0_43, %c0_44] : memref<1x1024xf32, #tpu.memory_space<vmem>>, vector<1x1024xf32>
    %c0_45 = arith.constant 0 : index
    %c0_46 = arith.constant 0 : index
    %89 = vector.load %arg13[%c0_45, %c0_46] : memref<1x1024xf32, #tpu.memory_space<vmem>>, vector<1x1024xf32>
    %cst_47 = arith.constant dense<0.000000e+00> : vector<1024xf32>
    %90 = vector.multi_reduction <add>, %87, %cst_47 [0] : vector<8x1024xf32> to vector<1024xf32>
    %91 = vector.shape_cast %90 : vector<1024xf32> to vector<1x1024xf32>
    %cst_48 = arith.constant 8.000000e+00 : f32
    %92 = vector.broadcast %cst_48 : f32 to vector<1x1024xf32>
    %93 = arith.divf %91, %92 : vector<1x1024xf32>
    %94 = vector.broadcast %93 : vector<1x1024xf32> to vector<8x1024xf32>
    %95 = arith.subf %87, %94 : vector<8x1024xf32>
    %96 = arith.mulf %95, %95 : vector<8x1024xf32>
    %cst_49 = arith.constant dense<0.000000e+00> : vector<1024xf32>
    %97 = vector.multi_reduction <add>, %96, %cst_49 [0] : vector<8x1024xf32> to vector<1024xf32>
    %98 = vector.shape_cast %97 : vector<1024xf32> to vector<1x1024xf32>
    %cst_50 = arith.constant 8.000000e+00 : f32
    %99 = vector.broadcast %cst_50 : f32 to vector<1x1024xf32>
    %100 = arith.divf %98, %99 : vector<1x1024xf32>
    %cst_51 = arith.constant 8.000000e-01 : f32
    %101 = vector.broadcast %cst_51 : f32 to vector<1x1024xf32>
    %102 = arith.addf %100, %101 : vector<1x1024xf32>
    %103 = math.rsqrt %102 : vector<1x1024xf32>
    %104 = arith.mulf %88, %103 : vector<1x1024xf32>
    %105 = arith.mulf %93, %104 : vector<1x1024xf32>
    %106 = arith.subf %89, %105 : vector<1x1024xf32>
    %107 = vector.broadcast %104 : vector<1x1024xf32> to vector<8x1024xf32>
    %108 = arith.mulf %87, %107 : vector<8x1024xf32>
    %109 = vector.broadcast %106 : vector<1x1024xf32> to vector<8x1024xf32>
    %110 = arith.addf %108, %109 : vector<8x1024xf32>
    %cst_52 = arith.constant 0.000000e+00 : f32
    %111 = vector.broadcast %cst_52 : f32 to vector<8x1024xf32>
    %112 = arith.cmpf ogt, %110, %111 : vector<8x1024xf32>
    %cst_53 = arith.constant 2.000000e-01 : f32
    %113 = vector.broadcast %cst_53 : f32 to vector<8x1024xf32>
    %114 = arith.mulf %113, %110 : vector<8x1024xf32>
    %115 = arith.select %112, %110, %114 : vector<8x1024xi1>, vector<8x1024xf32>
    %c1_i32_54 = arith.constant 1 : i32
    %116 = tpu.memref_slice %arg20[%c1_i32_54] : memref<2x!tpu.dma_semaphore, #tpu.memory_space<semaphore_mem>> -> memref<1x!tpu.dma_semaphore, #tpu.memory_space<semaphore_mem>>
    %117 = tpu.memref_squeeze %116 : memref<1x!tpu.dma_semaphore, #tpu.memory_space<semaphore_mem>> -> memref<!tpu.dma_semaphore, #tpu.memory_space<semaphore_mem>>
    tpu.wait_dma2 semaphore(%117 : memref<!tpu.dma_semaphore, #tpu.memory_space<semaphore_mem>>) src(%arg14 : memref<1024x256xi8, #tpu.memory_space<any>>) dst(%arg19 : memref<1024x256xi8, #tpu.memory_space<vmem>>)
    %c0_55 = arith.constant 0 : index
    %c0_56 = arith.constant 0 : index
    %118 = vector.load %arg19[%c0_55, %c0_56] : memref<1024x256xi8, #tpu.memory_space<vmem>>, vector<1024x256xi8>
    %119 = arith.sitofp %118 : vector<1024x256xi8> to vector<1024x256xbf16>
    %120 = arith.truncf %115 : vector<8x1024xf32> to vector<8x1024xbf16>
    %cst_57 = arith.constant dense<0.000000e+00> : vector<8x256xf32>
    %121 = tpu.matmul %120, %119, %cst_57 {dimension_numbers = #tpu.dot_dimension_numbers<[1], [0], [0], [1], [0, 0, 1, 1], [], []>} : vector<8x1024xbf16>, vector<1024x256xbf16>, vector<8x256xf32> -> vector<8x256xf32>
    %c0_58 = arith.constant 0 : index
    %c0_59 = arith.constant 0 : index
    %122 = vector.load %arg15[%c0_58, %c0_59] : memref<1x256xf32, #tpu.memory_space<vmem>>, vector<1x256xf32>
    %123 = vector.broadcast %122 : vector<1x256xf32> to vector<8x256xf32>
    %124 = arith.mulf %121, %123 : vector<8x256xf32>
    %c0_60 = arith.constant 0 : index
    %c0_61 = arith.constant 0 : index
    %125 = vector.load %arg16[%c0_60, %c0_61] : memref<1x256xf32, #tpu.memory_space<vmem>>, vector<1x256xf32>
    %126 = vector.broadcast %125 : vector<1x256xf32> to vector<8x256xf32>
    %127 = arith.addf %124, %126 : vector<8x256xf32>
    %128 = math.tanh %127 : vector<8x256xf32>
    %c0_62 = arith.constant 0 : index
    %c0_63 = arith.constant 0 : index
    %129 = vector.load %arg17[%c0_62, %c0_63] : memref<8x256xf32, #tpu.memory_space<vmem>>, vector<8x256xf32>
    tpu.vector_store %arg17[%c0_62, %c0_63], %128 {strides = array<i32>} : memref<8x256xf32, #tpu.memory_space<vmem>>, vector<8x256xf32>,
    return
  }
}

</mosaic_0001>

<bundles_post_ra>
// kernel: tpu_custom_call.1
= control target key start
LH: loop header
LB: loop body
LE: loop exit
PB: predicated region body
PF: predicated region fallthrough
CT: control target
= control target key end

     0   :  { %s3837_s0 = inlined_call_operand.hbm [shape: f32[8,128], index: 0, kind: input, shape index: {}]   ;;  %s3838_s1 = inlined_call_operand.hbm [shape: f32[8,32], index: 1, kind: input, shape index: {}]   ;;  %s3839_s2 = inlined_call_operand.hbm [shape: f32[32,128], index: 2, kind: input, shape index: {}]   ;;  %s3840_s3 = inlined_call_operand.hbm [shape: f32[1,128], index: 3, kind: input, shape index: {}]   ;;  %s3841_s4 = inlined_call_operand.hbm [shape: bf16[128,256], index: 4, kind: input, shape index: {}]   ;;  %s3842_s5 = inlined_call_operand.vmem [shape: f32[1,256], index: 5, kind: input, shape index: {}]   ;;  %s3843_s6 = inlined_call_operand.hbm [shape: f32[1,256], index: 6, kind: input, shape index: {}]   ;;  %s3844_s7 = inlined_call_operand.hbm [shape: bf16[256,512], index: 7, kind: input, shape index: {}]   ;;  %s3845_s8 = inlined_call_operand.vmem [shape: f32[1,512], index: 8, kind: input, shape index: {}]   ;;  %s3846_s9 = inlined_call_operand.vmem [shape: f32[1,512], index: 9, kind: input, shape index: {}]   ;;  %s3847_s10 = inlined_call_operand.hbm [shape: s8[512,1024], index: 10, kind: input, shape index: {}]   ;;  %s3848_s11 = inlined_call_operand.vmem [shape: f32[1,1024], index: 11, kind: input, shape index: {}]   ;;  %s3849_s12 = inlined_call_operand.vmem [shape: f32[1,1024], index: 12, kind: input, shape index: {}]   ;;  %s3850_s13 = inlined_call_operand.vmem [shape: f32[1,1024], index: 13, kind: input, shape index: {}]   ;;  %s3851_s14 = inlined_call_operand.hbm [shape: s8[1024,256], index: 14, kind: input, shape index: {}]   ;;  %s3852_s15 = inlined_call_operand.vmem [shape: f32[1,256], index: 15, kind: input, shape index: {}]   ;;  %s3853_s16 = inlined_call_operand.vmem [shape: f32[1,256], index: 16, kind: input, shape index: {}]   ;;  %s3854_s17 = inlined_call_operand.hbm [shape: f32[8,256], index: 17, kind: output, shape index: {}]  }
   0x1   :  { %3857 = sst [smem:[#allocation31_spill]] %s3837_s0 }
   0x2   :  { %3858 = sst [smem:[#allocation32_spill]] %s3838_s1 }
   0x3   :  { %22 = vsyncpa [#allocation6], 0 }
   0x4   :  { %23 = vsyncpa [#allocation9], 0 }
   0x5   :  { %24 = vsyncpa [#allocation12], 0 }
   0x6   :  { %25 = vsyncpa [#allocation15], 0 }
   0x7   :  { %26 = vsyncpa [#allocation7], 0  ;;  %s3305_s24 = smov [#allocation8]   ;;  %s3306_s26 = smov [#allocation11]  }
   0x8   :  { %s43_s25 = sshll.u32 %s3305_s24, 4  ;;  %s65_s27 = sshll.u32 %s3306_s26, 4  ;;  %s44_s25 = int_to_ptr.vmem [resolvable:$true] %s43_s25  ;;  %s66_s27 = int_to_ptr.vmem [resolvable:$true] %s65_s27 }
   0x9   :  { %s3859_s0 = sld [smem:[#allocation32_spill]] }
   0xf   :  { %s3071_s30 = scalar_lea.hbm %s3859_s0, 128 }
  0x10   :  { %p3072_p0 = scmp.ne.s32.totalorder %s3859_s0, %s3071_s30  ;;  %p3075_p1 = scmp.lt.u32.totalorder %s3071_s30, %s3859_s0 }
  0x12   :  { %p3077_p2 = pnand %p3075_p1, %p3072_p0 }
  0x14   :  { %3080 = shalt.err (!%p3077_p2)
}
  0x15   :  { %s3081_s21 = scalar_lea.vmem %s44_s25, 128  ;;  %p3086_p4 = scmp.lt.s32.totalorder %s44_s25, %s44_s25 }
  0x16   :  { %p3082_p3 = scmp.ne.s32.totalorder %s44_s25, %s3081_s21  ;;  %p3087_p5 = scmp.lt.s32.totalorder %s3081_s21, %s3081_s21 }
  0x18   :  { %p3088_p6 = por %p3087_p5, %p3086_p4 }
  0x1a   :  { %p3089_p7 = pnand %p3088_p6, %p3082_p3 }
  0x1c   :  { %3092 = shalt.err (!%p3089_p7)
}
  0x1d   :  { %46 = dma.hbm_to_vmem [thread:$0]  %s3859_s0, 128, %s44_s25, [#allocation9]  }
  0x1e   :  { %s3093_s28 = scalar_lea.hbm %s3840_s3, 16 }
  0x1f   :  { %p3094_p8 = scmp.ne.s32.totalorder %s3840_s3, %s3093_s28  ;;  %p3097_p9 = scmp.lt.u32.totalorder %s3093_s28, %s3840_s3 }
  0x21   :  { %p3099_p10 = pnand %p3097_p9, %p3094_p8 }
  0x23   :  { %3102 = shalt.err (!%p3099_p10)
}
  0x24   :  { %s3103_s1 = scalar_lea.vmem %s66_s27, 16  ;;  %s3107_s20 = scalar_lea.vmem %s66_s27, 32 }
  0x25   :  { %p3104_p11 = scmp.ne.s32.totalorder %s66_s27, %s3103_s1  ;;  %p3108_p12 = scmp.lt.s32.totalorder %s66_s27, %s66_s27 }
  0x26   :  { %p3109_p13 = scmp.lt.s32.totalorder %s3107_s20, %s3103_s1 }
  0x28   :  { %p3110_p0 = por %p3109_p13, %p3108_p12 }
  0x2a   :  { %p3111_p1 = pnand %p3110_p0, %p3104_p11 }
  0x2c   :  { %3114 = shalt.err (!%p3111_p1)
}
  0x2d   :  { %68 = dma.hbm_to_vmem [thread:$0]  %s3840_s3, 16, %s66_s27, [#allocation12]  }
  0x2e   :  { %s3307_s21 = smov [#allocation14]   ;;  %s3308_s23 = smov [#allocation5]  }
  0x2f   :  { %s89_s22 = sshll.u32 %s3307_s21, 4  ;;  %s33_s24 = sshll.u32 %s3308_s23, 4  ;;  %s90_s22 = int_to_ptr.vmem [resolvable:$true] %s89_s22  ;;  %s34_s24 = int_to_ptr.vmem [resolvable:$true] %s33_s24 }
  0x30   :  { %s3115_s29 = scalar_lea.hbm %s3843_s6, 32 }
  0x31   :  { %p3116_p2 = scmp.ne.s32.totalorder %s3843_s6, %s3115_s29  ;;  %p3119_p3 = scmp.lt.u32.totalorder %s3115_s29, %s3843_s6 }
  0x33   :  { %p3121_p4 = pnand %p3119_p3, %p3116_p2 }
  0x35   :  { %3124 = shalt.err (!%p3121_p4)
}
  0x36   :  { %s3125_s3 = scalar_lea.vmem %s90_s22, 32  ;;  %p3130_p6 = scmp.lt.s32.totalorder %s90_s22, %s90_s22 }
  0x37   :  { %p3126_p5 = scmp.ne.s32.totalorder %s90_s22, %s3125_s3  ;;  %p3131_p7 = scmp.lt.s32.totalorder %s3125_s3, %s3125_s3 }
  0x39   :  { %p3132_p8 = por %p3131_p7, %p3130_p6 }
  0x3b   :  { %p3133_p9 = pnand %p3132_p8, %p3126_p5 }
  0x3d   :  { %3136 = shalt.err (!%p3133_p9)
}
  0x3e   :  { %92 = dma.hbm_to_vmem [thread:$0]  %s3843_s6, 32, %s90_s22, [#allocation15]  }
  0x3f   :  { %s3860_s21 = sld [smem:[#allocation31_spill]] }
  0x45   :  { %s3137_s23 = scalar_lea.hbm %s3860_s21, 128 }
  0x46   :  { %p3138_p10 = scmp.ne.s32.totalorder %s3860_s21, %s3137_s23  ;;  %p3141_p11 = scmp.lt.u32.totalorder %s3137_s23, %s3860_s21 }
  0x48   :  { %p3143_p12 = pnand %p3141_p11, %p3138_p10 }
  0x4a   :  { %3146 = shalt.err (!%p3143_p12)
}
  0x4b   :  { %s3147_s30 = scalar_lea.vmem %s34_s24, 128  ;;  %p3152_p0 = scmp.lt.s32.totalorder %s34_s24, %s34_s24 }
  0x4c   :  { %p3148_p13 = scmp.ne.s32.totalorder %s34_s24, %s3147_s30  ;;  %p3153_p1 = scmp.lt.s32.totalorder %s3147_s30, %s3147_s30 }
  0x4e   :  { %p3154_p2 = por %p3153_p1, %p3152_p0 }
  0x50   :  { %p3155_p3 = pnand %p3154_p2, %p3148_p13 }
  0x52   :  { %3158 = shalt.err (!%p3155_p3)
}
  0x53   :  { %36 = dma.hbm_to_vmem [thread:$0]  %s3860_s21, 128, %s34_s24, [#allocation6]  }
  0x54   :  { %s3309_s19 = smov [#allocation10]   ;;  %s3159_s20 = scalar_lea.hbm %s3839_s2, 512 }
  0x55   :  { %s52_s1 = sshll.u32 %s3309_s19, 4  ;;  %p3160_p4 = scmp.ne.s32.totalorder %s3839_s2, %s3159_s20  ;;  %s53_s1 = int_to_ptr.vmem [resolvable:$true] %s52_s1 }
  0x56   :  { %p3163_p5 = scmp.lt.u32.totalorder %s3159_s20, %s3839_s2 }
  0x58   :  { %p3165_p6 = pnand %p3163_p5, %p3160_p4 }
  0x5a   :  { %3168 = shalt.err (!%p3165_p6)
}
  0x5b   :  { %s3169_s28 = scalar_lea.vmem %s53_s1, 512  ;;  %p3174_p8 = scmp.lt.s32.totalorder %s53_s1, %s53_s1 }
  0x5c   :  { %p3170_p7 = scmp.ne.s32.totalorder %s53_s1, %s3169_s28  ;;  %p3175_p9 = scmp.lt.s32.totalorder %s3169_s28, %s3169_s28 }
  0x5e   :  { %p3176_p10 = por %p3175_p9, %p3174_p8 }
  0x60   :  { %p3177_p11 = pnand %p3176_p10, %p3170_p7 }
  0x62   :  { %3180 = shalt.err (!%p3177_p11)
}
  0x63   :  { %s3310_s24 = smov 128   ;;  %s3311_s21 = smov 8  }
  0x64   :  { %58 = dma.hbm_to_vmem [thread:$0]  %s3839_s2, 512, %s53_s1, [#allocation9], %s3310_s24, %s3310_s24, %s3311_s21  }
  0x65   :  { %s3312_s30 = smov [#allocation13]   ;;  %s3313_s22 = smov [#allocation16]  }
  0x66   :  { %s74_s6 = sshll.u32 %s3312_s30, 4  ;;  %s98_s19 = sshll.u32 %s3313_s22, 4  ;;  %s75_s6 = int_to_ptr.vmem [resolvable:$true] %s74_s6  ;;  %s99_s19 = int_to_ptr.vmem [resolvable:$true] %s98_s19 }
  0x67   :  { %s3181_s20 = scalar_lea.hbm %s3841_s4, 2048 }
  0x68   :  { %p3182_p12 = scmp.ne.s32.totalorder %s3841_s4, %s3181_s20  ;;  %p3185_p13 = scmp.lt.u32.totalorder %s3181_s20, %s3841_s4 }
  0x6a   :  { %p3187_p0 = pnand %p3185_p13, %p3182_p12 }
  0x6c   :  { %3190 = shalt.err (!%p3187_p0)
}
  0x6d   :  { %s3191_s2 = scalar_lea.vmem %s75_s6, 2048  ;;  %p3196_p2 = scmp.lt.s32.totalorder %s75_s6, %s75_s6 }
  0x6e   :  { %p3192_p1 = scmp.ne.s32.totalorder %s75_s6, %s3191_s2  ;;  %p3197_p3 = scmp.lt.s32.totalorder %s3191_s2, %s3191_s2 }
  0x70   :  { %p3198_p4 = por %p3197_p3, %p3196_p2 }
  0x72   :  { %p3199_p5 = pnand %p3198_p4, %p3192_p1 }
  0x74   :  { %3202 = shalt.err (!%p3199_p5)
}
  0x75   :  { %80 = dma.hbm_to_vmem [thread:$0]  %s3841_s4, 2048, %s75_s6, [#allocation12], %s3310_s24, %s3310_s24, %s3311_s21  }
  0x76   :  { %s3203_s30 = scalar_lea.hbm %s3844_s7, 8192 }
  0x77   :  { %p3204_p6 = scmp.ne.s32.totalorder %s3844_s7, %s3203_s30  ;;  %p3207_p7 = scmp.lt.u32.totalorder %s3203_s30, %s3844_s7 }
  0x79   :  { %p3209_p8 = pnand %p3207_p7, %p3204_p6 }
  0x7b   :  { %3212 = shalt.err (!%p3209_p8)
}
  0x7c   :  { %s3213_s25 = scalar_lea.vmem %s99_s19, 8192  ;;  %p3218_p10 = scmp.lt.s32.totalorder %s99_s19, %s99_s19 }
  0x7d   :  { %p3214_p9 = scmp.ne.s32.totalorder %s99_s19, %s3213_s25  ;;  %p3219_p11 = scmp.lt.s32.totalorder %s3213_s25, %s3213_s25 }
  0x7f   :  { %p3220_p12 = por %p3219_p11, %p3218_p10 }
  0x81   :  { %p3221_p13 = pnand %p3220_p12, %p3214_p9 }
  0x83   :  { %3224 = shalt.err (!%p3221_p13)
}
  0x84   :  { %s3314_s4 = smov 256   ;;  %s3315_s24 = smov 16  }
  0x85   :  { %104 = dma.hbm_to_vmem [thread:$0]  %s3844_s7, 8192, %s99_s19, [#allocation15], %s3314_s4, %s3314_s4, %s3315_s24  }
  0x86   :  { %3291 = dma.done.wait [#allocation6], 128  }
  0x87   :  { %3292 = vsyncadd [#allocation6], 4294967168 }
  0x88   :  { %3293 = dma.done.wait [#allocation9], 640  }
  0x89   :  { %3294 = vsyncadd [#allocation9], 4294966656 }
  0x8a   :  { %3295 = dma.done.wait [#allocation12], 2064  }
  0x8b   :  { %3296 = vsyncadd [#allocation12], 4294965232 }
  0x8c   :  { %3297 = dma.done.wait [#allocation15], 8224  }
  0x8d   :  { %3298 = vsyncadd [#allocation15], 4294959072  ;;  %v3316_v0 = vmov 0.0|0.0   ;;  %vm3317_vm0 = vmmov 0   ;;  %v3318_v1 = vmov 0.0   ;;  %v154_v2 = vld [vmem:[#allocation10] sm:$0xff] }
  0x8e   :  { %2868 = vmatprep.subr.bf16.mxu0 %v3316_v0  ;;  %2865 = vmatprep.mubr.msk.f32.mxu0 %vm3317_vm0, %v3318_v1  ;;  %v155_v3 = vld [vmem:[#allocation10 + $0x8] sm:$0xff]  ;;  %v156_v4 = vld [vmem:[#allocation10 + $0x10] sm:$0xff]  ;;  %v157_v6 = vld [vmem:[#allocation10 + $0x18] sm:$0xff]  ;;  %vm158_vm1 = vcmask 261120   ;;  %v3319_v25 = vmov 0   ;;  %s3225_s2 = scalar_lea.hbm %s3847_s10, 16384 }
  0x8f   :  { %v2869_v5 = vpack.c.bf16 %v155_v3, %v154_v2  ;;  %v2919_v7 = vld [vmem:[#allocation13 + $0x4] ss:$8 sps:$4 sm:$0xff]   ;;  %v2921_v8 = vld [vmem:[#allocation13] ss:$8 sps:$4 sm:$0xff]   ;;  %v2872_v9 = vpack.c.bf16 %v157_v6, %v156_v4  ;;  %v2922_v10 = vld [vmem:[#allocation13 + $0x14] ss:$8 sps:$4 sm:$0xff]   ;;  %373 = vmatprep.mubr.bf16.mxu1 %v3319_v25  ;;  %p3226_p0 = scmp.ne.s32.totalorder %s3847_s10, %s3225_s2  ;;  %p3229_p1 = scmp.lt.u32.totalorder %s3225_s2, %s3847_s10 }
  0x90   :  { %341 = vmatprep.subr.bf16.mxu1 %v2919_v7  ;;  %v2924_v11 = vld [vmem:[#allocation13 + $0x10] ss:$8 sps:$4 sm:$0xff]   ;;  %v2925_v12 = vld [vmem:[#allocation13 + $0x24] ss:$8 sps:$4 sm:$0xff]   ;;  %v2927_v14 = vld [vmem:[#allocation13 + $0x20] ss:$8 sps:$4 sm:$0xff]  }
  0x91   :  { %2870 = vmatpush3.bf16.msra.mxu0 %v2869_v5  ;;  %342 = vmatpush1.bf16.msra.mxu1 %v2921_v8  ;;  %v153_v13 = vld [vmem:[#allocation8] sm:$0xff]  ;;  %v2931_v17 = vld [vmem:[#allocation13 + $0x44] ss:$8 sps:$4 sm:$0xff]   ;;  %v2933_v18 = vld [vmem:[#allocation13 + $0x40] ss:$8 sps:$4 sm:$0xff]   ;;  %p3231_p2 = pnand %p3229_p1, %p3226_p0 }
  0x92   :  { %2871 = vmatprep.subr.bf16.mxu0 %v3316_v0  ;;  %343 = vmatprep.subr.bf16.mxu1 %v2922_v10  ;;  %v2928_v15 = vld [vmem:[#allocation13 + $0x34] ss:$8 sps:$4 sm:$0xff]   ;;  %v2930_v16 = vld [vmem:[#allocation13 + $0x30] ss:$8 sps:$4 sm:$0xff]   ;;  %v2937_v21 = vld [vmem:[#allocation13 + $0x64] ss:$8 sps:$4 sm:$0xff]  }
  0x93   :  { %v2934_v19 = vld [vmem:[#allocation13 + $0x54] ss:$8 sps:$4 sm:$0xff]   ;;  %v2936_v20 = vld [vmem:[#allocation13 + $0x50] ss:$8 sps:$4 sm:$0xff]   ;;  %v2939_v22 = vld [vmem:[#allocation13 + $0x60] ss:$8 sps:$4 sm:$0xff]  }
  0x94   :  { %v2940_v23 = vld [vmem:[#allocation13 + $0x74] ss:$8 sps:$4 sm:$0xff]   ;;  %v2942_v24 = vld [vmem:[#allocation13 + $0x70] ss:$8 sps:$4 sm:$0xff]  }
  0x95   :  { %2873 = vmatpush3.bf16.msra.mxu0 %v2872_v9  ;;  %344 = vmatpush1.bf16.msra.mxu1 %v2924_v11  ;;  %v152_v26 = vld [vmem:[#allocation5] sm:$0xff]  ;;  %v2769_v28 = vld [vmem:[#allocation11] ss:$0 sm:$0xff]  ;;  %v2945_v35 = vld [vmem:[#allocation16 + $0x4] ss:$16 sps:$4 sm:$0xff]  }
  0x96   :  { %345 = vmatprep.subr.bf16.mxu1 %v2925_v12  ;;  %v2943_v36 = vld [vmem:[#allocation16] ss:$16 sps:$4 sm:$0xff]   ;;  %v2948_v37 = vld [vmem:[#allocation16 + $0x24] ss:$16 sps:$4 sm:$0xff]   ;;  %v2993_v3 = vld [vmem:[#allocation16 + $0xc] ss:$16 sps:$4 sm:$0xff]  }
  0x97   :  { %v2946_v38 = vld [vmem:[#allocation16 + $0x20] ss:$16 sps:$4 sm:$0xff]   ;;  %v2951_v39 = vld [vmem:[#allocation16 + $0x44] ss:$16 sps:$4 sm:$0xff]  }
  0x98   :  { %2866 = vmatmul.mubr.msk.f32.vlgmr.msra.gmra.mrb[0].mxu0 %vm158_vm1, %v153_v13  ;;  %v2949_v40 = vld [vmem:[#allocation16 + $0x40] ss:$16 sps:$4 sm:$0xff]   ;;  %v2954_v41 = vld [vmem:[#allocation16 + $0x64] ss:$16 sps:$4 sm:$0xff]  }
  0x99   :  { %346 = vmatpush1.bf16.msra.mxu1 %v2927_v14  ;;  %v2952_v42 = vld [vmem:[#allocation16 + $0x60] ss:$16 sps:$4 sm:$0xff]   ;;  %v2957_v43 = vld [vmem:[#allocation16 + $0x84] ss:$16 sps:$4 sm:$0xff]  }
  0x9a   :  { %347 = vmatprep.subr.bf16.mxu1 %v2928_v15  ;;  %v2955_v44 = vld [vmem:[#allocation16 + $0x80] ss:$16 sps:$4 sm:$0xff]   ;;  %v2960_v45 = vld [vmem:[#allocation16 + $0xa4] ss:$16 sps:$4 sm:$0xff]  }
  0x9b   :  { %v2958_v46 = vld [vmem:[#allocation16 + $0xa0] ss:$16 sps:$4 sm:$0xff]   ;;  %v2963_v47 = vld [vmem:[#allocation16 + $0xc4] ss:$16 sps:$4 sm:$0xff]  }
  0x9c   :  { %v2961_v48 = vld [vmem:[#allocation16 + $0xc0] ss:$16 sps:$4 sm:$0xff]   ;;  %v2966_v49 = vld [vmem:[#allocation16 + $0xe4] ss:$16 sps:$4 sm:$0xff]  }
  0x9d   :  { %348 = vmatpush1.bf16.msra.mxu1 %v2930_v16  ;;  %v2964_v50 = vld [vmem:[#allocation16 + $0xe0] ss:$16 sps:$4 sm:$0xff]   ;;  %v2969_v51 = vld [vmem:[#allocation16 + $0x104] ss:$16 sps:$4 sm:$0xff]  }
  0x9e   :  { %349 = vmatprep.subr.bf16.mxu1 %v2931_v17  ;;  %v2967_v52 = vld [vmem:[#allocation16 + $0x100] ss:$16 sps:$4 sm:$0xff]   ;;  %v2972_v53 = vld [vmem:[#allocation16 + $0x124] ss:$16 sps:$4 sm:$0xff]  }
  0x9f   :  { %v2970_v54 = vld [vmem:[#allocation16 + $0x120] ss:$16 sps:$4 sm:$0xff]   ;;  %v2975_v55 = vld [vmem:[#allocation16 + $0x144] ss:$16 sps:$4 sm:$0xff]  }
  0xa0   :  { %v2973_v56 = vld [vmem:[#allocation16 + $0x140] ss:$16 sps:$4 sm:$0xff]   ;;  %v2978_v57 = vld [vmem:[#allocation16 + $0x164] ss:$16 sps:$4 sm:$0xff]  }
  0xa1   :  { %350 = vmatpush1.bf16.msra.mxu1 %v2933_v18  ;;  %v2976_v58 = vld [vmem:[#allocation16 + $0x160] ss:$16 sps:$4 sm:$0xff]   ;;  %v2981_v59 = vld [vmem:[#allocation16 + $0x184] ss:$16 sps:$4 sm:$0xff]  }
  0xa2   :  { %351 = vmatprep.subr.bf16.mxu1 %v2934_v19  ;;  %v2979_v60 = vld [vmem:[#allocation16 + $0x180] ss:$16 sps:$4 sm:$0xff]   ;;  %v2984_v61 = vld [vmem:[#allocation16 + $0x1a4] ss:$16 sps:$4 sm:$0xff]  }
  0xa3   :  { %v2982_v62 = vld [vmem:[#allocation16 + $0x1a0] ss:$16 sps:$4 sm:$0xff]   ;;  %v2987_v63 = vld [vmem:[#allocation16 + $0x1c4] ss:$16 sps:$4 sm:$0xff]  }
  0xa4   :  { %v2985_v0 = vld [vmem:[#allocation16 + $0x1c0] ss:$16 sps:$4 sm:$0xff]   ;;  %v2990_v2 = vld [vmem:[#allocation16 + $0x1e4] ss:$16 sps:$4 sm:$0xff]  }
  0xa5   :  { %352 = vmatpush1.bf16.msra.mxu1 %v2936_v20  ;;  %v2988_v1 = vld [vmem:[#allocation16 + $0x1e0] ss:$16 sps:$4 sm:$0xff]  }
  0xa6   :  { %353 = vmatprep.subr.bf16.mxu1 %v2937_v21 }
  0xa9   :  { %354 = vmatpush1.bf16.msra.mxu1 %v2939_v22 }
  0xaa   :  { %355 = vmatprep.subr.bf16.mxu1 %v2940_v23 }
  0xad   :  { %356 = vmatpush1.bf16.msra.mxu1 %v2942_v24 }
  0xae   :  { %879 = vmatprep.subr.bf16.mxu1 %v2945_v35 }
 0x16b   :  { %v228_v27 = vpop.f32.mrb[0].mxu0 }
 0x16c   :  { %v232_v29 = vadd.f32 %v228_v27, %v152_v26  ;;  %v2867_v30 = vpop.f32.mrb[1].mxu0 }
 0x16e   :  { %v240_v31 = vadd.f32 %v2769_v28, %v232_v29 }
 0x170   :  { %v242_v32 = vmul.f32 0.2, %v240_v31  ;;  %vm241_vm2 = vcmp.gt.f32.partialorder %v240_v31, 0.0 }
 0x172   :  { %v243_v33 = vsel %vm241_vm2, %v240_v31, %v242_v32 }
 0x173   :  { %v244_v34 = vpack.c.bf16 %v243_v33, %v243_v33 }
 0x175   :  { %374 = vmatmul.mubr.bf16.vlgmr.msra.gmra.mrb[0].mxu1 %v244_v34 }
 0x176   :  { %880 = vmatpush1.bf16.msra.mxu1 %v2943_v36 }
 0x177   :  { %881 = vmatprep.subr.bf16.mxu1 %v2948_v37 }
 0x17a   :  { %882 = vmatpush1.bf16.msra.mxu1 %v2946_v38 }
 0x17b   :  { %883 = vmatprep.subr.bf16.mxu1 %v2951_v39 }
 0x17e   :  { %884 = vmatpush1.bf16.msra.mxu1 %v2949_v40 }
 0x17f   :  { %885 = vmatprep.subr.bf16.mxu1 %v2954_v41 }
 0x182   :  { %886 = vmatpush1.bf16.msra.mxu1 %v2952_v42  ;;  %v3320_v42 = vmov 1966171168  }
 0x183   :  { %887 = vmatprep.subr.bf16.mxu1 %v2957_v43  ;;  %v425_v43 = vunpack.c.l.s4 %v3320_v42  ;;  %v3033_v42 = vld [vmem:[#allocation16 + $0x1c8] ss:$16 sps:$4 sm:$0xff]  }
 0x186   :  { %888 = vmatpush1.bf16.msra.mxu1 %v2955_v44  ;;  %v427_v44 = vlaneseq }
 0x187   :  { %889 = vmatprep.subr.bf16.mxu1 %v2960_v45  ;;  %v426_v45 = vunpack.c.0.s8 %v425_v43  ;;  %v3038_v43 = vld [vmem:[#allocation16 + $0x1ec] ss:$16 sps:$4 sm:$0xff]  }
 0x18a   :  { %890 = vmatpush1.bf16.msra.mxu1 %v2958_v46  ;;  %v3498_v46 = vshrl.u32 %v427_v44, 7  ;;  %v3036_v44 = vld [vmem:[#allocation16 + $0x1e8] ss:$16 sps:$4 sm:$0xff]  }
 0x18b   :  { %891 = vmatprep.subr.bf16.mxu1 %v2963_v47 }
 0x18e   :  { %892 = vmatpush1.bf16.msra.mxu1 %v2961_v48  ;;  %v3501_v48 = vsub.s32 %v426_v45, %v3498_v46 }
 0x18f   :  { %893 = vmatprep.subr.bf16.mxu1 %v2966_v49 }
 0x192   :  { %894 = vmatpush1.bf16.msra.mxu1 %v2964_v50 }
 0x193   :  { %895 = vmatprep.subr.bf16.mxu1 %v2969_v51 }
 0x196   :  { %896 = vmatpush1.bf16.msra.mxu1 %v2967_v52  ;;  %v382_v52 = vld [vmem:[%s3842_s5] sm:$0x3]  ;;  %s3321_s5 = smov [#allocation2]  }
 0x197   :  { %897 = vmatprep.subr.bf16.mxu1 %v2972_v53  ;;  %s148_s0 = sshll.u32 %s3321_s5, 4  ;;  %s149_s0 = int_to_ptr.vmem [resolvable:$true] %s148_s0 }
 0x19a   :  { %898 = vmatpush1.bf16.msra.mxu1 %v2970_v54  ;;  %v3509_v54 = vsub.s32 0, %v3498_v46 }
 0x19b   :  { %899 = vmatprep.subr.bf16.mxu1 %v2975_v55  ;;  %v3512_v55 = vsub.s32 1, %v3498_v46 }
 0x19e   :  { %900 = vmatpush1.bf16.msra.mxu1 %v2973_v56 }
 0x19f   :  { %901 = vmatprep.subr.bf16.mxu1 %v2978_v57 }
 0x1a2   :  { %902 = vmatpush1.bf16.msra.mxu1 %v2976_v58 }
 0x1a3   :  { %903 = vmatprep.subr.bf16.mxu1 %v2981_v59 }
 0x1a6   :  { %904 = vmatpush1.bf16.msra.mxu1 %v2979_v60 }
 0x1a7   :  { %905 = vmatprep.subr.bf16.mxu1 %v2984_v61 }
 0x1aa   :  { %906 = vmatpush1.bf16.msra.mxu1 %v2982_v62 }
 0x1ab   :  { %907 = vmatprep.subr.bf16.mxu1 %v2987_v63 }
 0x1ae   :  { %908 = vmatpush1.bf16.msra.mxu1 %v2985_v0 }
 0x1af   :  { %909 = vmatprep.subr.bf16.mxu1 %v2990_v2 }
 0x1b2   :  { %910 = vmatpush1.bf16.msra.mxu1 %v2988_v1  ;;  %v383_v1 = vld [vmem:[#allocation14] sm:$0x3] }
 0x1b3   :  { %920 = vmatprep.subr.bf16.mxu1 %v2993_v3 }
 0x248   :  { %v375_v4 = vpop.f32.mrb[0].mxu1 }
 0x249   :  { %v384_v5 = vrot.slane %v375_v4, 4  ;;  %v377_v6 = vpop.f32.mrb[1].mxu1 }
 0x24a   :  { %v390_v7 = vrot.slane %v377_v6, 4  ;;  %v379_v8 = vpop.f32.mrb[2].mxu1 }
 0x24b   :  { %v385_v9 = vadd.f32 %v384_v5, %v375_v4  ;;  %v380_v10 = vpop.f32.mrb[3].mxu1 }
 0x24c   :  { %v391_v11 = vadd.f32 %v390_v7, %v377_v6 }
 0x24d   :  { %v386_v12 = vrot.slane %v385_v9, 2 }
 0x24e   :  { %v392_v13 = vrot.slane %v391_v11, 2 }
 0x24f   :  { %v387_v14 = vadd.f32 %v386_v12, %v385_v9 }
 0x250   :  { %v393_v15 = vadd.f32 %v392_v13, %v391_v11  ;;  %v2991_v13 = vld [vmem:[#allocation16 + $0x8] ss:$16 sps:$4 sm:$0xff]  }
 0x251   :  { %v388_v16 = vrot.slane %v387_v14, 1 }
 0x252   :  { %v394_v17 = vrot.slane %v393_v15, 1 }
 0x253   :  { %v389_v18 = vadd.f32 %v388_v16, %v387_v14  ;;  %v2994_v16 = vld [vmem:[#allocation16 + $0x28] ss:$16 sps:$4 sm:$0xff]  }
 0x254   :  { %v395_v19 = vadd.f32 %v394_v17, %v393_v15  ;;  %v2996_v15 = vld [vmem:[#allocation16 + $0x2c] ss:$16 sps:$4 sm:$0xff]  }
 0x255   :  { %v397_v20 = vmul.f32 0.125, %v389_v18  ;;  %v2999_v17 = vld [vmem:[#allocation16 + $0x4c] ss:$16 sps:$4 sm:$0xff]   ;;  %v2997_v18 = vld [vmem:[#allocation16 + $0x48] ss:$16 sps:$4 sm:$0xff]  }
 0x256   :  { %v398_v21 = vmul.f32 0.125, %v395_v19  ;;  %v3002_v19 = vld [vmem:[#allocation16 + $0x6c] ss:$16 sps:$4 sm:$0xff]  }
 0x257   :  { %v399_v22 = vsub.f32 %v375_v4, %v397_v20 }
 0x258   :  { %v400_v23 = vsub.f32 %v377_v6, %v398_v21 }
 0x259   :  { %v401_v24 = vmul.f32 %v399_v22, %v399_v22  ;;  %v3003_v22 = vld [vmem:[#allocation16 + $0x88] ss:$16 sps:$4 sm:$0xff]  }
 0x25a   :  { %v402_v25 = vmul.f32 %v400_v23, %v400_v23  ;;  %v3008_v23 = vld [vmem:[#allocation16 + $0xac] ss:$16 sps:$4 sm:$0xff]  }
 0x25b   :  { %v403_v26 = vrot.slane %v401_v24, 4 }
 0x25c   :  { %v409_v27 = vrot.slane %v402_v25, 4 }
 0x25d   :  { %v404_v28 = vadd.f32 %v403_v26, %v401_v24  ;;  %v3006_v24 = vld [vmem:[#allocation16 + $0xa8] ss:$16 sps:$4 sm:$0xff]  }
 0x25e   :  { %v410_v29 = vadd.f32 %v409_v27, %v402_v25  ;;  %v3011_v25 = vld [vmem:[#allocation16 + $0xcc] ss:$16 sps:$4 sm:$0xff]   ;;  %v3009_v26 = vld [vmem:[#allocation16 + $0xc8] ss:$16 sps:$4 sm:$0xff]  }
 0x25f   :  { %v405_v30 = vrot.slane %v404_v28, 2  ;;  %v3014_v27 = vld [vmem:[#allocation16 + $0xec] ss:$16 sps:$4 sm:$0xff]  }
 0x260   :  { %v411_v31 = vrot.slane %v410_v29, 2 }
 0x261   :  { %v406_v32 = vadd.f32 %v405_v30, %v404_v28  ;;  %v3012_v28 = vld [vmem:[#allocation16 + $0xe8] ss:$16 sps:$4 sm:$0xff]  }
 0x262   :  { %v412_v33 = vadd.f32 %v411_v31, %v410_v29  ;;  %v3017_v29 = vld [vmem:[#allocation16 + $0x10c] ss:$16 sps:$4 sm:$0xff]   ;;  %v3015_v30 = vld [vmem:[#allocation16 + $0x108] ss:$16 sps:$4 sm:$0xff]  }
 0x263   :  { %v407_v34 = vrot.slane %v406_v32, 1  ;;  %v3020_v31 = vld [vmem:[#allocation16 + $0x12c] ss:$16 sps:$4 sm:$0xff]  }
 0x264   :  { %v413_v35 = vrot.slane %v412_v33, 1 }
 0x265   :  { %v408_v36 = vadd.f32 %v407_v34, %v406_v32  ;;  %v3018_v32 = vld [vmem:[#allocation16 + $0x128] ss:$16 sps:$4 sm:$0xff]  }
 0x266   :  { %v414_v37 = vadd.f32 %v413_v35, %v412_v33  ;;  %v3023_v33 = vld [vmem:[#allocation16 + $0x14c] ss:$16 sps:$4 sm:$0xff]   ;;  %v3021_v34 = vld [vmem:[#allocation16 + $0x148] ss:$16 sps:$4 sm:$0xff]  }
 0x267   :  { %v415_v38 = vmul.f32 0.125, %v408_v36  ;;  %v3026_v35 = vld [vmem:[#allocation16 + $0x16c] ss:$16 sps:$4 sm:$0xff]   ;;  %v3024_v36 = vld [vmem:[#allocation16 + $0x168] ss:$16 sps:$4 sm:$0xff]  }
 0x268   :  { %v416_v39 = vmul.f32 0.125, %v414_v37  ;;  %v3029_v37 = vld [vmem:[#allocation16 + $0x18c] ss:$16 sps:$4 sm:$0xff]  }
 0x269   :  { %v417_v40 = vadd.f32 0.8, %v415_v38  ;;  %v3027_v38 = vld [vmem:[#allocation16 + $0x188] ss:$16 sps:$4 sm:$0xff]  }
 0x26a   :  { %v418_v41 = vadd.f32 0.8, %v416_v39  ;;  %v3032_v39 = vld [vmem:[#allocation16 + $0x1ac] ss:$16 sps:$4 sm:$0xff]  }
 0x26b   :  { %3039 = vrsqrt.f32 %v417_v40  ;;  %v3030_v40 = vld [vmem:[#allocation16 + $0x1a8] ss:$16 sps:$4 sm:$0xff]  }
 0x26c   :  { %3041 = vrsqrt.f32 %v418_v41  ;;  %v3035_v41 = vld [vmem:[#allocation16 + $0x1cc] ss:$16 sps:$4 sm:$0xff]  }
 0x275   :  { %v3040_v47 = vpop.eup %3039 }
 0x276   :  { %v3042_v49 = vpop.eup %3041 }
 0x277   :  { %v423_v50 = vcombine.low %v3040_v47, %v3042_v49 }
 0x279   :  { %v430_v51 = vrot.slane %v423_v50, %v3501_v48 }
 0x27b   :  { %v437_v53 = vrot.slane %v430_v51, %v3501_v48 }
 0x27d   :  { %v439_v56 = vmul.f32 %v437_v53, %v382_v52 }
 0x27f   :  { %v444_v57 = vrot.slane %v439_v56, %v3509_v54  ;;  %v448_v58 = vrot.slane %v439_v56, %v3512_v55 }
 0x281   :  { %v451_v59 = vmul.f32 %v444_v57, %v397_v20  ;;  %v452_v60 = vmul.f32 %v448_v58, %v398_v21  ;;  %v472_v61 = vmul.f32 %v444_v57, %v375_v4  ;;  %v473_v62 = vmul.f32 %v448_v58, %v377_v6  ;;  %v3000_v20 = vld [vmem:[#allocation16 + $0x68] ss:$16 sps:$4 sm:$0xff]   ;;  %v3005_v21 = vld [vmem:[#allocation16 + $0x8c] ss:$16 sps:$4 sm:$0xff]  }
 0x283   :  { %v455_v63 = vcombine.low %v451_v59, %v452_v60 }
 0x285   :  { %v462_v0 = vrot.slane %v455_v63, %v3501_v48 }
 0x287   :  { %v469_v2 = vrot.slane %v462_v0, %v3501_v48 }
 0x289   :  { %v471_v3 = vsub.f32 %v383_v1, %v469_v2 }
 0x28b   :  { %v478_v5 = vrot.slane %v471_v3, %v3509_v54  ;;  %v482_v7 = vrot.slane %v471_v3, %v3512_v55 }
 0x28d   :  { %v486_v8 = vadd.f32 %v482_v7, %v473_v62  ;;  %v485_v9 = vadd.f32 %v478_v5, %v472_v61 }
 0x28f   :  { %vm488_vm3 = vcmp.gt.f32.partialorder %v486_v8, 0.0  ;;  %v490_v10 = vmul.f32 0.2, %v486_v8  ;;  %vm487_vm4 = vcmp.gt.f32.partialorder %v485_v9, 0.0  ;;  %v489_v11 = vmul.f32 0.2, %v485_v9 }
 0x291   :  { %v492_v12 = vsel %vm488_vm3, %v486_v8, %v490_v10  ;;  %v491_v4 = vsel %vm487_vm4, %v485_v9, %v489_v11 }
 0x292   :  { %v494_v6 = vpack.c.bf16 %v492_v12, %v492_v12  ;;  %v3520_v14 = vpack.c.bf16 %v491_v4, %v491_v4 }
 0x294   :  { %911 = vmatprep.mubr.bf16.mxu1 %v494_v6 }
 0x295   :  { %912 = vmatmul.mubr.bf16.vlgmr.msra.gmra.mrb[4].mxu1 %v3520_v14 }
 0x296   :  { %921 = vmatpush1.bf16.msra.mxu1 %v2991_v13  ;;  %952 = vmatprep.mubr.bf16.mxu1 %v494_v6 }
 0x297   :  { %922 = vmatprep.subr.bf16.mxu1 %v2996_v15 }
 0x29a   :  { %923 = vmatpush1.bf16.msra.mxu1 %v2994_v16 }
 0x29b   :  { %924 = vmatprep.subr.bf16.mxu1 %v2999_v17 }
 0x29e   :  { %925 = vmatpush1.bf16.msra.mxu1 %v2997_v18 }
 0x29f   :  { %926 = vmatprep.subr.bf16.mxu1 %v3002_v19 }
 0x2a2   :  { %927 = vmatpush1.bf16.msra.mxu1 %v3000_v20 }
 0x2a3   :  { %928 = vmatprep.subr.bf16.mxu1 %v3005_v21 }
 0x2a6   :  { %929 = vmatpush1.bf16.msra.mxu1 %v3003_v22 }
 0x2a7   :  { %930 = vmatprep.subr.bf16.mxu1 %v3008_v23 }
 0x2aa   :  { %931 = vmatpush1.bf16.msra.mxu1 %v3006_v24 }
 0x2ab   :  { %932 = vmatprep.subr.bf16.mxu1 %v3011_v25 }
 0x2ae   :  { %933 = vmatpush1.bf16.msra.mxu1 %v3009_v26 }
 0x2af   :  { %934 = vmatprep.subr.bf16.mxu1 %v3014_v27 }
 0x2b2   :  { %935 = vmatpush1.bf16.msra.mxu1 %v3012_v28 }
 0x2b3   :  { %936 = vmatprep.subr.bf16.mxu1 %v3017_v29 }
 0x2b6   :  { %937 = vmatpush1.bf16.msra.mxu1 %v3015_v30 }
 0x2b7   :  { %938 = vmatprep.subr.bf16.mxu1 %v3020_v31 }
 0x2ba   :  { %939 = vmatpush1.bf16.msra.mxu1 %v3018_v32 }
 0x2bb   :  { %940 = vmatprep.subr.bf16.mxu1 %v3023_v33 }
 0x2be   :  { %941 = vmatpush1.bf16.msra.mxu1 %v3021_v34 }
 0x2bf   :  { %942 = vmatprep.subr.bf16.mxu1 %v3026_v35 }
 0x2c2   :  { %943 = vmatpush1.bf16.msra.mxu1 %v3024_v36 }
 0x2c3   :  { %944 = vmatprep.subr.bf16.mxu1 %v3029_v37 }
 0x2c6   :  { %945 = vmatpush1.bf16.msra.mxu1 %v3027_v38 }
 0x2c7   :  { %946 = vmatprep.subr.bf16.mxu1 %v3032_v39 }
 0x2ca   :  { %947 = vmatpush1.bf16.msra.mxu1 %v3030_v40 }
 0x2cb   :  { %948 = vmatprep.subr.bf16.mxu1 %v3035_v41 }
 0x2ce   :  { %949 = vmatpush1.bf16.msra.mxu1 %v3033_v42 }
 0x2cf   :  { %950 = vmatprep.subr.bf16.mxu1 %v3038_v43 }
 0x2d2   :  { %951 = vmatpush1.bf16.msra.mxu1 %v3036_v44 }
 0x2d5   :  { %953 = vmatmul.mubr.bf16.vlgmr.msra.gmra.mrb[8].mxu1 %v3520_v14 }
 0x368   :  { %v3524_v45 = vpop.f32.mrb[4].mxu1 }
 0x369   :  { %v963_v47 = vrot.slane %v3524_v45, 4  ;;  %v3527_v49 = vpop.f32.mrb[5].mxu1 }
 0x36a   :  { %v969_v50 = vrot.slane %v3527_v49, 4  ;;  %v917_v51 = vpop.f32.mrb[6].mxu1 }
 0x36b   :  { %v964_v52 = vadd.f32 %v963_v47, %v3524_v45  ;;  %v918_v53 = vpop.f32.mrb[7].mxu1 }
 0x36c   :  { %v970_v56 = vadd.f32 %v969_v50, %v3527_v49 }
 0x36d   :  { %v965_v57 = vrot.slane %v964_v52, 2 }
 0x36e   :  { %v971_v58 = vrot.slane %v970_v56, 2 }
 0x36f   :  { %v966_v59 = vadd.f32 %v965_v57, %v964_v52 }
 0x370   :  { %v972_v60 = vadd.f32 %v971_v58, %v970_v56 }
 0x371   :  { %v967_v61 = vrot.slane %v966_v59, 1 }
 0x372   :  { %v973_v62 = vrot.slane %v972_v60, 1 }
 0x373   :  { %v968_v63 = vadd.f32 %v967_v61, %v966_v59 }
 0x374   :  { %v974_v0 = vadd.f32 %v973_v62, %v972_v60 }
 0x375   :  { %v3532_v1 = vmul.f32 0.125, %v968_v63 }
 0x376   :  { %v3534_v2 = vmul.f32 0.125, %v974_v0 }
 0x377   :  { %v991_v3 = vsub.f32 %v3524_v45, %v3532_v1 }
 0x378   :  { %3234 = shalt.err (!%p3231_p2)  }
 0x379   :  { %s3235_s30 = scalar_lea.vmem %s149_s0, 16384  ;;  %p3240_p4 = scmp.lt.s32.totalorder %s149_s0, %s149_s0 }
 0x37a   :  { %p3236_p3 = scmp.ne.s32.totalorder %s149_s0, %s3235_s30  ;;  %p3241_p5 = scmp.lt.s32.totalorder %s3235_s30, %s3235_s30 }
 0x37c   :  { %p3242_p6 = por %p3241_p5, %p3240_p4 }
 0x37e   :  { %p3243_p7 = pnand %p3242_p6, %p3236_p3 }
 0x380   :  { %3246 = shalt.err (!%p3243_p7)  }
 0x381   :  { %151 = dma.hbm_to_vmem [thread:$0]  %s3847_s10, 16384, %s149_s0, [#allocation4]  ;;  %v992_v5 = vsub.f32 %v3527_v49, %v3534_v2  ;;  %v995_v7 = vmul.f32 %v991_v3, %v991_v3 }
 0x383   :  { %v996_v8 = vmul.f32 %v992_v5, %v992_v5  ;;  %v999_v9 = vrot.slane %v995_v7, 4 }
 0x385   :  { %v1005_v10 = vrot.slane %v996_v8, 4  ;;  %v1000_v11 = vadd.f32 %v999_v9, %v995_v7 }
 0x387   :  { %v1006_v12 = vadd.f32 %v1005_v10, %v996_v8  ;;  %v1001_v4 = vrot.slane %v1000_v11, 2 }
 0x389   :  { %v1007_v6 = vrot.slane %v1006_v12, 2  ;;  %v1002_v13 = vadd.f32 %v1001_v4, %v1000_v11 }
 0x38b   :  { %v1008_v14 = vadd.f32 %v1007_v6, %v1006_v12  ;;  %v1003_v15 = vrot.slane %v1002_v13, 1 }
 0x38d   :  { %v1009_v16 = vrot.slane %v1008_v14, 1  ;;  %v1004_v17 = vadd.f32 %v1003_v15, %v1002_v13 }
 0x38f   :  { %v1010_v18 = vadd.f32 %v1009_v16, %v1008_v14  ;;  %v1023_v19 = vmul.f32 0.125, %v1004_v17  ;;  %v961_v14 = vld [vmem:[%s3845_s8] sm:$0xf]  ;;  %v3559_v16 = vsub.s32 2, %v3498_v46  ;;  %v3562_v17 = vsub.s32 3, %v3498_v46 }
 0x391   :  { %v1024_v20 = vmul.f32 0.125, %v1010_v18  ;;  %v1027_v21 = vadd.f32 0.8, %v1023_v19 }
 0x393   :  { %v1028_v22 = vadd.f32 0.8, %v1024_v20  ;;  %3043 = vrsqrt.f32 %v1027_v21 }
 0x395   :  { %3045 = vrsqrt.f32 %v1028_v22 }
 0x39d   :  { %v3044_v23 = vpop.eup %3043 }
 0x39f   :  { %v3046_v24 = vpop.eup %3045 }
 0x3a0   :  { %v1039_v25 = vcombine.low %v3044_v23, %v3046_v24 }
 0x3a2   :  { %v1047_v4 = vrot.slane %v1039_v25, %v3501_v48 }
 0x3a8   :  { %v954_v26 = vpop.f32.mrb[8].mxu1 }
 0x3a9   :  { %v975_v27 = vrot.slane %v954_v26, 4  ;;  %v956_v28 = vpop.f32.mrb[9].mxu1 }
 0x3aa   :  { %v981_v29 = vrot.slane %v956_v28, 4  ;;  %v958_v30 = vpop.f32.mrb[10].mxu1 }
 0x3ab   :  { %v976_v31 = vadd.f32 %v975_v27, %v954_v26  ;;  %v959_v32 = vpop.f32.mrb[11].mxu1 }
 0x3ac   :  { %v982_v33 = vadd.f32 %v981_v29, %v956_v28 }
 0x3ad   :  { %v977_v34 = vrot.slane %v976_v31, 2 }
 0x3ae   :  { %v983_v35 = vrot.slane %v982_v33, 2 }
 0x3af   :  { %v978_v36 = vadd.f32 %v977_v34, %v976_v31 }
 0x3b0   :  { %v984_v37 = vadd.f32 %v983_v35, %v982_v33 }
 0x3b1   :  { %v979_v38 = vrot.slane %v978_v36, 1 }
 0x3b2   :  { %v985_v39 = vrot.slane %v984_v37, 1 }
 0x3b3   :  { %v980_v40 = vadd.f32 %v979_v38, %v978_v36 }
 0x3b4   :  { %v986_v41 = vadd.f32 %v985_v39, %v984_v37 }
 0x3b5   :  { %v989_v42 = vmul.f32 0.125, %v980_v40 }
 0x3b6   :  { %v990_v43 = vmul.f32 0.125, %v986_v41 }
 0x3b7   :  { %v993_v44 = vsub.f32 %v954_v26, %v989_v42 }
 0x3b8   :  { %v994_v47 = vsub.f32 %v956_v28, %v990_v43 }
 0x3b9   :  { %v997_v50 = vmul.f32 %v993_v44, %v993_v44 }
 0x3ba   :  { %v998_v51 = vmul.f32 %v994_v47, %v994_v47 }
 0x3bb   :  { %v1011_v52 = vrot.slane %v997_v50, 4 }
 0x3bc   :  { %v1017_v53 = vrot.slane %v998_v51, 4 }
 0x3bd   :  { %v1012_v56 = vadd.f32 %v1011_v52, %v997_v50 }
 0x3be   :  { %v1018_v57 = vadd.f32 %v1017_v53, %v998_v51 }
 0x3bf   :  { %v1013_v58 = vrot.slane %v1012_v56, 2 }
 0x3c0   :  { %v1019_v59 = vrot.slane %v1018_v57, 2 }
 0x3c1   :  { %v1014_v60 = vadd.f32 %v1013_v58, %v1012_v56 }
 0x3c2   :  { %v1020_v61 = vadd.f32 %v1019_v59, %v1018_v57 }
 0x3c3   :  { %v1015_v62 = vrot.slane %v1014_v60, 1 }
 0x3c4   :  { %v1021_v63 = vrot.slane %v1020_v61, 1 }
 0x3c5   :  { %v1016_v0 = vadd.f32 %v1015_v62, %v1014_v60 }
 0x3c6   :  { %v1022_v3 = vadd.f32 %v1021_v63, %v1020_v61 }
 0x3c7   :  { %v1025_v5 = vmul.f32 0.125, %v1016_v0 }
 0x3c8   :  { %v1026_v7 = vmul.f32 0.125, %v1022_v3 }
 0x3c9   :  { %v1029_v8 = vadd.f32 0.8, %v1025_v5 }
 0x3ca   :  { %v1030_v9 = vadd.f32 0.8, %v1026_v7 }
 0x3cb   :  { %3047 = vrsqrt.f32 %v1029_v8 }
 0x3cc   :  { %3049 = vrsqrt.f32 %v1030_v9 }
 0x3d5   :  { %v3048_v10 = vpop.eup %3047 }
 0x3d6   :  { %v3050_v11 = vpop.eup %3049 }
 0x3d7   :  { %v1040_v12 = vcombine.low %v3048_v10, %v3050_v11 }
 0x3d9   :  { %v1054_v6 = vrot.slane %v1040_v12, %v3501_v48 }
 0x3db   :  { %v1055_v13 = vcombine.low %v1047_v4, %v1054_v6 }
 0x3dd   :  { %v1062_v15 = vrot.slane %v1055_v13, %v3501_v48 }
 0x3df   :  { %v1064_v18 = vmul.f32 %v1062_v15, %v961_v14 }
 0x3e1   :  { %v1069_v19 = vrot.slane %v1064_v18, %v3509_v54  ;;  %v1073_v20 = vrot.slane %v1064_v18, %v3512_v55  ;;  %v1077_v21 = vrot.slane %v1064_v18, %v3559_v16  ;;  %v1081_v22 = vrot.slane %v1064_v18, %v3562_v17 }
 0x3e3   :  { %v1086_v23 = vmul.f32 %v1069_v19, %v3532_v1  ;;  %v1087_v24 = vmul.f32 %v1073_v20, %v3534_v2  ;;  %v1088_v25 = vmul.f32 %v1077_v21, %v989_v42  ;;  %v1089_v27 = vmul.f32 %v1081_v22, %v990_v43  ;;  %v962_v1 = vld [vmem:[%s3846_s9] sm:$0xf] }
 0x3e4   :  { %v1120_v29 = vmul.f32 %v1069_v19, %v3524_v45  ;;  %v1121_v30 = vmul.f32 %v1073_v20, %v3527_v49  ;;  %v1122_v31 = vmul.f32 %v1077_v21, %v954_v26  ;;  %v1123_v32 = vmul.f32 %v1081_v22, %v956_v28 }
 0x3e5   :  { %v1094_v33 = vcombine.low %v1086_v23, %v1087_v24  ;;  %v1095_v34 = vcombine.low %v1088_v25, %v1089_v27 }
 0x3e7   :  { %v1102_v35 = vrot.slane %v1094_v33, %v3501_v48  ;;  %v1109_v36 = vrot.slane %v1095_v34, %v3501_v48 }
 0x3e9   :  { %v1110_v37 = vcombine.low %v1102_v35, %v1109_v36 }
 0x3eb   :  { %v1117_v2 = vrot.slane %v1110_v37, %v3501_v48 }
 0x3ed   :  { %v1119_v38 = vsub.f32 %v962_v1, %v1117_v2 }
 0x3ef   :  { %v1128_v45 = vrot.slane %v1119_v38, %v3509_v54  ;;  %v1132_v49 = vrot.slane %v1119_v38, %v3512_v55  ;;  %v1136_v26 = vrot.slane %v1119_v38, %v3559_v16  ;;  %v1140_v28 = vrot.slane %v1119_v38, %v3562_v17 }
 0x3f1   :  { %v1145_v39 = vadd.f32 %v1128_v45, %v1120_v29  ;;  %v1146_v40 = vadd.f32 %v1132_v49, %v1121_v30  ;;  %v1147_v41 = vadd.f32 %v1136_v26, %v1122_v31  ;;  %v1148_v42 = vadd.f32 %v1140_v28, %v1123_v32 }
 0x3f3   :  { %vm1149_vm5 = vcmp.gt.f32.partialorder %v1145_v39, 0.0  ;;  %vm1150_vm6 = vcmp.gt.f32.partialorder %v1146_v40, 0.0  ;;  %vm1151_vm7 = vcmp.gt.f32.partialorder %v1147_v41, 0.0  ;;  %vm1152_vm8 = vcmp.gt.f32.partialorder %v1148_v42, 0.0 }
 0x3f4   :  { %v1153_v43 = vmul.f32 0.2, %v1145_v39  ;;  %v1154_v44 = vmul.f32 0.2, %v1146_v40  ;;  %v1155_v47 = vmul.f32 0.2, %v1147_v41 }
 0x3f5   :  { %v1156_v50 = vmul.f32 0.2, %v1148_v42 }
 0x3f6   :  { %v3582_v51 = vsel %vm1149_vm5, %v1145_v39, %v1153_v43  ;;  %v1158_v52 = vsel %vm1150_vm6, %v1146_v40, %v1154_v44  ;;  %v3584_v53 = vsel %vm1151_vm7, %v1147_v41, %v1155_v47 }
 0x3f7   :  { %v1160_v56 = vsel %vm1152_vm8, %v1148_v42, %v1156_v50 }
 0x3f8   :  { %3299 = dma.done.wait [#allocation4], 16384 }
 0x3f9   :  { %3300 = vsyncadd [#allocation4], 4294950912  ;;  %v3586_v57 = vpack.c.bf16 %v1158_v52, %v1158_v52  ;;  %v3588_v58 = vpack.c.bf16 %v1160_v56, %v1160_v56  ;;  %v1178_v59 = vld [vmem:[#allocation2 + $0x8] sm:$0xff]  ;;  %v1177_v61 = vld [vmem:[#allocation2] sm:$0xff]  ;;  %s3247_s6 = scalar_lea.hbm %s3851_s14, 8192 }
 0x3fa   :  { %v1242_v60 = vld [vmem:[#allocation2 + $0x208] sm:$0xff]  ;;  %v1306_v62 = vunpack.c.l.s8.bf16 %v1178_v59  ;;  %v1314_v63 = vunpack.c.h.s8.bf16 %v1178_v59  ;;  %v1241_v5 = vld [vmem:[#allocation2 + $0x200] sm:$0xff]  ;;  %v1305_v7 = vunpack.c.l.s8.bf16 %v1177_v61  ;;  %v1313_v11 = vunpack.c.h.s8.bf16 %v1177_v61  ;;  %p3248_p8 = scmp.ne.s32.totalorder %s3851_s14, %s3247_s6  ;;  %p3251_p9 = scmp.lt.u32.totalorder %s3247_s6, %s3851_s14 }
 0x3fb   :  { %1597 = vmatprep.mubr.bf16.mxu1 %v3586_v57  ;;  %1638 = vmatprep.mubr.bf16.mxu0 %v3588_v58  ;;  %v1434_v0 = vunpack.c.l.s8.bf16 %v1242_v60  ;;  %v1442_v3 = vunpack.c.h.s8.bf16 %v1242_v60  ;;  %v1433_v8 = vunpack.c.l.s8.bf16 %v1241_v5  ;;  %v1186_v9 = vld [vmem:[#allocation2 + $0x48] sm:$0xff]  ;;  %v1441_v12 = vunpack.c.h.s8.bf16 %v1241_v5  ;;  %v1185_v13 = vld [vmem:[#allocation2 + $0x40] sm:$0xff] }
 0x3fc   :  { %v1250_v10 = vld [vmem:[#allocation2 + $0x248] sm:$0xff]  ;;  %1565 = vmatprep.subr.bf16.mxu1 %v1306_v62  ;;  %v1322_v4 = vunpack.c.l.s8.bf16 %v1186_v9  ;;  %v1249_v14 = vld [vmem:[#allocation2 + $0x240] sm:$0xff]  ;;  %v1321_v15 = vunpack.c.l.s8.bf16 %v1185_v13  ;;  %v1330_v19 = vunpack.c.h.s8.bf16 %v1186_v9  ;;  %v1329_v23 = vunpack.c.h.s8.bf16 %v1185_v13  ;;  %p3253_p10 = pnand %p3251_p9, %p3248_p8 }
 0x3fd   :  { %1606 = vmatprep.subr.bf16.mxu0 %v1434_v0  ;;  %1566 = vmatpush1.bf16.msra.mxu1 %v1305_v7  ;;  %v1450_v6 = vunpack.c.l.s8.bf16 %v1250_v10  ;;  %v1449_v18 = vunpack.c.l.s8.bf16 %v1249_v14  ;;  %v1458_v20 = vunpack.c.h.s8.bf16 %v1250_v10  ;;  %v1194_v21 = vld [vmem:[#allocation2 + $0x88] sm:$0xff]  ;;  %v1457_v24 = vunpack.c.h.s8.bf16 %v1249_v14  ;;  %v1193_v29 = vld [vmem:[#allocation2 + $0x80] sm:$0xff] }
 0x3fe   :  { %1607 = vmatpush1.bf16.msra.mxu0 %v1433_v8  ;;  %1567 = vmatprep.subr.bf16.mxu1 %v1314_v63  ;;  %v1258_v22 = vld [vmem:[#allocation2 + $0x288] sm:$0xff]  ;;  %v1338_v25 = vunpack.c.l.s8.bf16 %v1194_v21  ;;  %v1257_v30 = vld [vmem:[#allocation2 + $0x280] sm:$0xff]  ;;  %v1337_v31 = vunpack.c.l.s8.bf16 %v1193_v29  ;;  %v1346_v33 = vunpack.c.h.s8.bf16 %v1194_v21  ;;  %v1345_v37 = vunpack.c.h.s8.bf16 %v1193_v29 }
 0x3ff   :  { %1608 = vmatprep.subr.bf16.mxu0 %v1442_v3  ;;  %v1466_v27 = vunpack.c.l.s8.bf16 %v1258_v22  ;;  %v1465_v32 = vunpack.c.l.s8.bf16 %v1257_v30  ;;  %v1474_v34 = vunpack.c.h.s8.bf16 %v1258_v22  ;;  %v1202_v35 = vld [vmem:[#allocation2 + $0xc8] sm:$0xff]  ;;  %v1473_v1 = vunpack.c.h.s8.bf16 %v1257_v30  ;;  %v1201_v45 = vld [vmem:[#allocation2 + $0xc0] sm:$0xff] }
 0x400   :  { %v1266_v36 = vld [vmem:[#allocation2 + $0x2c8] sm:$0xff]  ;;  %v1354_v2 = vunpack.c.l.s8.bf16 %v1202_v35  ;;  %v1265_v49 = vld [vmem:[#allocation2 + $0x2c0] sm:$0xff]  ;;  %v1353_v26 = vunpack.c.l.s8.bf16 %v1201_v45  ;;  %v1362_v39 = vunpack.c.h.s8.bf16 %v1202_v35  ;;  %v1361_v43 = vunpack.c.h.s8.bf16 %v1201_v45  ;;  %v1180_v45 = vld [vmem:[#allocation2 + $0x18] sm:$0xff] }
 0x401   :  { %1568 = vmatpush1.bf16.msra.mxu1 %v1313_v11  ;;  %v1482_v38 = vunpack.c.l.s8.bf16 %v1266_v36  ;;  %v1481_v28 = vunpack.c.l.s8.bf16 %v1265_v49  ;;  %v1490_v40 = vunpack.c.h.s8.bf16 %v1266_v36  ;;  %v1210_v41 = vld [vmem:[#allocation2 + $0x108] sm:$0xff]  ;;  %v1489_v44 = vunpack.c.h.s8.bf16 %v1265_v49  ;;  %v1209_v52 = vld [vmem:[#allocation2 + $0x100] sm:$0xff] }
 0x402   :  { %1609 = vmatpush1.bf16.msra.mxu0 %v1441_v12  ;;  %1569 = vmatprep.subr.bf16.mxu1 %v1322_v4  ;;  %v1274_v42 = vld [vmem:[#allocation2 + $0x308] sm:$0xff]  ;;  %v1370_v47 = vunpack.c.l.s8.bf16 %v1210_v41  ;;  %v1273_v56 = vld [vmem:[#allocation2 + $0x300] sm:$0xff]  ;;  %v1369_v59 = vunpack.c.l.s8.bf16 %v1209_v52  ;;  %v1378_v61 = vunpack.c.h.s8.bf16 %v1210_v41  ;;  %v1377_v3 = vunpack.c.h.s8.bf16 %v1209_v52 }
 0x403   :  { %1610 = vmatprep.subr.bf16.mxu0 %v1450_v6  ;;  %v1498_v50 = vunpack.c.l.s8.bf16 %v1274_v42  ;;  %v1497_v60 = vunpack.c.l.s8.bf16 %v1273_v56  ;;  %v1506_v62 = vunpack.c.h.s8.bf16 %v1274_v42  ;;  %v1218_v63 = vld [vmem:[#allocation2 + $0x148] sm:$0xff]  ;;  %v1505_v5 = vunpack.c.h.s8.bf16 %v1273_v56  ;;  %v1217_v9 = vld [vmem:[#allocation2 + $0x140] sm:$0xff] }
 0x404   :  { %v1282_v0 = vld [vmem:[#allocation2 + $0x348] sm:$0xff]  ;;  %v1386_v7 = vunpack.c.l.s8.bf16 %v1218_v63  ;;  %v1281_v10 = vld [vmem:[#allocation2 + $0x340] sm:$0xff]  ;;  %v1385_v11 = vunpack.c.l.s8.bf16 %v1217_v9  ;;  %v1394_v4 = vunpack.c.h.s8.bf16 %v1218_v63  ;;  %v1316_v52 = vunpack.c.h.s8.bf16 %v1180_v45 }
 0x405   :  { %1570 = vmatpush1.bf16.msra.mxu1 %v1321_v15  ;;  %v1514_v8 = vunpack.c.l.s8.bf16 %v1282_v0  ;;  %v1513_v12 = vunpack.c.l.s8.bf16 %v1281_v10  ;;  %v1522_v6 = vunpack.c.h.s8.bf16 %v1282_v0  ;;  %v1226_v13 = vld [vmem:[#allocation2 + $0x188] sm:$0xff]  ;;  %v1393_v15 = vunpack.c.h.s8.bf16 %v1217_v9  ;;  %v1225_v21 = vld [vmem:[#allocation2 + $0x180] sm:$0xff]  ;;  %v1196_v9 = vld [vmem:[#allocation2 + $0x98] sm:$0xff] }
 0x406   :  { %1611 = vmatpush1.bf16.msra.mxu0 %v1449_v18  ;;  %1571 = vmatprep.subr.bf16.mxu1 %v1330_v19  ;;  %v1290_v14 = vld [vmem:[#allocation2 + $0x388] sm:$0xff]  ;;  %v1521_v18 = vunpack.c.h.s8.bf16 %v1281_v10  ;;  %v1402_v19 = vunpack.c.l.s8.bf16 %v1226_v13  ;;  %v1289_v22 = vld [vmem:[#allocation2 + $0x380] sm:$0xff] }
 0x407   :  { %1612 = vmatprep.subr.bf16.mxu0 %v1458_v20  ;;  %v1530_v20 = vunpack.c.l.s8.bf16 %v1290_v14  ;;  %v1234_v29 = vld [vmem:[#allocation2 + $0x1c8] sm:$0xff]  ;;  %v1233_v35 = vld [vmem:[#allocation2 + $0x1c0] sm:$0xff] }
 0x408   :  { %v1298_v30 = vld [vmem:[#allocation2 + $0x3c8] sm:$0xff]  ;;  %v1297_v36 = vld [vmem:[#allocation2 + $0x3c0] sm:$0xff] }
 0x409   :  { %1572 = vmatpush1.bf16.msra.mxu1 %v1329_v23  ;;  %v1401_v23 = vunpack.c.l.s8.bf16 %v1225_v21  ;;  %v1182_v49 = vld [vmem:[#allocation2 + $0x28] sm:$0xff]  ;;  %v1181_v42 = vld [vmem:[#allocation2 + $0x20] sm:$0xff] }
 0x40a   :  { %1613 = vmatpush1.bf16.msra.mxu0 %v1457_v24  ;;  %1573 = vmatprep.subr.bf16.mxu1 %v1338_v25  ;;  %v1529_v24 = vunpack.c.l.s8.bf16 %v1289_v22  ;;  %v1410_v25 = vunpack.c.h.s8.bf16 %v1226_v13  ;;  %v1310_v41 = vunpack.c.l.s8.bf16 %v1182_v49  ;;  %v1318_v56 = vunpack.c.h.s8.bf16 %v1182_v49  ;;  %v1189_v0 = vld [vmem:[#allocation2 + $0x60] sm:$0xff]  ;;  %v1198_v10 = vld [vmem:[#allocation2 + $0xa8] sm:$0xff] }
 0x40b   :  { %1614 = vmatprep.subr.bf16.mxu0 %v1466_v27  ;;  %v1538_v27 = vunpack.c.h.s8.bf16 %v1290_v14  ;;  %v1342_v13 = vunpack.c.l.s8.bf16 %v1198_v10  ;;  %v1197_v14 = vld [vmem:[#allocation2 + $0xa0] sm:$0xff] }
 0x40c   :  { %v1213_v49 = vld [vmem:[#allocation2 + $0x120] sm:$0xff] }
 0x40d   :  { %1574 = vmatpush1.bf16.msra.mxu1 %v1337_v31  ;;  %v1409_v31 = vunpack.c.h.s8.bf16 %v1225_v21  ;;  %v1204_v21 = vld [vmem:[#allocation2 + $0xd8] sm:$0xff] }
 0x40e   :  { %1615 = vmatpush1.bf16.msra.mxu0 %v1465_v32  ;;  %1575 = vmatprep.subr.bf16.mxu1 %v1346_v33  ;;  %v1537_v32 = vunpack.c.h.s8.bf16 %v1289_v22  ;;  %v1418_v33 = vunpack.c.l.s8.bf16 %v1234_v29  ;;  %v1206_v22 = vld [vmem:[#allocation2 + $0xe8] sm:$0xff] }
 0x40f   :  { %1616 = vmatprep.subr.bf16.mxu0 %v1474_v34  ;;  %v1546_v34 = vunpack.c.l.s8.bf16 %v1298_v30 }
 0x411   :  { %1576 = vmatpush1.bf16.msra.mxu1 %v1345_v37  ;;  %v1417_v37 = vunpack.c.l.s8.bf16 %v1233_v35 }
 0x412   :  { %1617 = vmatpush1.bf16.msra.mxu0 %v1473_v1  ;;  %1577 = vmatprep.subr.bf16.mxu1 %v1354_v2  ;;  %v1545_v1 = vunpack.c.l.s8.bf16 %v1297_v36  ;;  %v1426_v2 = vunpack.c.h.s8.bf16 %v1234_v29  ;;  %v1358_v29 = vunpack.c.l.s8.bf16 %v1206_v22 }
 0x413   :  { %1618 = vmatprep.subr.bf16.mxu0 %v1482_v38  ;;  %v1554_v38 = vunpack.c.h.s8.bf16 %v1298_v30  ;;  %v1205_v30 = vld [vmem:[#allocation2 + $0xe0] sm:$0xff] }
 0x415   :  { %1578 = vmatpush1.bf16.msra.mxu1 %v1353_v26  ;;  %v1425_v26 = vunpack.c.h.s8.bf16 %v1233_v35  ;;  %v1212_v35 = vld [vmem:[#allocation2 + $0x118] sm:$0xff] }
 0x416   :  { %1619 = vmatpush1.bf16.msra.mxu0 %v1481_v28  ;;  %1579 = vmatprep.subr.bf16.mxu1 %v1362_v39  ;;  %v1553_v28 = vunpack.c.h.s8.bf16 %v1297_v36  ;;  %v1308_v39 = vunpack.c.l.s8.bf16 %v1180_v45  ;;  %v1214_v36 = vld [vmem:[#allocation2 + $0x128] sm:$0xff] }
 0x417   :  { %1620 = vmatprep.subr.bf16.mxu0 %v1490_v40  ;;  %v1179_v40 = vld [vmem:[#allocation2 + $0x10] sm:$0xff]  ;;  %v1374_v45 = vunpack.c.l.s8.bf16 %v1214_v36 }
 0x419   :  { %1580 = vmatpush1.bf16.msra.mxu1 %v1361_v43  ;;  %v3594_v43 = vpack.c.bf16 %v3582_v51, %v3582_v51  ;;  %v1315_v51 = vunpack.c.h.s8.bf16 %v1179_v40 }
 0x41a   :  { %1621 = vmatpush1.bf16.msra.mxu0 %v1489_v44  ;;  %1581 = vmatprep.subr.bf16.mxu1 %v1370_v47  ;;  %v3598_v44 = vpack.c.bf16 %v3584_v53, %v3584_v53  ;;  %v1307_v47 = vunpack.c.l.s8.bf16 %v1179_v40  ;;  %v1382_v40 = vunpack.c.h.s8.bf16 %v1214_v36  ;;  %v1245_v36 = vld [vmem:[#allocation2 + $0x220] sm:$0xff] }
 0x41b   :  { %1622 = vmatprep.subr.bf16.mxu0 %v1498_v50  ;;  %v1309_v50 = vunpack.c.l.s8.bf16 %v1181_v42 }
 0x41d   :  { %1582 = vmatpush1.bf16.msra.mxu1 %v1369_v59  ;;  %v1188_v59 = vld [vmem:[#allocation2 + $0x58] sm:$0xff] }
 0x41e   :  { %1623 = vmatpush1.bf16.msra.mxu0 %v1497_v60  ;;  %1583 = vmatprep.subr.bf16.mxu1 %v1378_v61  ;;  %v1190_v60 = vld [vmem:[#allocation2 + $0x68] sm:$0xff]  ;;  %v1317_v61 = vunpack.c.h.s8.bf16 %v1181_v42  ;;  %v1324_v53 = vunpack.c.l.s8.bf16 %v1188_v59 }
 0x41f   :  { %1624 = vmatprep.subr.bf16.mxu0 %v1506_v62  ;;  %v1187_v62 = vld [vmem:[#allocation2 + $0x50] sm:$0xff]  ;;  %v1326_v63 = vunpack.c.l.s8.bf16 %v1190_v60  ;;  %v1222_v42 = vld [vmem:[#allocation2 + $0x168] sm:$0xff] }
 0x421   :  { %1584 = vmatpush1.bf16.msra.mxu1 %v1377_v3  ;;  %v1323_v3 = vunpack.c.l.s8.bf16 %v1187_v62 }
 0x422   :  { %1625 = vmatpush1.bf16.msra.mxu0 %v1505_v5  ;;  %1585 = vmatprep.subr.bf16.mxu1 %v1386_v7  ;;  %v1325_v5 = vunpack.c.l.s8.bf16 %v1189_v0  ;;  %v1332_v7 = vunpack.c.h.s8.bf16 %v1188_v59  ;;  %v1390_v59 = vunpack.c.l.s8.bf16 %v1222_v42 }
 0x423   :  { %1626 = vmatprep.subr.bf16.mxu0 %v1514_v8  ;;  %v1334_v8 = vunpack.c.h.s8.bf16 %v1190_v60  ;;  %v1221_v60 = vld [vmem:[#allocation2 + $0x160] sm:$0xff] }
 0x425   :  { %1586 = vmatpush1.bf16.msra.mxu1 %v1385_v11  ;;  %v1331_v11 = vunpack.c.h.s8.bf16 %v1187_v62  ;;  %v1398_v62 = vunpack.c.h.s8.bf16 %v1222_v42  ;;  %v1253_v42 = vld [vmem:[#allocation2 + $0x260] sm:$0xff] }
 0x426   :  { %1627 = vmatpush1.bf16.msra.mxu0 %v1513_v12  ;;  %1587 = vmatprep.subr.bf16.mxu1 %v1394_v4  ;;  %v1333_v12 = vunpack.c.h.s8.bf16 %v1189_v0  ;;  %v1340_v4 = vunpack.c.l.s8.bf16 %v1196_v9  ;;  %v1230_v0 = vld [vmem:[#allocation2 + $0x1a8] sm:$0xff] }
 0x427   :  { %1628 = vmatprep.subr.bf16.mxu0 %v1522_v6  ;;  %v1195_v6 = vld [vmem:[#allocation2 + $0x90] sm:$0xff] }
 0x429   :  { %1588 = vmatpush1.bf16.msra.mxu1 %v1393_v15  ;;  %v1339_v15 = vunpack.c.l.s8.bf16 %v1195_v6 }
 0x42a   :  { %1629 = vmatpush1.bf16.msra.mxu0 %v1521_v18  ;;  %1589 = vmatprep.subr.bf16.mxu1 %v1402_v19  ;;  %v1341_v18 = vunpack.c.l.s8.bf16 %v1197_v14  ;;  %v1348_v19 = vunpack.c.h.s8.bf16 %v1196_v9  ;;  %v1406_v9 = vunpack.c.l.s8.bf16 %v1230_v0 }
 0x42b   :  { %1630 = vmatprep.subr.bf16.mxu0 %v1530_v20  ;;  %v1350_v20 = vunpack.c.h.s8.bf16 %v1198_v10  ;;  %v1229_v10 = vld [vmem:[#allocation2 + $0x1a0] sm:$0xff] }
 0x42d   :  { %1590 = vmatpush1.bf16.msra.mxu1 %v1401_v23  ;;  %v1347_v23 = vunpack.c.h.s8.bf16 %v1195_v6  ;;  %v1414_v6 = vunpack.c.h.s8.bf16 %v1230_v0  ;;  %v1261_v0 = vld [vmem:[#allocation2 + $0x2a0] sm:$0xff] }
 0x42e   :  { %1631 = vmatpush1.bf16.msra.mxu0 %v1529_v24  ;;  %1591 = vmatprep.subr.bf16.mxu1 %v1410_v25  ;;  %v1349_v24 = vunpack.c.h.s8.bf16 %v1197_v14  ;;  %v1356_v25 = vunpack.c.l.s8.bf16 %v1204_v21  ;;  %v1238_v14 = vld [vmem:[#allocation2 + $0x1e8] sm:$0xff] }
 0x42f   :  { %1632 = vmatprep.subr.bf16.mxu0 %v1538_v27  ;;  %v1203_v27 = vld [vmem:[#allocation2 + $0xd0] sm:$0xff] }
 0x431   :  { %1592 = vmatpush1.bf16.msra.mxu1 %v1409_v31  ;;  %v1355_v31 = vunpack.c.l.s8.bf16 %v1203_v27 }
 0x432   :  { %1633 = vmatpush1.bf16.msra.mxu0 %v1537_v32  ;;  %1593 = vmatprep.subr.bf16.mxu1 %v1418_v33  ;;  %v1357_v32 = vunpack.c.l.s8.bf16 %v1205_v30  ;;  %v1364_v33 = vunpack.c.h.s8.bf16 %v1204_v21  ;;  %v1422_v21 = vunpack.c.l.s8.bf16 %v1238_v14 }
 0x433   :  { %1634 = vmatprep.subr.bf16.mxu0 %v1546_v34  ;;  %v1366_v34 = vunpack.c.h.s8.bf16 %v1206_v22  ;;  %v1237_v22 = vld [vmem:[#allocation2 + $0x1e0] sm:$0xff] }
 0x435   :  { %1594 = vmatpush1.bf16.msra.mxu1 %v1417_v37  ;;  %v1363_v37 = vunpack.c.h.s8.bf16 %v1203_v27  ;;  %v1430_v27 = vunpack.c.h.s8.bf16 %v1238_v14  ;;  %v1269_v14 = vld [vmem:[#allocation2 + $0x2e0] sm:$0xff] }
 0x436   :  { %1635 = vmatpush1.bf16.msra.mxu0 %v1545_v1  ;;  %1595 = vmatprep.subr.bf16.mxu1 %v1426_v2  ;;  %v1365_v1 = vunpack.c.h.s8.bf16 %v1205_v30  ;;  %v1372_v2 = vunpack.c.l.s8.bf16 %v1212_v35  ;;  %v1246_v30 = vld [vmem:[#allocation2 + $0x228] sm:$0xff] }
 0x437   :  { %1636 = vmatprep.subr.bf16.mxu0 %v1554_v38  ;;  %v1211_v38 = vld [vmem:[#allocation2 + $0x110] sm:$0xff] }
 0x439   :  { %1596 = vmatpush1.bf16.msra.mxu1 %v1425_v26  ;;  %v1371_v26 = vunpack.c.l.s8.bf16 %v1211_v38 }
 0x43a   :  { %1637 = vmatpush1.bf16.msra.mxu0 %v1553_v28  ;;  %1647 = vmatprep.subr.bf16.mxu1 %v1308_v39  ;;  %v1373_v28 = vunpack.c.l.s8.bf16 %v1213_v49  ;;  %v1380_v39 = vunpack.c.h.s8.bf16 %v1212_v35  ;;  %v1438_v35 = vunpack.c.l.s8.bf16 %v1246_v30 }
 0x43b   :  { %1729 = vmatprep.subr.bf16.mxu0 %v1310_v41  ;;  %v1220_v41 = vld [vmem:[#allocation2 + $0x158] sm:$0xff] }
 0x43c   :  { %1598 = vmatmul.mubr.bf16.vlgmr.msra.gmra.mrb[12].mxu1 %v3594_v43 }
 0x43d   :  { %1639 = vmatmul.mubr.bf16.vlgmr.msra.gmra.mrb[4].mxu0 %v3598_v44  ;;  %1648 = vmatpush1.bf16.msra.mxu1 %v1307_v47  ;;  %v1379_v47 = vunpack.c.h.s8.bf16 %v1211_v38  ;;  %v1446_v38 = vunpack.c.h.s8.bf16 %v1246_v30  ;;  %v1277_v30 = vld [vmem:[#allocation2 + $0x320] sm:$0xff] }
 0x43e   :  { %1730 = vmatpush1.bf16.msra.mxu0 %v1309_v50  ;;  %1649 = vmatprep.subr.bf16.mxu1 %v1316_v52  ;;  %v1381_v50 = vunpack.c.h.s8.bf16 %v1213_v49  ;;  %v1388_v52 = vunpack.c.l.s8.bf16 %v1220_v41  ;;  %v1254_v49 = vld [vmem:[#allocation2 + $0x268] sm:$0xff] }
 0x43f   :  { %1731 = vmatprep.subr.bf16.mxu0 %v1318_v56  ;;  %1679 = vmatprep.mubr.bf16.mxu1 %v3586_v57  ;;  %v1219_v56 = vld [vmem:[#allocation2 + $0x150] sm:$0xff] }
 0x440   :  { %1761 = vmatprep.mubr.bf16.mxu0 %v3586_v57 }
 0x441   :  { %1650 = vmatpush1.bf16.msra.mxu1 %v1315_v51  ;;  %v1387_v51 = vunpack.c.l.s8.bf16 %v1219_v56 }
 0x442   :  { %1732 = vmatpush1.bf16.msra.mxu0 %v1317_v61  ;;  %1651 = vmatprep.subr.bf16.mxu1 %v1324_v53  ;;  %v1389_v61 = vunpack.c.l.s8.bf16 %v1221_v60  ;;  %v1396_v53 = vunpack.c.h.s8.bf16 %v1220_v41  ;;  %v1454_v41 = vunpack.c.l.s8.bf16 %v1254_v49 }
 0x443   :  { %1733 = vmatprep.subr.bf16.mxu0 %v1326_v63  ;;  %v1228_v63 = vld [vmem:[#allocation2 + $0x198] sm:$0xff] }
 0x445   :  { %1652 = vmatpush1.bf16.msra.mxu1 %v1323_v3  ;;  %v1395_v3 = vunpack.c.h.s8.bf16 %v1219_v56  ;;  %v1462_v56 = vunpack.c.h.s8.bf16 %v1254_v49  ;;  %v1285_v49 = vld [vmem:[#allocation2 + $0x360] sm:$0xff] }
 0x446   :  { %1734 = vmatpush1.bf16.msra.mxu0 %v1325_v5  ;;  %1653 = vmatprep.subr.bf16.mxu1 %v1332_v7  ;;  %v1397_v5 = vunpack.c.h.s8.bf16 %v1221_v60  ;;  %v1404_v7 = vunpack.c.l.s8.bf16 %v1228_v63  ;;  %v1262_v60 = vld [vmem:[#allocation2 + $0x2a8] sm:$0xff] }
 0x447   :  { %1735 = vmatprep.subr.bf16.mxu0 %v1334_v8  ;;  %v1227_v8 = vld [vmem:[#allocation2 + $0x190] sm:$0xff] }
 0x449   :  { %1654 = vmatpush1.bf16.msra.mxu1 %v1331_v11  ;;  %v1403_v11 = vunpack.c.l.s8.bf16 %v1227_v8 }
 0x44a   :  { %1736 = vmatpush1.bf16.msra.mxu0 %v1333_v12  ;;  %1655 = vmatprep.subr.bf16.mxu1 %v1340_v4  ;;  %v1405_v12 = vunpack.c.l.s8.bf16 %v1229_v10  ;;  %v1412_v4 = vunpack.c.h.s8.bf16 %v1228_v63  ;;  %v1470_v63 = vunpack.c.l.s8.bf16 %v1262_v60 }
 0x44b   :  { %1737 = vmatprep.subr.bf16.mxu0 %v1342_v13  ;;  %v1236_v13 = vld [vmem:[#allocation2 + $0x1d8] sm:$0xff] }
 0x44d   :  { %1656 = vmatpush1.bf16.msra.mxu1 %v1339_v15  ;;  %v1411_v15 = vunpack.c.h.s8.bf16 %v1227_v8  ;;  %v1478_v8 = vunpack.c.h.s8.bf16 %v1262_v60  ;;  %v1293_v60 = vld [vmem:[#allocation2 + $0x3a0] sm:$0xff] }
 0x44e   :  { %1738 = vmatpush1.bf16.msra.mxu0 %v1341_v18  ;;  %1657 = vmatprep.subr.bf16.mxu1 %v1348_v19  ;;  %v1413_v18 = vunpack.c.h.s8.bf16 %v1229_v10  ;;  %v1420_v19 = vunpack.c.l.s8.bf16 %v1236_v13  ;;  %v1270_v10 = vld [vmem:[#allocation2 + $0x2e8] sm:$0xff] }
 0x44f   :  { %1739 = vmatprep.subr.bf16.mxu0 %v1350_v20  ;;  %v1235_v20 = vld [vmem:[#allocation2 + $0x1d0] sm:$0xff] }
 0x451   :  { %1658 = vmatpush1.bf16.msra.mxu1 %v1347_v23  ;;  %v1419_v23 = vunpack.c.l.s8.bf16 %v1235_v20 }
 0x452   :  { %1740 = vmatpush1.bf16.msra.mxu0 %v1349_v24  ;;  %1659 = vmatprep.subr.bf16.mxu1 %v1356_v25  ;;  %v1421_v24 = vunpack.c.l.s8.bf16 %v1237_v22  ;;  %v1428_v25 = vunpack.c.h.s8.bf16 %v1236_v13  ;;  %v1486_v13 = vunpack.c.l.s8.bf16 %v1270_v10 }
 0x453   :  { %1741 = vmatprep.subr.bf16.mxu0 %v1358_v29  ;;  %v1244_v29 = vld [vmem:[#allocation2 + $0x218] sm:$0xff] }
 0x455   :  { %1660 = vmatpush1.bf16.msra.mxu1 %v1355_v31  ;;  %v1427_v31 = vunpack.c.h.s8.bf16 %v1235_v20  ;;  %v1494_v20 = vunpack.c.h.s8.bf16 %v1270_v10  ;;  %v1301_v10 = vld [vmem:[#allocation2 + $0x3e0] sm:$0xff] }
 0x456   :  { %1742 = vmatpush1.bf16.msra.mxu0 %v1357_v32  ;;  %1661 = vmatprep.subr.bf16.mxu1 %v1364_v33  ;;  %v1429_v32 = vunpack.c.h.s8.bf16 %v1237_v22  ;;  %v1436_v33 = vunpack.c.l.s8.bf16 %v1244_v29  ;;  %v1278_v22 = vld [vmem:[#allocation2 + $0x328] sm:$0xff] }
 0x457   :  { %1743 = vmatprep.subr.bf16.mxu0 %v1366_v34  ;;  %v1243_v34 = vld [vmem:[#allocation2 + $0x210] sm:$0xff] }
 0x459   :  { %1662 = vmatpush1.bf16.msra.mxu1 %v1363_v37  ;;  %v1435_v37 = vunpack.c.l.s8.bf16 %v1243_v34 }
 0x45a   :  { %1744 = vmatpush1.bf16.msra.mxu0 %v1365_v1  ;;  %1663 = vmatprep.subr.bf16.mxu1 %v1372_v2  ;;  %v1437_v1 = vunpack.c.l.s8.bf16 %v1245_v36  ;;  %v1444_v2 = vunpack.c.h.s8.bf16 %v1244_v29  ;;  %v1502_v29 = vunpack.c.l.s8.bf16 %v1278_v22 }
 0x45b   :  { %1745 = vmatprep.subr.bf16.mxu0 %v1374_v45  ;;  %v1252_v45 = vld [vmem:[#allocation2 + $0x258] sm:$0xff] }
 0x45d   :  { %1664 = vmatpush1.bf16.msra.mxu1 %v1371_v26  ;;  %v1443_v26 = vunpack.c.h.s8.bf16 %v1243_v34  ;;  %v1510_v34 = vunpack.c.h.s8.bf16 %v1278_v22  ;;  %v1192_v22 = vld [vmem:[#allocation2 + $0x78] sm:$0xff] }
 0x45e   :  { %1746 = vmatpush1.bf16.msra.mxu0 %v1373_v28  ;;  %1665 = vmatprep.subr.bf16.mxu1 %v1380_v39  ;;  %v1445_v28 = vunpack.c.h.s8.bf16 %v1245_v36  ;;  %v1452_v39 = vunpack.c.l.s8.bf16 %v1252_v45  ;;  %v1286_v36 = vld [vmem:[#allocation2 + $0x368] sm:$0xff] }
 0x45f   :  { %1747 = vmatprep.subr.bf16.mxu0 %v1382_v40  ;;  %v1251_v40 = vld [vmem:[#allocation2 + $0x250] sm:$0xff] }
 0x461   :  { %1666 = vmatpush1.bf16.msra.mxu1 %v1379_v47  ;;  %v1451_v47 = vunpack.c.l.s8.bf16 %v1251_v40 }
 0x462   :  { %1748 = vmatpush1.bf16.msra.mxu0 %v1381_v50  ;;  %1667 = vmatprep.subr.bf16.mxu1 %v1388_v52  ;;  %v1453_v50 = vunpack.c.l.s8.bf16 %v1253_v42  ;;  %v1460_v52 = vunpack.c.h.s8.bf16 %v1252_v45  ;;  %v1518_v45 = vunpack.c.l.s8.bf16 %v1286_v36 }
 0x463   :  { %1749 = vmatprep.subr.bf16.mxu0 %v1390_v59  ;;  %v1260_v59 = vld [vmem:[#allocation2 + $0x298] sm:$0xff] }
 0x465   :  { %1668 = vmatpush1.bf16.msra.mxu1 %v1387_v51  ;;  %v1459_v51 = vunpack.c.h.s8.bf16 %v1251_v40  ;;  %v1526_v40 = vunpack.c.h.s8.bf16 %v1286_v36  ;;  %v1208_v36 = vld [vmem:[#allocation2 + $0xf8] sm:$0xff] }
 0x466   :  { %1750 = vmatpush1.bf16.msra.mxu0 %v1389_v61  ;;  %1669 = vmatprep.subr.bf16.mxu1 %v1396_v53  ;;  %v1461_v61 = vunpack.c.h.s8.bf16 %v1253_v42  ;;  %v1468_v53 = vunpack.c.l.s8.bf16 %v1260_v59  ;;  %v1294_v42 = vld [vmem:[#allocation2 + $0x3a8] sm:$0xff] }
 0x467   :  { %1751 = vmatprep.subr.bf16.mxu0 %v1398_v62  ;;  %v1259_v62 = vld [vmem:[#allocation2 + $0x290] sm:$0xff] }
 0x469   :  { %1670 = vmatpush1.bf16.msra.mxu1 %v1395_v3  ;;  %v1467_v3 = vunpack.c.l.s8.bf16 %v1259_v62 }
 0x46a   :  { %1752 = vmatpush1.bf16.msra.mxu0 %v1397_v5  ;;  %1671 = vmatprep.subr.bf16.mxu1 %v1404_v7  ;;  %v1469_v5 = vunpack.c.l.s8.bf16 %v1261_v0  ;;  %v1476_v7 = vunpack.c.h.s8.bf16 %v1260_v59  ;;  %v1534_v59 = vunpack.c.l.s8.bf16 %v1294_v42 }
 0x46b   :  { %1753 = vmatprep.subr.bf16.mxu0 %v1406_v9  ;;  %v1268_v9 = vld [vmem:[#allocation2 + $0x2d8] sm:$0xff] }
 0x46d   :  { %1672 = vmatpush1.bf16.msra.mxu1 %v1403_v11  ;;  %v1475_v11 = vunpack.c.h.s8.bf16 %v1259_v62  ;;  %v1542_v62 = vunpack.c.h.s8.bf16 %v1294_v42 }
 0x46e   :  { %1754 = vmatpush1.bf16.msra.mxu0 %v1405_v12  ;;  %1673 = vmatprep.subr.bf16.mxu1 %v1412_v4  ;;  %v1477_v12 = vunpack.c.h.s8.bf16 %v1261_v0  ;;  %v1484_v4 = vunpack.c.l.s8.bf16 %v1268_v9  ;;  %v1302_v0 = vld [vmem:[#allocation2 + $0x3e8] sm:$0xff] }
 0x46f   :  { %1755 = vmatprep.subr.bf16.mxu0 %v1414_v6  ;;  %v1267_v6 = vld [vmem:[#allocation2 + $0x2d0] sm:$0xff] }
 0x471   :  { %1674 = vmatpush1.bf16.msra.mxu1 %v1411_v15  ;;  %v1483_v15 = vunpack.c.l.s8.bf16 %v1267_v6 }
 0x472   :  { %1756 = vmatpush1.bf16.msra.mxu0 %v1413_v18  ;;  %1675 = vmatprep.subr.bf16.mxu1 %v1420_v19  ;;  %v1485_v18 = vunpack.c.l.s8.bf16 %v1269_v14  ;;  %v1492_v19 = vunpack.c.h.s8.bf16 %v1268_v9  ;;  %v1550_v9 = vunpack.c.l.s8.bf16 %v1302_v0 }
 0x473   :  { %1757 = vmatprep.subr.bf16.mxu0 %v1422_v21  ;;  %v1276_v21 = vld [vmem:[#allocation2 + $0x318] sm:$0xff] }
 0x475   :  { %1676 = vmatpush1.bf16.msra.mxu1 %v1419_v23  ;;  %v1491_v23 = vunpack.c.h.s8.bf16 %v1267_v6  ;;  %v1558_v6 = vunpack.c.h.s8.bf16 %v1302_v0 }
 0x476   :  { %1758 = vmatpush1.bf16.msra.mxu0 %v1421_v24  ;;  %1677 = vmatprep.subr.bf16.mxu1 %v1428_v25  ;;  %v1493_v24 = vunpack.c.h.s8.bf16 %v1269_v14  ;;  %v1500_v25 = vunpack.c.l.s8.bf16 %v1276_v21 }
 0x477   :  { %1759 = vmatprep.subr.bf16.mxu0 %v1430_v27  ;;  %v1275_v27 = vld [vmem:[#allocation2 + $0x310] sm:$0xff] }
 0x479   :  { %1678 = vmatpush1.bf16.msra.mxu1 %v1427_v31  ;;  %v1499_v31 = vunpack.c.l.s8.bf16 %v1275_v27 }
 0x47a   :  { %1760 = vmatpush1.bf16.msra.mxu0 %v1429_v32  ;;  %1688 = vmatprep.subr.bf16.mxu1 %v1436_v33  ;;  %v1501_v32 = vunpack.c.l.s8.bf16 %v1277_v30  ;;  %v1508_v33 = vunpack.c.h.s8.bf16 %v1276_v21 }
 0x47b   :  { %1770 = vmatprep.subr.bf16.mxu0 %v1438_v35  ;;  %v1284_v35 = vld [vmem:[#allocation2 + $0x358] sm:$0xff] }
 0x47c   :  { %1680 = vmatmul.mubr.bf16.vlgmr.msra.gmra.mrb[16].mxu1 %v3594_v43 }
 0x47d   :  { %1762 = vmatmul.mubr.bf16.vlgmr.msra.gmra.mrb[8].mxu0 %v3594_v43  ;;  %1689 = vmatpush1.bf16.msra.mxu1 %v1435_v37  ;;  %v1507_v37 = vunpack.c.h.s8.bf16 %v1275_v27 }
 0x47e   :  { %1771 = vmatpush1.bf16.msra.mxu0 %v1437_v1  ;;  %1690 = vmatprep.subr.bf16.mxu1 %v1444_v2  ;;  %v1509_v1 = vunpack.c.h.s8.bf16 %v1277_v30  ;;  %v1516_v2 = vunpack.c.l.s8.bf16 %v1284_v35  ;;  %v1200_v30 = vld [vmem:[#allocation2 + $0xb8] sm:$0xff] }
 0x47f   :  { %1772 = vmatprep.subr.bf16.mxu0 %v1446_v38  ;;  %1720 = vmatprep.mubr.bf16.mxu1 %v3588_v58  ;;  %v1283_v38 = vld [vmem:[#allocation2 + $0x350] sm:$0xff] }
 0x480   :  { %1802 = vmatprep.mubr.bf16.mxu0 %v3588_v58 }
 0x481   :  { %1691 = vmatpush1.bf16.msra.mxu1 %v1443_v26  ;;  %v1515_v26 = vunpack.c.l.s8.bf16 %v1283_v38 }
 0x482   :  { %1773 = vmatpush1.bf16.msra.mxu0 %v1445_v28  ;;  %1692 = vmatprep.subr.bf16.mxu1 %v1452_v39  ;;  %v1517_v28 = vunpack.c.l.s8.bf16 %v1285_v49  ;;  %v1524_v39 = vunpack.c.h.s8.bf16 %v1284_v35  ;;  %v1352_v35 = vunpack.c.h.s8.bf16 %v1200_v30 }
 0x483   :  { %1774 = vmatprep.subr.bf16.mxu0 %v1454_v41  ;;  %v1292_v41 = vld [vmem:[#allocation2 + $0x398] sm:$0xff] }
 0x485   :  { %1693 = vmatpush1.bf16.msra.mxu1 %v1451_v47  ;;  %v1523_v47 = vunpack.c.h.s8.bf16 %v1283_v38  ;;  %v1368_v38 = vunpack.c.h.s8.bf16 %v1208_v36 }
 0x486   :  { %1775 = vmatpush1.bf16.msra.mxu0 %v1453_v50  ;;  %1694 = vmatprep.subr.bf16.mxu1 %v1460_v52  ;;  %v1525_v50 = vunpack.c.h.s8.bf16 %v1285_v49  ;;  %v1532_v52 = vunpack.c.l.s8.bf16 %v1292_v41 }
 0x487   :  { %1776 = vmatprep.subr.bf16.mxu0 %v1462_v56  ;;  %v1291_v56 = vld [vmem:[#allocation2 + $0x390] sm:$0xff] }
 0x489   :  { %1695 = vmatpush1.bf16.msra.mxu1 %v1459_v51  ;;  %v1531_v51 = vunpack.c.l.s8.bf16 %v1291_v56 }
 0x48a   :  { %1777 = vmatpush1.bf16.msra.mxu0 %v1461_v61  ;;  %1696 = vmatprep.subr.bf16.mxu1 %v1468_v53  ;;  %v1533_v61 = vunpack.c.l.s8.bf16 %v1293_v60  ;;  %v1540_v53 = vunpack.c.h.s8.bf16 %v1292_v41  ;;  %v1224_v41 = vld [vmem:[#allocation2 + $0x178] sm:$0xff] }
 0x48b   :  { %1778 = vmatprep.subr.bf16.mxu0 %v1470_v63  ;;  %v1300_v63 = vld [vmem:[#allocation2 + $0x3d8] sm:$0xff] }
 0x48d   :  { %1697 = vmatpush1.bf16.msra.mxu1 %v1467_v3  ;;  %v1539_v3 = vunpack.c.h.s8.bf16 %v1291_v56  ;;  %v1400_v56 = vunpack.c.h.s8.bf16 %v1224_v41 }
 0x48e   :  { %1779 = vmatpush1.bf16.msra.mxu0 %v1469_v5  ;;  %1698 = vmatprep.subr.bf16.mxu1 %v1476_v7  ;;  %v1541_v5 = vunpack.c.h.s8.bf16 %v1293_v60  ;;  %v1548_v7 = vunpack.c.l.s8.bf16 %v1300_v63 }
 0x48f   :  { %1780 = vmatprep.subr.bf16.mxu0 %v1478_v8  ;;  %v1299_v8 = vld [vmem:[#allocation2 + $0x3d0] sm:$0xff] }
 0x490   :  { %v1555_v14 = vunpack.c.h.s8.bf16 %v1299_v8 }
 0x491   :  { %1699 = vmatpush1.bf16.msra.mxu1 %v1475_v11  ;;  %v1547_v11 = vunpack.c.l.s8.bf16 %v1299_v8 }
 0x492   :  { %1781 = vmatpush1.bf16.msra.mxu0 %v1477_v12  ;;  %1700 = vmatprep.subr.bf16.mxu1 %v1484_v4  ;;  %v1549_v12 = vunpack.c.l.s8.bf16 %v1301_v10  ;;  %v1556_v4 = vunpack.c.h.s8.bf16 %v1300_v63  ;;  %v1240_v63 = vld [vmem:[#allocation2 + $0x1f8] sm:$0xff] }
 0x493   :  { %1782 = vmatprep.subr.bf16.mxu0 %v1486_v13  ;;  %v1184_v13 = vld [vmem:[#allocation2 + $0x38] sm:$0xff]  ;;  %v1432_v8 = vunpack.c.h.s8.bf16 %v1240_v63 }
 0x494   :  { %v1320_v21 = vunpack.c.h.s8.bf16 %v1184_v13 }
 0x495   :  { %1701 = vmatpush1.bf16.msra.mxu1 %v1483_v15  ;;  %v1557_v15 = vunpack.c.h.s8.bf16 %v1301_v10 }
 0x496   :  { %1783 = vmatpush1.bf16.msra.mxu0 %v1485_v18  ;;  %1702 = vmatprep.subr.bf16.mxu1 %v1492_v19  ;;  %v1312_v18 = vunpack.c.l.s8.bf16 %v1184_v13  ;;  %v1183_v19 = vld [vmem:[#allocation2 + $0x30] sm:$0xff]  ;;  %v1256_v13 = vld [vmem:[#allocation2 + $0x278] sm:$0xff] }
 0x497   :  { %1784 = vmatprep.subr.bf16.mxu0 %v1494_v20  ;;  %v1311_v20 = vunpack.c.l.s8.bf16 %v1183_v19 }
 0x499   :  { %1703 = vmatpush1.bf16.msra.mxu1 %v1491_v23  ;;  %v1319_v23 = vunpack.c.h.s8.bf16 %v1183_v19 }
 0x49a   :  { %1785 = vmatpush1.bf16.msra.mxu0 %v1493_v24  ;;  %1704 = vmatprep.subr.bf16.mxu1 %v1500_v25  ;;  %v1328_v24 = vunpack.c.l.s8.bf16 %v1192_v22  ;;  %v1191_v25 = vld [vmem:[#allocation2 + $0x70] sm:$0xff] }
 0x49b   :  { %1786 = vmatprep.subr.bf16.mxu0 %v1502_v29  ;;  %v1327_v27 = vunpack.c.l.s8.bf16 %v1191_v25  ;;  %v1336_v29 = vunpack.c.h.s8.bf16 %v1192_v22 }
 0x49d   :  { %1705 = vmatpush1.bf16.msra.mxu1 %v1499_v31  ;;  %v1335_v31 = vunpack.c.h.s8.bf16 %v1191_v25 }
 0x49e   :  { %1787 = vmatpush1.bf16.msra.mxu0 %v1501_v32  ;;  %1706 = vmatprep.subr.bf16.mxu1 %v1508_v33  ;;  %v1344_v32 = vunpack.c.l.s8.bf16 %v1200_v30  ;;  %v1199_v33 = vld [vmem:[#allocation2 + $0xb0] sm:$0xff] }
 0x49f   :  { %1788 = vmatprep.subr.bf16.mxu0 %v1510_v34  ;;  %v1343_v34 = vunpack.c.l.s8.bf16 %v1199_v33  ;;  %v1271_v30 = vld [vmem:[#allocation2 + $0x2f0] sm:$0xff] }
 0x4a1   :  { %1707 = vmatpush1.bf16.msra.mxu1 %v1507_v37  ;;  %v1360_v37 = vunpack.c.l.s8.bf16 %v1208_v36 }
 0x4a2   :  { %1789 = vmatpush1.bf16.msra.mxu0 %v1509_v1  ;;  %1708 = vmatprep.subr.bf16.mxu1 %v1516_v2  ;;  %v1207_v1 = vld [vmem:[#allocation2 + $0xf0] sm:$0xff] }
 0x4a3   :  { %1790 = vmatprep.subr.bf16.mxu0 %v1518_v45  ;;  %v1359_v2 = vunpack.c.l.s8.bf16 %v1207_v1  ;;  %v1216_v45 = vld [vmem:[#allocation2 + $0x138] sm:$0xff]  ;;  %v1367_v49 = vunpack.c.h.s8.bf16 %v1207_v1 }
 0x4a5   :  { %1709 = vmatpush1.bf16.msra.mxu1 %v1515_v26  ;;  %v1376_v26 = vunpack.c.l.s8.bf16 %v1216_v45 }
 0x4a6   :  { %1791 = vmatpush1.bf16.msra.mxu0 %v1517_v28  ;;  %1710 = vmatprep.subr.bf16.mxu1 %v1524_v39  ;;  %v1215_v28 = vld [vmem:[#allocation2 + $0x130] sm:$0xff] }
 0x4a7   :  { %1792 = vmatprep.subr.bf16.mxu0 %v1526_v40  ;;  %v1375_v39 = vunpack.c.l.s8.bf16 %v1215_v28  ;;  %v1384_v40 = vunpack.c.h.s8.bf16 %v1216_v45  ;;  %v1383_v42 = vunpack.c.h.s8.bf16 %v1215_v28 }
 0x4a9   :  { %1711 = vmatpush1.bf16.msra.mxu1 %v1523_v47  ;;  %v1392_v47 = vunpack.c.l.s8.bf16 %v1224_v41 }
 0x4aa   :  { %1793 = vmatpush1.bf16.msra.mxu0 %v1525_v50  ;;  %1712 = vmatprep.subr.bf16.mxu1 %v1532_v52  ;;  %v1223_v50 = vld [vmem:[#allocation2 + $0x170] sm:$0xff] }
 0x4ab   :  { %1794 = vmatprep.subr.bf16.mxu0 %v1534_v59  ;;  %v1391_v52 = vunpack.c.l.s8.bf16 %v1223_v50  ;;  %v1232_v59 = vld [vmem:[#allocation2 + $0x1b8] sm:$0xff]  ;;  %v1399_v60 = vunpack.c.h.s8.bf16 %v1223_v50 }
 0x4ad   :  { %1713 = vmatpush1.bf16.msra.mxu1 %v1531_v51  ;;  %v1408_v51 = vunpack.c.l.s8.bf16 %v1232_v59 }
 0x4ae   :  { %1795 = vmatpush1.bf16.msra.mxu0 %v1533_v61  ;;  %1714 = vmatprep.subr.bf16.mxu1 %v1540_v53  ;;  %v1231_v61 = vld [vmem:[#allocation2 + $0x1b0] sm:$0xff] }
 0x4af   :  { %1796 = vmatprep.subr.bf16.mxu0 %v1542_v62  ;;  %v1407_v53 = vunpack.c.l.s8.bf16 %v1231_v61  ;;  %v1416_v62 = vunpack.c.h.s8.bf16 %v1232_v59  ;;  %v1415_v0 = vunpack.c.h.s8.bf16 %v1231_v61 }
 0x4b1   :  { %1715 = vmatpush1.bf16.msra.mxu1 %v1539_v3  ;;  %v1424_v3 = vunpack.c.l.s8.bf16 %v1240_v63 }
 0x4b2   :  { %1797 = vmatpush1.bf16.msra.mxu0 %v1541_v5  ;;  %1716 = vmatprep.subr.bf16.mxu1 %v1548_v7  ;;  %v1239_v5 = vld [vmem:[#allocation2 + $0x1f0] sm:$0xff] }
 0x4b3   :  { %1798 = vmatprep.subr.bf16.mxu0 %v1550_v9  ;;  %v1423_v7 = vunpack.c.l.s8.bf16 %v1239_v5  ;;  %v1248_v9 = vld [vmem:[#allocation2 + $0x238] sm:$0xff]  ;;  %v1431_v10 = vunpack.c.h.s8.bf16 %v1239_v5 }
 0x4b5   :  { %1717 = vmatpush1.bf16.msra.mxu1 %v1547_v11  ;;  %v1440_v11 = vunpack.c.l.s8.bf16 %v1248_v9 }
 0x4b6   :  { %1799 = vmatpush1.bf16.msra.mxu0 %v1549_v12  ;;  %1718 = vmatprep.subr.bf16.mxu1 %v1556_v4  ;;  %v1247_v12 = vld [vmem:[#allocation2 + $0x230] sm:$0xff] }
 0x4b7   :  { %1800 = vmatprep.subr.bf16.mxu0 %v1558_v6  ;;  %v1439_v4 = vunpack.c.l.s8.bf16 %v1247_v12  ;;  %v1448_v6 = vunpack.c.h.s8.bf16 %v1248_v9 }
 0x4b9   :  { %1719 = vmatpush1.bf16.msra.mxu1 %v1555_v14  ;;  %v1447_v14 = vunpack.c.h.s8.bf16 %v1247_v12 }
 0x4ba   :  { %1801 = vmatpush1.bf16.msra.mxu0 %v1557_v15  ;;  %1811 = vmatprep.subr.bf16.mxu1 %v1312_v18  ;;  %v1456_v15 = vunpack.c.l.s8.bf16 %v1256_v13  ;;  %v1255_v18 = vld [vmem:[#allocation2 + $0x270] sm:$0xff] }
 0x4bb   :  { %v1455_v19 = vunpack.c.l.s8.bf16 %v1255_v18  ;;  %v1463_v22 = vunpack.c.h.s8.bf16 %v1255_v18 }
 0x4bc   :  { %1721 = vmatmul.mubr.bf16.vlgmr.msra.gmra.mrb[16].mxu1 %v3598_v44 }
 0x4bd   :  { %1803 = vmatmul.mubr.bf16.vlgmr.msra.gmra.mrb[8].mxu0 %v3598_v44  ;;  %1812 = vmatpush1.bf16.msra.mxu1 %v1311_v20  ;;  %v1464_v20 = vunpack.c.h.s8.bf16 %v1256_v13 }
 0x4be   :  { %1843 = vmatprep.mubr.bf16.mxu1 %v3586_v57  ;;  %1813 = vmatprep.subr.bf16.mxu1 %v1320_v21  ;;  %v1351_v57 = vunpack.c.h.s8.bf16 %v1199_v33  ;;  %v1264_v21 = vld [vmem:[#allocation2 + $0x2b8] sm:$0xff] }
 0x4c1   :  { %1814 = vmatpush1.bf16.msra.mxu1 %v1319_v23  ;;  %v1472_v23 = vunpack.c.l.s8.bf16 %v1264_v21 }
 0x4c2   :  { %1815 = vmatprep.subr.bf16.mxu1 %v1328_v24  ;;  %v1263_v24 = vld [vmem:[#allocation2 + $0x2b0] sm:$0xff] }
 0x4c3   :  { %v1471_v25 = vunpack.c.l.s8.bf16 %v1263_v24 }
 0x4c5   :  { %1816 = vmatpush1.bf16.msra.mxu1 %v1327_v27  ;;  %v1272_v27 = vld [vmem:[#allocation2 + $0x2f8] sm:$0xff] }
 0x4c6   :  { %1817 = vmatprep.subr.bf16.mxu1 %v1336_v29  ;;  %v1488_v29 = vunpack.c.l.s8.bf16 %v1272_v27 }
 0x4c9   :  { %1818 = vmatpush1.bf16.msra.mxu1 %v1335_v31 }
 0x4ca   :  { %1819 = vmatprep.subr.bf16.mxu1 %v1344_v32 }
 0x4cd   :  { %1820 = vmatpush1.bf16.msra.mxu1 %v1343_v34 }
 0x4ce   :  { %1821 = vmatprep.subr.bf16.mxu1 %v1352_v35 }
 0x4d1   :  { %1822 = vmatpush1.bf16.msra.mxu1 %v1351_v57 }
 0x4d2   :  { %1823 = vmatprep.subr.bf16.mxu1 %v1360_v37  ;;  %v1487_v37 = vunpack.c.l.s8.bf16 %v1271_v30 }
 0x4d5   :  { %1824 = vmatpush1.bf16.msra.mxu1 %v1359_v2 }
 0x4d6   :  { %1825 = vmatprep.subr.bf16.mxu1 %v1368_v38  ;;  %v1496_v38 = vunpack.c.h.s8.bf16 %v1272_v27 }
 0x4d9   :  { %1826 = vmatpush1.bf16.msra.mxu1 %v1367_v49  ;;  %v1280_v49 = vld [vmem:[#allocation2 + $0x338] sm:$0xff] }
 0x4da   :  { %1827 = vmatprep.subr.bf16.mxu1 %v1376_v26  ;;  %v1495_v26 = vunpack.c.h.s8.bf16 %v1271_v30  ;;  %v1504_v28 = vunpack.c.l.s8.bf16 %v1280_v49  ;;  %v1512_v41 = vunpack.c.h.s8.bf16 %v1280_v49 }
 0x4dd   :  { %1828 = vmatpush1.bf16.msra.mxu1 %v1375_v39  ;;  %v1279_v39 = vld [vmem:[#allocation2 + $0x330] sm:$0xff] }
 0x4de   :  { %1829 = vmatprep.subr.bf16.mxu1 %v1384_v40  ;;  %v1503_v40 = vunpack.c.l.s8.bf16 %v1279_v39 }
 0x4e1   :  { %1830 = vmatpush1.bf16.msra.mxu1 %v1383_v42  ;;  %v1288_v42 = vld [vmem:[#allocation2 + $0x378] sm:$0xff] }
 0x4e2   :  { %1831 = vmatprep.subr.bf16.mxu1 %v1392_v47  ;;  %v1511_v47 = vunpack.c.h.s8.bf16 %v1279_v39  ;;  %v1520_v50 = vunpack.c.l.s8.bf16 %v1288_v42  ;;  %v1528_v59 = vunpack.c.h.s8.bf16 %v1288_v42 }
 0x4e5   :  { %1832 = vmatpush1.bf16.msra.mxu1 %v1391_v52  ;;  %v1287_v52 = vld [vmem:[#allocation2 + $0x370] sm:$0xff] }
 0x4e6   :  { %1833 = vmatprep.subr.bf16.mxu1 %v1400_v56  ;;  %v1519_v56 = vunpack.c.l.s8.bf16 %v1287_v52 }
 0x4e9   :  { %1834 = vmatpush1.bf16.msra.mxu1 %v1399_v60  ;;  %v1296_v60 = vld [vmem:[#allocation2 + $0x3b8] sm:$0xff] }
 0x4ea   :  { %1835 = vmatprep.subr.bf16.mxu1 %v1408_v51  ;;  %v1527_v51 = vunpack.c.h.s8.bf16 %v1287_v52  ;;  %v1536_v61 = vunpack.c.l.s8.bf16 %v1296_v60  ;;  %v1544_v63 = vunpack.c.h.s8.bf16 %v1296_v60 }
 0x4ed   :  { %1836 = vmatpush1.bf16.msra.mxu1 %v1407_v53  ;;  %v1295_v53 = vld [vmem:[#allocation2 + $0x3b0] sm:$0xff] }
 0x4ee   :  { %1837 = vmatprep.subr.bf16.mxu1 %v1416_v62  ;;  %v1535_v62 = vunpack.c.l.s8.bf16 %v1295_v53 }
 0x4f1   :  { %1838 = vmatpush1.bf16.msra.mxu1 %v1415_v0  ;;  %v1304_v0 = vld [vmem:[#allocation2 + $0x3f8] sm:$0xff] }
 0x4f2   :  { %1839 = vmatprep.subr.bf16.mxu1 %v1424_v3  ;;  %v1543_v3 = vunpack.c.h.s8.bf16 %v1295_v53  ;;  %v1552_v5 = vunpack.c.l.s8.bf16 %v1304_v0  ;;  %v1560_v9 = vunpack.c.h.s8.bf16 %v1304_v0 }
 0x4f5   :  { %1840 = vmatpush1.bf16.msra.mxu1 %v1423_v7  ;;  %v1303_v7 = vld [vmem:[#allocation2 + $0x3f0] sm:$0xff] }
 0x4f6   :  { %1841 = vmatprep.subr.bf16.mxu1 %v1432_v8  ;;  %v1551_v8 = vunpack.c.l.s8.bf16 %v1303_v7 }
 0x4f9   :  { %1842 = vmatpush1.bf16.msra.mxu1 %v1431_v10  ;;  %v1559_v10 = vunpack.c.h.s8.bf16 %v1303_v7 }
 0x4fa   :  { %1852 = vmatprep.subr.bf16.mxu1 %v1440_v11 }
 0x4fc   :  { %1844 = vmatmul.mubr.bf16.vlgmr.msra.gmra.mrb[20].mxu1 %v3594_v43  ;;  %v1480_v43 = vunpack.c.h.s8.bf16 %v1264_v21  ;;  %v3626_v21 = vsub.s32 4, %v3498_v46 }
 0x4fd   :  { %1853 = vmatpush1.bf16.msra.mxu1 %v1439_v4  ;;  %1884 = vmatprep.mubr.bf16.mxu1 %v3588_v58  ;;  %v1479_v58 = vunpack.c.h.s8.bf16 %v1263_v24 }
 0x4fe   :  { %1854 = vmatprep.subr.bf16.mxu1 %v1448_v6 }
 0x501   :  { %1855 = vmatpush1.bf16.msra.mxu1 %v1447_v14 }
 0x502   :  { %1856 = vmatprep.subr.bf16.mxu1 %v1456_v15 }
 0x505   :  { %1857 = vmatpush1.bf16.msra.mxu1 %v1455_v19  ;;  %v3621_v19 = vld [vmem:[%s3848_s11] sm:$0xff]  ;;  %s3322_s11 = smov [#allocation3]  }
 0x506   :  { %1858 = vmatprep.subr.bf16.mxu1 %v1464_v20  ;;  %v1906_v20 = vrot.slane %v3621_v19, %v3559_v16  ;;  %v1902_v24 = vrot.slane %v3621_v19, %v3512_v55  ;;  %s1173_s4 = sshll.u32 %s3322_s11, 4  ;;  %s1174_s4 = int_to_ptr.vmem [resolvable:$true] %s1173_s4 }
 0x509   :  { %1859 = vmatpush1.bf16.msra.mxu1 %v1463_v22  ;;  %v3631_v22 = vsub.s32 5, %v3498_v46 }
 0x50a   :  { %1860 = vmatprep.subr.bf16.mxu1 %v1472_v23  ;;  %v1898_v23 = vrot.slane %v3621_v19, %v3509_v54 }
 0x50d   :  { %1861 = vmatpush1.bf16.msra.mxu1 %v1471_v25 }
 0x50e   :  { %1862 = vmatprep.subr.bf16.mxu1 %v1480_v43  ;;  %v1914_v43 = vrot.slane %v3621_v19, %v3626_v21 }
 0x50f   :  { %v1599_v31 = vpop.f32.mrb[12].mxu1 }
 0x510   :  { %v1640_v32 = vpop.f32.mrb[4].mxu0  ;;  %v1601_v34 = vpop.f32.mrb[13].mxu1 }
 0x511   :  { %v3613_v33 = vadd.f32 %v1640_v32, %v1599_v31  ;;  %v1642_v35 = vpop.f32.mrb[5].mxu0  ;;  %v1603_v57 = vpop.f32.mrb[14].mxu1  ;;  %1863 = vmatpush1.bf16.msra.mxu1 %v1479_v58  ;;  %v1918_v58 = vrot.slane %v3621_v19, %v3631_v22 }
 0x512   :  { %v3615_v36 = vadd.f32 %v1642_v35, %v1601_v34  ;;  %v1644_v1 = vpop.f32.mrb[6].mxu0  ;;  %v1604_v2 = vpop.f32.mrb[15].mxu1  ;;  %1864 = vmatprep.subr.bf16.mxu1 %v1488_v29 }
 0x513   :  { %v1645_v45 = vpop.f32.mrb[7].mxu0  ;;  %v3646_v29 = vmul.f32 %v1898_v23, %v3613_v33 }
 0x514   :  { %v3649_v30 = vmul.f32 %v1902_v24, %v3615_v36 }
 0x515   :  { %1865 = vmatpush1.bf16.msra.mxu1 %v1487_v37 }
 0x516   :  { %1866 = vmatprep.subr.bf16.mxu1 %v1496_v38 }
 0x519   :  { %1867 = vmatpush1.bf16.msra.mxu1 %v1495_v26 }
 0x51a   :  { %1868 = vmatprep.subr.bf16.mxu1 %v1504_v28 }
 0x51d   :  { %1869 = vmatpush1.bf16.msra.mxu1 %v1503_v40 }
 0x51e   :  { %1870 = vmatprep.subr.bf16.mxu1 %v1512_v41 }
 0x521   :  { %1871 = vmatpush1.bf16.msra.mxu1 %v1511_v47 }
 0x522   :  { %1872 = vmatprep.subr.bf16.mxu1 %v1520_v50 }
 0x525   :  { %1873 = vmatpush1.bf16.msra.mxu1 %v1519_v56 }
 0x526   :  { %1874 = vmatprep.subr.bf16.mxu1 %v1528_v59 }
 0x529   :  { %1875 = vmatpush1.bf16.msra.mxu1 %v1527_v51 }
 0x52a   :  { %1876 = vmatprep.subr.bf16.mxu1 %v1536_v61 }
 0x52d   :  { %1877 = vmatpush1.bf16.msra.mxu1 %v1535_v62 }
 0x52e   :  { %1878 = vmatprep.subr.bf16.mxu1 %v1544_v63 }
 0x531   :  { %1879 = vmatpush1.bf16.msra.mxu1 %v1543_v3 }
 0x532   :  { %1880 = vmatprep.subr.bf16.mxu1 %v1552_v5 }
 0x535   :  { %1881 = vmatpush1.bf16.msra.mxu1 %v1551_v8 }
 0x536   :  { %1882 = vmatprep.subr.bf16.mxu1 %v1560_v9 }
 0x539   :  { %1883 = vmatpush1.bf16.msra.mxu1 %v1559_v10 }
 0x53c   :  { %1885 = vmatmul.mubr.bf16.vlgmr.msra.gmra.mrb[20].mxu1 %v3598_v44  ;;  %v1910_v44 = vrot.slane %v3621_v19, %v3562_v17 }
 0x58f   :  { %v1722_v11 = vpop.f32.mrb[16].mxu1 }
 0x590   :  { %v1804_v12 = vpop.f32.mrb[8].mxu0  ;;  %v1724_v4 = vpop.f32.mrb[17].mxu1  ;;  %v3637_v25 = vmul.f32 %v1906_v20, %v1722_v11 }
 0x591   :  { %v1806_v6 = vpop.f32.mrb[9].mxu0  ;;  %v1726_v13 = vpop.f32.mrb[18].mxu1  ;;  %v3641_v27 = vmul.f32 %v1910_v44, %v1724_v4 }
 0x592   :  { %v1808_v14 = vpop.f32.mrb[10].mxu0  ;;  %v1727_v15 = vpop.f32.mrb[19].mxu1 }
 0x593   :  { %v1809_v18 = vpop.f32.mrb[11].mxu0 }
 0x594   :  { %3256 = shalt.err (!%p3253_p10)  }
 0x595   :  { %s3257_s23 = scalar_lea.vmem %s1174_s4, 8192  ;;  %p3262_p12 = scmp.lt.s32.totalorder %s1174_s4, %s1174_s4 }
 0x596   :  { %p3258_p11 = scmp.ne.s32.totalorder %s1174_s4, %s3257_s23  ;;  %p3263_p13 = scmp.lt.s32.totalorder %s3257_s23, %s3257_s23 }
 0x598   :  { %p3264_p0 = por %p3263_p13, %p3262_p12 }
 0x59a   :  { %p3265_p1 = pnand %p3264_p0, %p3258_p11 }
 0x59c   :  { %3268 = shalt.err (!%p3265_p1)  }
 0x59d   :  { %1176 = dma.hbm_to_vmem [thread:$0]  %s3851_s14, 8192, %s1174_s4, [#allocation4 + $0x1]  ;;  %v1957_v31 = vrot.slane %v3637_v25, 4  ;;  %v3664_v32 = vmul.f32 %v1914_v43, %v1804_v12  ;;  %v1963_v33 = vrot.slane %v3641_v27, 4  ;;  %v3667_v34 = vmul.f32 %v1918_v58, %v1806_v6 }
 0x59e   :  { %v1945_v35 = vrot.slane %v3646_v29, 4  ;;  %v1951_v36 = vrot.slane %v3649_v30, 4  ;;  %v3702_v58 = vsub.s32 6, %v3498_v46 }
 0x59f   :  { %v1958_v57 = vadd.f32 %v1957_v31, %v3637_v25  ;;  %v1969_v37 = vrot.slane %v3664_v32, 4  ;;  %v1964_v1 = vadd.f32 %v1963_v33, %v3641_v27  ;;  %v1975_v2 = vrot.slane %v3667_v34, 4 }
 0x5a0   :  { %v1946_v38 = vadd.f32 %v1945_v35, %v3646_v29  ;;  %v1952_v45 = vadd.f32 %v1951_v36, %v3649_v30  ;;  %v3707_v35 = vsub.s32 7, %v3498_v46 }
 0x5a1   :  { %v1959_v49 = vrot.slane %v1958_v57, 2  ;;  %v1970_v26 = vadd.f32 %v1969_v37, %v3664_v32  ;;  %v1965_v28 = vrot.slane %v1964_v1, 2  ;;  %v1976_v39 = vadd.f32 %v1975_v2, %v3667_v34 }
 0x5a2   :  { %v1947_v40 = vrot.slane %v1946_v38, 2  ;;  %v1953_v41 = vrot.slane %v1952_v45, 2  ;;  %v1922_v2 = vrot.slane %v3621_v19, %v3702_v58 }
 0x5a3   :  { %v1960_v42 = vadd.f32 %v1959_v49, %v1958_v57  ;;  %v1971_v47 = vrot.slane %v1970_v26, 2  ;;  %v1966_v50 = vadd.f32 %v1965_v28, %v1964_v1  ;;  %v1977_v52 = vrot.slane %v1976_v39, 2 }
 0x5a4   :  { %v1948_v56 = vadd.f32 %v1947_v40, %v1946_v38  ;;  %v1954_v59 = vadd.f32 %v1953_v41, %v1952_v45  ;;  %v1926_v49 = vrot.slane %v3621_v19, %v3707_v35 }
 0x5a5   :  { %v1961_v60 = vrot.slane %v1960_v42, 1  ;;  %v1972_v51 = vadd.f32 %v1971_v47, %v1970_v26  ;;  %v1967_v61 = vrot.slane %v1966_v50, 1  ;;  %v1978_v53 = vadd.f32 %v1977_v52, %v1976_v39 }
 0x5a6   :  { %v1949_v62 = vrot.slane %v1948_v56, 1  ;;  %v1955_v63 = vrot.slane %v1954_v59, 1 }
 0x5a7   :  { %v1962_v0 = vadd.f32 %v1961_v60, %v1960_v42  ;;  %v1973_v3 = vrot.slane %v1972_v51, 1  ;;  %v1968_v5 = vadd.f32 %v1967_v61, %v1966_v50  ;;  %v1979_v7 = vrot.slane %v1978_v53, 1 }
 0x5a8   :  { %v1950_v8 = vadd.f32 %v1949_v62, %v1948_v56  ;;  %v1956_v9 = vadd.f32 %v1955_v63, %v1954_v59 }
 0x5a9   :  { %v3679_v10 = vmul.f32 0.125, %v1962_v0  ;;  %v1974_v11 = vadd.f32 %v1973_v3, %v1972_v51  ;;  %v3681_v12 = vmul.f32 0.125, %v1968_v5  ;;  %v1980_v4 = vadd.f32 %v1979_v7, %v1978_v53 }
 0x5aa   :  { %v3683_v6 = vmul.f32 0.125, %v1950_v8  ;;  %v3685_v13 = vmul.f32 0.125, %v1956_v9 }
 0x5ab   :  { %v2003_v14 = vsub.f32 %v3637_v25, %v3679_v10  ;;  %v3689_v15 = vmul.f32 0.125, %v1974_v11  ;;  %v2004_v18 = vsub.f32 %v3641_v27, %v3681_v12  ;;  %v3693_v20 = vmul.f32 0.125, %v1980_v4 }
 0x5ac   :  { %v2001_v44 = vsub.f32 %v3646_v29, %v3683_v6  ;;  %v2002_v23 = vsub.f32 %v3649_v30, %v3685_v13 }
 0x5ad   :  { %v2011_v24 = vmul.f32 %v2003_v14, %v2003_v14  ;;  %v2005_v43 = vsub.f32 %v3664_v32, %v3689_v15  ;;  %v2012_v31 = vmul.f32 %v2004_v18, %v2004_v18  ;;  %v2006_v33 = vsub.f32 %v3667_v34, %v3693_v20 }
 0x5ae   :  { %v2009_v36 = vmul.f32 %v2001_v44, %v2001_v44  ;;  %v2010_v57 = vmul.f32 %v2002_v23, %v2002_v23 }
 0x5af   :  { %v2029_v37 = vrot.slane %v2011_v24, 4  ;;  %v2013_v1 = vmul.f32 %v2005_v43, %v2005_v43  ;;  %v2035_v38 = vrot.slane %v2012_v31, 4  ;;  %v2014_v45 = vmul.f32 %v2006_v33, %v2006_v33 }
 0x5b0   :  { %v2017_v26 = vrot.slane %v2009_v36, 4  ;;  %v2023_v28 = vrot.slane %v2010_v57, 4 }
 0x5b1   :  { %v2030_v40 = vadd.f32 %v2029_v37, %v2011_v24  ;;  %v2041_v41 = vrot.slane %v2013_v1, 4  ;;  %v2036_v47 = vadd.f32 %v2035_v38, %v2012_v31  ;;  %v2047_v50 = vrot.slane %v2014_v45, 4 }
 0x5b2   :  { %v2018_v59 = vadd.f32 %v2017_v26, %v2009_v36  ;;  %v2024_v61 = vadd.f32 %v2023_v28, %v2010_v57 }
 0x5b3   :  { %v2031_v53 = vrot.slane %v2030_v40, 2  ;;  %v2042_v62 = vadd.f32 %v2041_v41, %v2013_v1  ;;  %v2037_v0 = vrot.slane %v2036_v47, 2  ;;  %v2048_v3 = vadd.f32 %v2047_v50, %v2014_v45 }
 0x5b4   :  { %v2019_v7 = vrot.slane %v2018_v59, 2  ;;  %v2025_v9 = vrot.slane %v2024_v61, 2 }
 0x5b5   :  { %v2032_v4 = vadd.f32 %v2031_v53, %v2030_v40  ;;  %v2043_v14 = vrot.slane %v2042_v62, 2  ;;  %v2038_v44 = vadd.f32 %v2037_v0, %v2036_v47  ;;  %v2049_v23 = vrot.slane %v2048_v3, 2 }
 0x5b6   :  { %v2020_v43 = vadd.f32 %v2019_v7, %v2018_v59  ;;  %v2026_v33 = vadd.f32 %v2025_v9, %v2024_v61 }
 0x5b7   :  { %v2033_v57 = vrot.slane %v2032_v4, 1  ;;  %v2044_v37 = vadd.f32 %v2043_v14, %v2042_v62  ;;  %v2050_v38 = vadd.f32 %v2049_v23, %v2048_v3 }
 0x5b8   :  { %v2027_v28 = vrot.slane %v2026_v33, 1 }
 0x5b9   :  { %v2034_v40 = vadd.f32 %v2033_v57, %v2032_v4  ;;  %v2045_v41 = vrot.slane %v2044_v37, 1  ;;  %v2051_v50 = vrot.slane %v2050_v38, 1 }
 0x5bb   :  { %v2046_v53 = vadd.f32 %v2045_v41, %v2044_v37  ;;  %v2052_v0 = vadd.f32 %v2051_v50, %v2050_v38 }
 0x5bd   :  { %v2069_v4 = vmul.f32 0.125, %v2046_v53 }
 0x60f   :  { %v1886_v39 = vpop.f32.mrb[20].mxu1 }
 0x610   :  { %v3713_v42 = vmul.f32 %v1922_v2, %v1886_v39  ;;  %v1888_v46 = vpop.f32.mrb[21].mxu1  ;;  %v2039_v2 = vrot.slane %v2038_v44, 1 }
 0x611   :  { %v3715_v52 = vmul.f32 %v1926_v49, %v1888_v46  ;;  %v1890_v56 = vpop.f32.mrb[22].mxu1  ;;  %v2021_v49 = vrot.slane %v2020_v43, 1 }
 0x612   :  { %v1981_v60 = vrot.slane %v3713_v42, 4  ;;  %v1891_v51 = vpop.f32.mrb[23].mxu1  ;;  %v2040_v47 = vadd.f32 %v2039_v2, %v2038_v44  ;;  %v2070_v44 = vmul.f32 0.125, %v2052_v0 }
 0x613   :  { %v1987_v19 = vrot.slane %v3715_v52, 4  ;;  %v2022_v59 = vadd.f32 %v2021_v49, %v2020_v43  ;;  %v2028_v51 = vadd.f32 %v2027_v28, %v2026_v33 }
 0x614   :  { %v1982_v63 = vadd.f32 %v1981_v60, %v3713_v42  ;;  %v2078_v37 = vadd.f32 0.8, %v2070_v44 }
 0x615   :  { %v1988_v5 = vadd.f32 %v1987_v19, %v3715_v52  ;;  %v2067_v19 = vmul.f32 0.125, %v2034_v40 }
 0x616   :  { %v1983_v8 = vrot.slane %v1982_v63, 2 }
 0x617   :  { %v1989_v11 = vrot.slane %v1988_v5, 2 }
 0x618   :  { %v1984_v18 = vadd.f32 %v1983_v8, %v1982_v63  ;;  %v2068_v63 = vmul.f32 0.125, %v2040_v47  ;;  %v2066_v8 = vmul.f32 0.125, %v2028_v51 }
 0x619   :  { %v1990_v24 = vadd.f32 %v1989_v11, %v1988_v5  ;;  %v2065_v5 = vmul.f32 0.125, %v2022_v59  ;;  %v2075_v11 = vadd.f32 0.8, %v2067_v19 }
 0x61a   :  { %v1985_v31 = vrot.slane %v1984_v18, 1 }
 0x61b   :  { %v1991_v36 = vrot.slane %v1990_v24, 1  ;;  %3051 = vrsqrt.f32 %v2075_v11 }
 0x61c   :  { %v1986_v1 = vadd.f32 %v1985_v31, %v1984_v18  ;;  %v2076_v18 = vadd.f32 0.8, %v2068_v63  ;;  %v2074_v31 = vadd.f32 0.8, %v2066_v8 }
 0x61d   :  { %v1992_v45 = vadd.f32 %v1991_v36, %v1990_v24  ;;  %v2073_v24 = vadd.f32 0.8, %v2065_v5  ;;  %v2077_v36 = vadd.f32 0.8, %v2069_v4  ;;  %v1943_v4 = vld [vmem:[%s3849_s12] sm:$0xff] }
 0x61e   :  { %v3721_v26 = vmul.f32 0.125, %v1986_v1  ;;  %3053 = vrsqrt.f32 %v2076_v18 }
 0x61f   :  { %v3723_v39 = vmul.f32 0.125, %v1992_v45  ;;  %3055 = vrsqrt.f32 %v2073_v24 }
 0x620   :  { %v2007_v46 = vsub.f32 %v3713_v42, %v3721_v26  ;;  %3057 = vrsqrt.f32 %v2074_v31 }
 0x621   :  { %v2008_v56 = vsub.f32 %v3715_v52, %v3723_v39  ;;  %3059 = vrsqrt.f32 %v2077_v36 }
 0x622   :  { %v2015_v60 = vmul.f32 %v2007_v46, %v2007_v46  ;;  %3061 = vrsqrt.f32 %v2078_v37 }
 0x623   :  { %v2016_v61 = vmul.f32 %v2008_v56, %v2008_v56 }
 0x624   :  { %v2053_v62 = vrot.slane %v2015_v60, 4 }
 0x625   :  { %v2059_v3 = vrot.slane %v2016_v61, 4  ;;  %v3052_v41 = vpop.eup %3051 }
 0x626   :  { %v2054_v7 = vadd.f32 %v2053_v62, %v2015_v60 }
 0x627   :  { %v2060_v9 = vadd.f32 %v2059_v3, %v2016_v61 }
 0x628   :  { %v2055_v14 = vrot.slane %v2054_v7, 2  ;;  %v3054_v46 = vpop.eup %3053 }
 0x629   :  { %v2061_v23 = vrot.slane %v2060_v9, 2  ;;  %v3056_v47 = vpop.eup %3055  ;;  %v2098_v59 = vcombine.low %v3052_v41, %v3054_v46 }
 0x62a   :  { %v2056_v43 = vadd.f32 %v2055_v14, %v2054_v7  ;;  %v3058_v50 = vpop.eup %3057 }
 0x62b   :  { %v2062_v33 = vadd.f32 %v2061_v23, %v2060_v9  ;;  %v3060_v56 = vpop.eup %3059  ;;  %v2097_v51 = vcombine.low %v3056_v47, %v3058_v50  ;;  %v2114_v19 = vrot.slane %v2098_v59, %v3501_v48  ;;  %v1944_v59 = vld [vmem:[%s3850_s13] sm:$0xff] }
 0x62c   :  { %v2057_v57 = vrot.slane %v2056_v43, 1  ;;  %v3062_v60 = vpop.eup %3061 }
 0x62d   :  { %v2063_v1 = vrot.slane %v2062_v33, 1  ;;  %v2099_v53 = vcombine.low %v3060_v56, %v3062_v60  ;;  %v2107_v63 = vrot.slane %v2097_v51, %v3501_v48 }
 0x62e   :  { %v2058_v2 = vadd.f32 %v2057_v57, %v2056_v43 }
 0x62f   :  { %v2064_v38 = vadd.f32 %v2063_v1, %v2062_v33  ;;  %v2129_v3 = vcombine.low %v2107_v63, %v2114_v19  ;;  %v2121_v5 = vrot.slane %v2099_v53, %v3501_v48 }
 0x630   :  { %v2071_v45 = vmul.f32 0.125, %v2058_v2 }
 0x631   :  { %v2072_v49 = vmul.f32 0.125, %v2064_v38  ;;  %v2137_v9 = vrot.slane %v2129_v3, %v3501_v48 }
 0x632   :  { %v2079_v28 = vadd.f32 0.8, %v2071_v45 }
 0x633   :  { %v2080_v40 = vadd.f32 0.8, %v2072_v49 }
 0x634   :  { %3063 = vrsqrt.f32 %v2079_v28 }
 0x635   :  { %3065 = vrsqrt.f32 %v2080_v40 }
 0x63e   :  { %v3064_v61 = vpop.eup %3063 }
 0x63f   :  { %v3066_v62 = vpop.eup %3065 }
 0x640   :  { %v2100_v0 = vcombine.low %v3064_v61, %v3066_v62 }
 0x642   :  { %v2128_v7 = vrot.slane %v2100_v0, %v3501_v48 }
 0x644   :  { %v2130_v8 = vcombine.low %v2121_v5, %v2128_v7 }
 0x646   :  { %v2144_v11 = vrot.slane %v2130_v8, %v3501_v48 }
 0x648   :  { %v2145_v14 = vcombine.low %v2137_v9, %v2144_v11 }
 0x64a   :  { %v2147_v18 = vmul.f32 %v2145_v14, %v1943_v4 }
 0x64c   :  { %v2152_v44 = vrot.slane %v2147_v18, %v3509_v54  ;;  %v2156_v23 = vrot.slane %v2147_v18, %v3512_v55  ;;  %v2160_v24 = vrot.slane %v2147_v18, %v3559_v16  ;;  %v2164_v43 = vrot.slane %v2147_v18, %v3562_v17 }
 0x64d   :  { %v2168_v31 = vrot.slane %v2147_v18, %v3626_v21  ;;  %v2172_v33 = vrot.slane %v2147_v18, %v3631_v22  ;;  %v2176_v36 = vrot.slane %v2147_v18, %v3702_v58  ;;  %v2180_v57 = vrot.slane %v2147_v18, %v3707_v35 }
 0x64e   :  { %v2189_v37 = vmul.f32 %v2152_v44, %v3683_v6  ;;  %v2190_v1 = vmul.f32 %v2156_v23, %v3685_v13  ;;  %v2191_v2 = vmul.f32 %v2160_v24, %v3679_v10  ;;  %v2192_v38 = vmul.f32 %v2164_v43, %v3681_v12 }
 0x64f   :  { %v2193_v45 = vmul.f32 %v2168_v31, %v3689_v15  ;;  %v2194_v49 = vmul.f32 %v2172_v33, %v3693_v20  ;;  %v2195_v28 = vmul.f32 %v2176_v36, %v3721_v26  ;;  %v2196_v40 = vmul.f32 %v2180_v57, %v3723_v39 }
 0x650   :  { %v2205_v41 = vcombine.low %v2189_v37, %v2190_v1  ;;  %v2206_v46 = vcombine.low %v2191_v2, %v2192_v38  ;;  %v2263_v15 = vmul.f32 %v2180_v57, %v3715_v52  ;;  %v2256_v61 = vmul.f32 %v2152_v44, %v3646_v29 }
 0x651   :  { %v2207_v47 = vcombine.low %v2193_v45, %v2194_v49  ;;  %v2208_v50 = vcombine.low %v2195_v28, %v2196_v40  ;;  %v2257_v19 = vmul.f32 %v2156_v23, %v3649_v30  ;;  %v2258_v53 = vmul.f32 %v2160_v24, %v3637_v25 }
 0x652   :  { %v2215_v6 = vrot.slane %v2205_v41, %v3501_v48  ;;  %v2222_v13 = vrot.slane %v2206_v46, %v3501_v48  ;;  %v2259_v52 = vmul.f32 %v2164_v43, %v3641_v27  ;;  %v2260_v62 = vmul.f32 %v2168_v31, %v3664_v32 }
 0x653   :  { %v2229_v10 = vrot.slane %v2207_v47, %v3501_v48  ;;  %v2236_v12 = vrot.slane %v2208_v50, %v3501_v48  ;;  %v2261_v63 = vmul.f32 %v2172_v33, %v3667_v34 }
 0x654   :  { %v2237_v56 = vcombine.low %v2215_v6, %v2222_v13 }
 0x655   :  { %v2238_v20 = vcombine.low %v2229_v10, %v2236_v12 }
 0x656   :  { %v2245_v26 = vrot.slane %v2237_v56, %v3501_v48 }
 0x657   :  { %v2252_v39 = vrot.slane %v2238_v20, %v3501_v48  ;;  %v2262_v48 = vmul.f32 %v2176_v36, %v3713_v42 }
 0x659   :  { %v2253_v60 = vcombine.low %v2245_v26, %v2252_v39 }
 0x65b   :  { %v2255_v51 = vsub.f32 %v1944_v59, %v2253_v60 }
 0x65d   :  { %v2268_v0 = vrot.slane %v2255_v51, %v3509_v54  ;;  %v2272_v3 = vrot.slane %v2255_v51, %v3512_v55  ;;  %v2276_v5 = vrot.slane %v2255_v51, %v3559_v16  ;;  %v2280_v29 = vrot.slane %v2255_v51, %v3562_v17 }
 0x65e   :  { %v2284_v30 = vrot.slane %v2255_v51, %v3626_v21  ;;  %v2288_v25 = vrot.slane %v2255_v51, %v3631_v22  ;;  %v2292_v27 = vrot.slane %v2255_v51, %v3702_v58  ;;  %v2296_v32 = vrot.slane %v2255_v51, %v3707_v35 }
 0x65f   :  { %v2305_v7 = vadd.f32 %v2268_v0, %v2256_v61  ;;  %v2306_v34 = vadd.f32 %v2272_v3, %v2257_v19  ;;  %v2307_v8 = vadd.f32 %v2276_v5, %v2258_v53  ;;  %v2308_v42 = vadd.f32 %v2280_v29, %v2259_v52 }
 0x660   :  { %v2309_v9 = vadd.f32 %v2284_v30, %v2260_v62  ;;  %v2310_v11 = vadd.f32 %v2288_v25, %v2261_v63  ;;  %v2311_v4 = vadd.f32 %v2292_v27, %v2262_v48  ;;  %v2312_v14 = vadd.f32 %v2296_v32, %v2263_v15 }
 0x661   :  { %vm2313_vm9 = vcmp.gt.f32.partialorder %v2305_v7, 0.0  ;;  %vm2314_vm10 = vcmp.gt.f32.partialorder %v2306_v34, 0.0  ;;  %vm2315_vm11 = vcmp.gt.f32.partialorder %v2307_v8, 0.0  ;;  %vm2316_vm12 = vcmp.gt.f32.partialorder %v2308_v42, 0.0 }
 0x662   :  { %vm2317_vm13 = vcmp.gt.f32.partialorder %v2309_v9, 0.0  ;;  %vm2318_vm14 = vcmp.gt.f32.partialorder %v2310_v11, 0.0  ;;  %vm2319_vm15 = vcmp.gt.f32.partialorder %v2311_v4, 0.0  ;;  %vm2320_vm0 = vcmp.gt.f32.partialorder %v2312_v14, 0.0 }
 0x663   :  { %v2321_v16 = vmul.f32 0.2, %v2305_v7  ;;  %v2322_v17 = vmul.f32 0.2, %v2306_v34  ;;  %v2323_v21 = vmul.f32 0.2, %v2307_v8 }
 0x664   :  { %v2324_v22 = vmul.f32 0.2, %v2308_v42  ;;  %v2325_v58 = vmul.f32 0.2, %v2309_v9  ;;  %v2326_v35 = vmul.f32 0.2, %v2310_v11 }
 0x665   :  { %v2327_v18 = vmul.f32 0.2, %v2311_v4  ;;  %v2328_v44 = vmul.f32 0.2, %v2312_v14  ;;  %v3780_v23 = vsel %vm2313_vm9, %v2305_v7, %v2321_v16  ;;  %v2330_v24 = vsel %vm2314_vm10, %v2306_v34, %v2322_v17 }
 0x666   :  { %v3784_v43 = vsel %vm2315_vm11, %v2307_v8, %v2323_v21  ;;  %v3787_v31 = vsel %vm2316_vm12, %v2308_v42, %v2324_v22  ;;  %v3790_v33 = vsel %vm2317_vm13, %v2309_v9, %v2325_v58  ;;  %v3793_v36 = vsel %vm2318_vm14, %v2310_v11, %v2326_v35 }
 0x667   :  { %v3796_v57 = vsel %vm2319_vm15, %v2311_v4, %v2327_v18  ;;  %v3799_v37 = vsel %vm2320_vm0, %v2312_v14, %v2328_v44 }
 0x668   :  { %3301 = dma.done.wait [#allocation4 + $0x1], 8192 }
 0x669   :  { %3302 = vsyncadd [#allocation4 + $0x1], 4294959104  ;;  %v2534_v1 = vpack.c.bf16 %v2330_v24, %v2330_v24  ;;  %v2342_v2 = vld [vmem:[#allocation3 + $0x8] sm:$0xff]  ;;  %v2341_v38 = vld [vmem:[#allocation3] sm:$0xff]  ;;  %v2533_v18 = vpack.c.bf16 %v3780_v23, %v3780_v23  ;;  %v2536_v24 = vpack.c.bf16 %v3787_v31, %v3787_v31 }
 0x66a   :  { %v2406_v45 = vunpack.c.l.s8.bf16 %v2342_v2  ;;  %v2408_v49 = vunpack.c.h.s8.bf16 %v2342_v2  ;;  %v2405_v28 = vunpack.c.l.s8.bf16 %v2341_v38  ;;  %v2344_v40 = vld [vmem:[#allocation3 + $0x18] sm:$0xff]  ;;  %v2407_v41 = vunpack.c.h.s8.bf16 %v2341_v38  ;;  %v2343_v47 = vld [vmem:[#allocation3 + $0x10] sm:$0xff]  ;;  %v2346_v13 = vld [vmem:[#allocation3 + $0x28] sm:$0xff] }
 0x66b   :  { %2573 = vmatprep.mubr.bf16.mxu0 %v2534_v1  ;;  %v2410_v46 = vunpack.c.l.s8.bf16 %v2344_v40  ;;  %v2409_v50 = vunpack.c.l.s8.bf16 %v2343_v47  ;;  %v2412_v6 = vunpack.c.h.s8.bf16 %v2344_v40  ;;  %v2411_v10 = vunpack.c.h.s8.bf16 %v2343_v47  ;;  %v2345_v15 = vld [vmem:[#allocation3 + $0x20] sm:$0xff]  ;;  %v2348_v26 = vld [vmem:[#allocation3 + $0x38] sm:$0xff]  ;;  %v2347_v60 = vld [vmem:[#allocation3 + $0x30] sm:$0xff] }
 0x66c   :  { %2541 = vmatprep.subr.bf16.mxu0 %v2406_v45  ;;  %v2414_v12 = vunpack.c.l.s8.bf16 %v2346_v13  ;;  %v2413_v56 = vunpack.c.l.s8.bf16 %v2345_v15  ;;  %v2416_v20 = vunpack.c.h.s8.bf16 %v2346_v13  ;;  %v2415_v39 = vunpack.c.h.s8.bf16 %v2345_v15  ;;  %v2350_v19 = vld [vmem:[#allocation3 + $0x48] sm:$0xff]  ;;  %v2349_v62 = vld [vmem:[#allocation3 + $0x40] sm:$0xff]  ;;  %v2352_v0 = vld [vmem:[#allocation3 + $0x58] sm:$0xff] }
 0x66d   :  { %2542 = vmatpush1.bf16.msra.mxu0 %v2405_v28  ;;  %v2418_v59 = vunpack.c.l.s8.bf16 %v2348_v26  ;;  %v2417_v51 = vunpack.c.l.s8.bf16 %v2347_v60  ;;  %v2420_v61 = vunpack.c.h.s8.bf16 %v2348_v26  ;;  %v2419_v53 = vunpack.c.h.s8.bf16 %v2347_v60  ;;  %v2351_v29 = vld [vmem:[#allocation3 + $0x50] sm:$0xff]  ;;  %v2354_v27 = vld [vmem:[#allocation3 + $0x68] sm:$0xff]  ;;  %v2353_v34 = vld [vmem:[#allocation3 + $0x60] sm:$0xff] }
 0x66e   :  { %2543 = vmatprep.subr.bf16.mxu0 %v2408_v49  ;;  %v2422_v52 = vunpack.c.l.s8.bf16 %v2350_v19  ;;  %v2421_v63 = vunpack.c.l.s8.bf16 %v2349_v62  ;;  %v2424_v48 = vunpack.c.h.s8.bf16 %v2350_v19  ;;  %v2423_v3 = vunpack.c.h.s8.bf16 %v2349_v62  ;;  %v2356_v9 = vld [vmem:[#allocation3 + $0x78] sm:$0xff]  ;;  %v2355_v14 = vld [vmem:[#allocation3 + $0x70] sm:$0xff]  ;;  %v2358_v21 = vld [vmem:[#allocation3 + $0x88] sm:$0xff] }
 0x66f   :  { %v2426_v5 = vunpack.c.l.s8.bf16 %v2352_v0  ;;  %v2425_v30 = vunpack.c.l.s8.bf16 %v2351_v29  ;;  %v2428_v25 = vunpack.c.h.s8.bf16 %v2352_v0  ;;  %v2427_v32 = vunpack.c.h.s8.bf16 %v2351_v29  ;;  %v2357_v35 = vld [vmem:[#allocation3 + $0x80] sm:$0xff]  ;;  %v2360_v2 = vld [vmem:[#allocation3 + $0x98] sm:$0xff]  ;;  %v2359_v49 = vld [vmem:[#allocation3 + $0x90] sm:$0xff] }
 0x670   :  { %v2430_v7 = vunpack.c.l.s8.bf16 %v2354_v27  ;;  %v2429_v8 = vunpack.c.l.s8.bf16 %v2353_v34  ;;  %v2432_v42 = vunpack.c.h.s8.bf16 %v2354_v27  ;;  %v2431_v11 = vunpack.c.h.s8.bf16 %v2353_v34  ;;  %v2362_v23 = vld [vmem:[#allocation3 + $0xa8] sm:$0xff]  ;;  %v2361_v31 = vld [vmem:[#allocation3 + $0xa0] sm:$0xff] }
 0x671   :  { %2544 = vmatpush1.bf16.msra.mxu0 %v2407_v41  ;;  %v2434_v4 = vunpack.c.l.s8.bf16 %v2356_v9  ;;  %v2433_v16 = vunpack.c.l.s8.bf16 %v2355_v14  ;;  %v2436_v17 = vunpack.c.h.s8.bf16 %v2356_v9  ;;  %v2435_v22 = vunpack.c.h.s8.bf16 %v2355_v14 }
 0x672   :  { %2545 = vmatprep.subr.bf16.mxu0 %v2410_v46  ;;  %v2438_v58 = vunpack.c.l.s8.bf16 %v2358_v21  ;;  %v2437_v44 = vunpack.c.l.s8.bf16 %v2357_v35  ;;  %v2440_v1 = vunpack.c.h.s8.bf16 %v2358_v21  ;;  %v2439_v38 = vunpack.c.h.s8.bf16 %v2357_v35 }
 0x673   :  { %v2442_v45 = vunpack.c.l.s8.bf16 %v2360_v2  ;;  %v2441_v28 = vunpack.c.l.s8.bf16 %v2359_v49  ;;  %v2444_v40 = vunpack.c.h.s8.bf16 %v2360_v2  ;;  %v2443_v41 = vunpack.c.h.s8.bf16 %v2359_v49  ;;  %v2380_v49 = vld [vmem:[#allocation3 + $0x138] sm:$0xff] }
 0x674   :  { %v2446_v46 = vunpack.c.l.s8.bf16 %v2362_v23  ;;  %v2445_v47 = vunpack.c.l.s8.bf16 %v2361_v31  ;;  %v2447_v13 = vunpack.c.h.s8.bf16 %v2361_v31  ;;  %v2535_v14 = vpack.c.bf16 %v3784_v43, %v3784_v43  ;;  %v2378_v43 = vld [vmem:[#allocation3 + $0x128] sm:$0xff] }
 0x675   :  { %2546 = vmatpush1.bf16.msra.mxu0 %v2409_v50  ;;  %v2448_v50 = vunpack.c.h.s8.bf16 %v2362_v23  ;;  %v2478_v2 = vunpack.c.l.s8.bf16 %v2378_v43  ;;  %v2379_v23 = vld [vmem:[#allocation3 + $0x130] sm:$0xff]  ;;  %v2382_v31 = vld [vmem:[#allocation3 + $0x148] sm:$0xff] }
 0x676   :  { %2547 = vmatprep.subr.bf16.mxu0 %v2412_v6  ;;  %v2364_v6 = vld [vmem:[#allocation3 + $0xb8] sm:$0xff] }
 0x679   :  { %2548 = vmatpush1.bf16.msra.mxu0 %v2411_v10  ;;  %v2450_v10 = vunpack.c.l.s8.bf16 %v2364_v6 }
 0x67a   :  { %2549 = vmatprep.subr.bf16.mxu0 %v2414_v12  ;;  %v2363_v12 = vld [vmem:[#allocation3 + $0xb0] sm:$0xff] }
 0x67b   :  { %v2449_v15 = vunpack.c.l.s8.bf16 %v2363_v12  ;;  %v2451_v26 = vunpack.c.h.s8.bf16 %v2363_v12  ;;  %v2384_v12 = vld [vmem:[#allocation3 + $0x158] sm:$0xff] }
 0x67d   :  { %2550 = vmatpush1.bf16.msra.mxu0 %v2413_v56  ;;  %v2452_v56 = vunpack.c.h.s8.bf16 %v2364_v6  ;;  %v2381_v6 = vld [vmem:[#allocation3 + $0x140] sm:$0xff] }
 0x67e   :  { %2551 = vmatprep.subr.bf16.mxu0 %v2416_v20  ;;  %v2366_v20 = vld [vmem:[#allocation3 + $0xc8] sm:$0xff] }
 0x681   :  { %2552 = vmatpush1.bf16.msra.mxu0 %v2415_v39  ;;  %v2454_v39 = vunpack.c.l.s8.bf16 %v2366_v20 }
 0x682   :  { %2553 = vmatprep.subr.bf16.mxu0 %v2418_v59  ;;  %v2365_v59 = vld [vmem:[#allocation3 + $0xc0] sm:$0xff] }
 0x683   :  { %v2453_v60 = vunpack.c.l.s8.bf16 %v2365_v59  ;;  %v2455_v19 = vunpack.c.h.s8.bf16 %v2365_v59  ;;  %v2386_v59 = vld [vmem:[#allocation3 + $0x168] sm:$0xff] }
 0x685   :  { %2554 = vmatpush1.bf16.msra.mxu0 %v2417_v51  ;;  %v2456_v51 = vunpack.c.h.s8.bf16 %v2366_v20  ;;  %v2383_v20 = vld [vmem:[#allocation3 + $0x150] sm:$0xff] }
 0x686   :  { %2555 = vmatprep.subr.bf16.mxu0 %v2420_v61  ;;  %v2368_v61 = vld [vmem:[#allocation3 + $0xd8] sm:$0xff] }
 0x689   :  { %2556 = vmatpush1.bf16.msra.mxu0 %v2419_v53  ;;  %v2458_v53 = vunpack.c.l.s8.bf16 %v2368_v61 }
 0x68a   :  { %2557 = vmatprep.subr.bf16.mxu0 %v2422_v52  ;;  %v2367_v52 = vld [vmem:[#allocation3 + $0xd0] sm:$0xff] }
 0x68b   :  { %v2457_v62 = vunpack.c.l.s8.bf16 %v2367_v52  ;;  %v2459_v0 = vunpack.c.h.s8.bf16 %v2367_v52  ;;  %v2388_v52 = vld [vmem:[#allocation3 + $0x178] sm:$0xff] }
 0x68d   :  { %2558 = vmatpush1.bf16.msra.mxu0 %v2421_v63  ;;  %v2460_v63 = vunpack.c.h.s8.bf16 %v2368_v61  ;;  %v2385_v61 = vld [vmem:[#allocation3 + $0x160] sm:$0xff] }
 0x68e   :  { %2559 = vmatprep.subr.bf16.mxu0 %v2424_v48  ;;  %v2370_v48 = vld [vmem:[#allocation3 + $0xe8] sm:$0xff] }
 0x691   :  { %2560 = vmatpush1.bf16.msra.mxu0 %v2423_v3  ;;  %v2462_v3 = vunpack.c.l.s8.bf16 %v2370_v48 }
 0x692   :  { %2561 = vmatprep.subr.bf16.mxu0 %v2426_v5  ;;  %v2369_v5 = vld [vmem:[#allocation3 + $0xe0] sm:$0xff] }
 0x693   :  { %v2461_v29 = vunpack.c.l.s8.bf16 %v2369_v5  ;;  %v2463_v27 = vunpack.c.h.s8.bf16 %v2369_v5  ;;  %v2390_v5 = vld [vmem:[#allocation3 + $0x188] sm:$0xff] }
 0x695   :  { %2562 = vmatpush1.bf16.msra.mxu0 %v2425_v30  ;;  %v2464_v30 = vunpack.c.h.s8.bf16 %v2370_v48  ;;  %v2387_v48 = vld [vmem:[#allocation3 + $0x170] sm:$0xff] }
 0x696   :  { %2563 = vmatprep.subr.bf16.mxu0 %v2428_v25  ;;  %v2372_v25 = vld [vmem:[#allocation3 + $0xf8] sm:$0xff] }
 0x699   :  { %2564 = vmatpush1.bf16.msra.mxu0 %v2427_v32  ;;  %v2466_v32 = vunpack.c.l.s8.bf16 %v2372_v25 }
 0x69a   :  { %2565 = vmatprep.subr.bf16.mxu0 %v2430_v7  ;;  %v2371_v7 = vld [vmem:[#allocation3 + $0xf0] sm:$0xff] }
 0x69b   :  { %v2465_v34 = vunpack.c.l.s8.bf16 %v2371_v7  ;;  %v2467_v9 = vunpack.c.h.s8.bf16 %v2371_v7  ;;  %v2540_v7 = vpack.c.bf16 %v3799_v37, %v3799_v37  ;;  %v2393_v37 = vld [vmem:[#allocation3 + $0x1a0] sm:$0xff] }
 0x69d   :  { %2566 = vmatpush1.bf16.msra.mxu0 %v2429_v8  ;;  %v2468_v8 = vunpack.c.h.s8.bf16 %v2372_v25  ;;  %v2389_v25 = vld [vmem:[#allocation3 + $0x180] sm:$0xff] }
 0x69e   :  { %2567 = vmatprep.subr.bf16.mxu0 %v2432_v42  ;;  %v2374_v42 = vld [vmem:[#allocation3 + $0x108] sm:$0xff] }
 0x69f   :  { %v2472_v21 = vunpack.c.h.s8.bf16 %v2374_v42 }
 0x6a1   :  { %2568 = vmatpush1.bf16.msra.mxu0 %v2431_v11  ;;  %v2470_v11 = vunpack.c.l.s8.bf16 %v2374_v42  ;;  %v2503_v42 = vunpack.c.h.s8.bf16 %v2389_v25 }
 0x6a2   :  { %2569 = vmatprep.subr.bf16.mxu0 %v2434_v4  ;;  %v2373_v4 = vld [vmem:[#allocation3 + $0x100] sm:$0xff] }
 0x6a5   :  { %2570 = vmatpush1.bf16.msra.mxu0 %v2433_v16  ;;  %v2469_v16 = vunpack.c.l.s8.bf16 %v2373_v4 }
 0x6a6   :  { %2571 = vmatprep.subr.bf16.mxu0 %v2436_v17  ;;  %v2538_v17 = vpack.c.bf16 %v3793_v36, %v3793_v36  ;;  %v2377_v36 = vld [vmem:[#allocation3 + $0x120] sm:$0xff] }
 0x6a9   :  { %2572 = vmatpush1.bf16.msra.mxu0 %v2435_v22  ;;  %v2376_v22 = vld [vmem:[#allocation3 + $0x118] sm:$0xff] }
 0x6aa   :  { %2582 = vmatprep.subr.bf16.mxu0 %v2438_v58  ;;  %v2471_v58 = vunpack.c.h.s8.bf16 %v2373_v4  ;;  %v2474_v35 = vunpack.c.l.s8.bf16 %v2376_v22 }
 0x6ac   :  { %2574 = vmatmul.mubr.bf16.vlgmr.msra.gmra.mrb[12].mxu0 %v2533_v18  ;;  %v2375_v18 = vld [vmem:[#allocation3 + $0x110] sm:$0xff] }
 0x6ad   :  { %2583 = vmatpush1.bf16.msra.mxu0 %v2437_v44  ;;  %2614 = vmatprep.mubr.bf16.mxu0 %v2536_v24  ;;  %v2473_v44 = vunpack.c.l.s8.bf16 %v2375_v18  ;;  %v2476_v24 = vunpack.c.h.s8.bf16 %v2376_v22 }
 0x6ae   :  { %2584 = vmatprep.subr.bf16.mxu0 %v2440_v1  ;;  %v2475_v1 = vunpack.c.h.s8.bf16 %v2375_v18 }
 0x6b1   :  { %2585 = vmatpush1.bf16.msra.mxu0 %v2439_v38  ;;  %v2477_v38 = vunpack.c.l.s8.bf16 %v2377_v36 }
 0x6b2   :  { %2586 = vmatprep.subr.bf16.mxu0 %v2442_v45  ;;  %v2480_v45 = vunpack.c.h.s8.bf16 %v2378_v43 }
 0x6b5   :  { %2587 = vmatpush1.bf16.msra.mxu0 %v2441_v28  ;;  %v2479_v28 = vunpack.c.h.s8.bf16 %v2377_v36 }
 0x6b6   :  { %2588 = vmatprep.subr.bf16.mxu0 %v2444_v40  ;;  %v2482_v40 = vunpack.c.l.s8.bf16 %v2380_v49 }
 0x6b9   :  { %2589 = vmatpush1.bf16.msra.mxu0 %v2443_v41  ;;  %v2481_v41 = vunpack.c.l.s8.bf16 %v2379_v23 }
 0x6ba   :  { %2590 = vmatprep.subr.bf16.mxu0 %v2446_v46  ;;  %v2484_v46 = vunpack.c.h.s8.bf16 %v2380_v49 }
 0x6bd   :  { %2591 = vmatpush1.bf16.msra.mxu0 %v2445_v47  ;;  %v2483_v47 = vunpack.c.h.s8.bf16 %v2379_v23 }
 0x6be   :  { %2592 = vmatprep.subr.bf16.mxu0 %v2448_v50  ;;  %v2486_v50 = vunpack.c.l.s8.bf16 %v2382_v31 }
 0x6c1   :  { %2593 = vmatpush1.bf16.msra.mxu0 %v2447_v13  ;;  %v2485_v13 = vunpack.c.l.s8.bf16 %v2381_v6 }
 0x6c2   :  { %2594 = vmatprep.subr.bf16.mxu0 %v2450_v10  ;;  %v2488_v10 = vunpack.c.h.s8.bf16 %v2382_v31 }
 0x6c5   :  { %2595 = vmatpush1.bf16.msra.mxu0 %v2449_v15  ;;  %v2487_v15 = vunpack.c.h.s8.bf16 %v2381_v6 }
 0x6c6   :  { %2596 = vmatprep.subr.bf16.mxu0 %v2452_v56  ;;  %v2490_v56 = vunpack.c.l.s8.bf16 %v2384_v12 }
 0x6c9   :  { %2597 = vmatpush1.bf16.msra.mxu0 %v2451_v26  ;;  %v2489_v26 = vunpack.c.l.s8.bf16 %v2383_v20 }
 0x6ca   :  { %2598 = vmatprep.subr.bf16.mxu0 %v2454_v39  ;;  %v2492_v39 = vunpack.c.h.s8.bf16 %v2384_v12 }
 0x6cd   :  { %2599 = vmatpush1.bf16.msra.mxu0 %v2453_v60  ;;  %v2491_v60 = vunpack.c.h.s8.bf16 %v2383_v20 }
 0x6ce   :  { %2600 = vmatprep.subr.bf16.mxu0 %v2456_v51  ;;  %v2494_v51 = vunpack.c.l.s8.bf16 %v2386_v59 }
 0x6d1   :  { %2601 = vmatpush1.bf16.msra.mxu0 %v2455_v19  ;;  %v2493_v19 = vunpack.c.l.s8.bf16 %v2385_v61 }
 0x6d2   :  { %2602 = vmatprep.subr.bf16.mxu0 %v2458_v53  ;;  %v2496_v53 = vunpack.c.h.s8.bf16 %v2386_v59 }
 0x6d5   :  { %2603 = vmatpush1.bf16.msra.mxu0 %v2457_v62  ;;  %v2495_v62 = vunpack.c.h.s8.bf16 %v2385_v61  ;;  %v2705_v61 = vld [vmem:[%s3852_s15] sm:$0x3]  ;;  %s3323_s15 = smov [#allocation17]  }
 0x6d6   :  { %2604 = vmatprep.subr.bf16.mxu0 %v2460_v63  ;;  %v2498_v63 = vunpack.c.l.s8.bf16 %v2388_v52 }
 0x6d9   :  { %2605 = vmatpush1.bf16.msra.mxu0 %v2459_v0  ;;  %v2497_v0 = vunpack.c.l.s8.bf16 %v2387_v48 }
 0x6da   :  { %2606 = vmatprep.subr.bf16.mxu0 %v2462_v3  ;;  %v2500_v3 = vunpack.c.h.s8.bf16 %v2388_v52  ;;  %v2714_v52 = vrot.slane %v2705_v61, %v3512_v55 }
 0x6dd   :  { %2607 = vmatpush1.bf16.msra.mxu0 %v2461_v29  ;;  %v2499_v29 = vunpack.c.h.s8.bf16 %v2387_v48 }
 0x6de   :  { %2608 = vmatprep.subr.bf16.mxu0 %v2464_v30  ;;  %v2502_v30 = vunpack.c.l.s8.bf16 %v2390_v5 }
 0x6e1   :  { %2609 = vmatpush1.bf16.msra.mxu0 %v2463_v27  ;;  %v2537_v27 = vpack.c.bf16 %v3790_v33, %v3790_v33  ;;  %v2394_v33 = vld [vmem:[#allocation3 + $0x1a8] sm:$0xff] }
 0x6e2   :  { %2610 = vmatprep.subr.bf16.mxu0 %v2466_v32  ;;  %v2501_v32 = vunpack.c.l.s8.bf16 %v2389_v25  ;;  %v2512_v22 = vunpack.c.h.s8.bf16 %v2394_v33 }
 0x6e5   :  { %2611 = vmatpush1.bf16.msra.mxu0 %v2465_v34  ;;  %v2504_v34 = vunpack.c.h.s8.bf16 %v2390_v5 }
 0x6e6   :  { %2612 = vmatprep.subr.bf16.mxu0 %v2468_v8  ;;  %v2392_v8 = vld [vmem:[#allocation3 + $0x198] sm:$0xff] }
 0x6e9   :  { %2613 = vmatpush1.bf16.msra.mxu0 %v2467_v9  ;;  %v2506_v9 = vunpack.c.l.s8.bf16 %v2392_v8 }
 0x6ea   :  { %2623 = vmatprep.subr.bf16.mxu0 %v2470_v11  ;;  %v2391_v11 = vld [vmem:[#allocation3 + $0x190] sm:$0xff] }
 0x6eb   :  { %v2505_v4 = vunpack.c.l.s8.bf16 %v2391_v11 }
 0x6ec   :  { %2615 = vmatmul.mubr.bf16.vlgmr.msra.gmra.mrb[12].mxu0 %v2535_v14  ;;  %v2508_v14 = vunpack.c.h.s8.bf16 %v2392_v8 }
 0x6ed   :  { %2624 = vmatpush1.bf16.msra.mxu0 %v2469_v16  ;;  %2655 = vmatprep.mubr.bf16.mxu0 %v2538_v17  ;;  %v2507_v16 = vunpack.c.h.s8.bf16 %v2391_v11  ;;  %v2510_v17 = vunpack.c.l.s8.bf16 %v2394_v33 }
 0x6ee   :  { %2625 = vmatprep.subr.bf16.mxu0 %v2472_v21  ;;  %v2509_v21 = vunpack.c.l.s8.bf16 %v2393_v37 }
 0x6f1   :  { %2626 = vmatpush1.bf16.msra.mxu0 %v2471_v58  ;;  %v2396_v58 = vld [vmem:[#allocation3 + $0x1b8] sm:$0xff] }
 0x6f2   :  { %2627 = vmatprep.subr.bf16.mxu0 %v2474_v35  ;;  %v2511_v35 = vunpack.c.h.s8.bf16 %v2393_v37  ;;  %v2514_v18 = vunpack.c.l.s8.bf16 %v2396_v58  ;;  %v2516_v43 = vunpack.c.h.s8.bf16 %v2396_v58 }
 0x6f5   :  { %2628 = vmatpush1.bf16.msra.mxu0 %v2473_v44  ;;  %v2395_v44 = vld [vmem:[#allocation3 + $0x1b0] sm:$0xff] }
 0x6f6   :  { %2629 = vmatprep.subr.bf16.mxu0 %v2476_v24  ;;  %v2513_v24 = vunpack.c.l.s8.bf16 %v2395_v44 }
 0x6f9   :  { %2630 = vmatpush1.bf16.msra.mxu0 %v2475_v1  ;;  %v2398_v1 = vld [vmem:[#allocation3 + $0x1c8] sm:$0xff] }
 0x6fa   :  { %2631 = vmatprep.subr.bf16.mxu0 %v2478_v2  ;;  %v2515_v2 = vunpack.c.h.s8.bf16 %v2395_v44  ;;  %v2518_v36 = vunpack.c.l.s8.bf16 %v2398_v1  ;;  %v2520_v49 = vunpack.c.h.s8.bf16 %v2398_v1 }
 0x6fd   :  { %2632 = vmatpush1.bf16.msra.mxu0 %v2477_v38  ;;  %v2397_v38 = vld [vmem:[#allocation3 + $0x1c0] sm:$0xff] }
 0x6fe   :  { %2633 = vmatprep.subr.bf16.mxu0 %v2480_v45  ;;  %v2517_v45 = vunpack.c.l.s8.bf16 %v2397_v38 }
 0x701   :  { %2634 = vmatpush1.bf16.msra.mxu0 %v2479_v28  ;;  %v2400_v28 = vld [vmem:[#allocation3 + $0x1d8] sm:$0xff] }
 0x702   :  { %2635 = vmatprep.subr.bf16.mxu0 %v2482_v40  ;;  %v2519_v40 = vunpack.c.h.s8.bf16 %v2397_v38  ;;  %v2522_v23 = vunpack.c.l.s8.bf16 %v2400_v28  ;;  %v2524_v31 = vunpack.c.h.s8.bf16 %v2400_v28 }
 0x705   :  { %2636 = vmatpush1.bf16.msra.mxu0 %v2481_v41  ;;  %v2399_v41 = vld [vmem:[#allocation3 + $0x1d0] sm:$0xff] }
 0x706   :  { %2637 = vmatprep.subr.bf16.mxu0 %v2484_v46  ;;  %v2521_v46 = vunpack.c.l.s8.bf16 %v2399_v41 }
 0x709   :  { %2638 = vmatpush1.bf16.msra.mxu0 %v2483_v47  ;;  %v2402_v47 = vld [vmem:[#allocation3 + $0x1e8] sm:$0xff] }
 0x70a   :  { %2639 = vmatprep.subr.bf16.mxu0 %v2486_v50  ;;  %v2523_v50 = vunpack.c.h.s8.bf16 %v2399_v41  ;;  %v2526_v6 = vunpack.c.l.s8.bf16 %v2402_v47  ;;  %v2528_v12 = vunpack.c.h.s8.bf16 %v2402_v47 }
 0x70d   :  { %2640 = vmatpush1.bf16.msra.mxu0 %v2485_v13  ;;  %v2401_v13 = vld [vmem:[#allocation3 + $0x1e0] sm:$0xff] }
 0x70e   :  { %2641 = vmatprep.subr.bf16.mxu0 %v2488_v10  ;;  %v2525_v10 = vunpack.c.l.s8.bf16 %v2401_v13 }
 0x711   :  { %2642 = vmatpush1.bf16.msra.mxu0 %v2487_v15  ;;  %v2404_v15 = vld [vmem:[#allocation3 + $0x1f8] sm:$0xff] }
 0x712   :  { %2643 = vmatprep.subr.bf16.mxu0 %v2490_v56  ;;  %v2527_v56 = vunpack.c.h.s8.bf16 %v2401_v13  ;;  %v2530_v20 = vunpack.c.l.s8.bf16 %v2404_v15  ;;  %v2532_v59 = vunpack.c.h.s8.bf16 %v2404_v15 }
 0x715   :  { %2644 = vmatpush1.bf16.msra.mxu0 %v2489_v26  ;;  %v2403_v26 = vld [vmem:[#allocation3 + $0x1f0] sm:$0xff] }
 0x716   :  { %2645 = vmatprep.subr.bf16.mxu0 %v2492_v39  ;;  %v2529_v39 = vunpack.c.l.s8.bf16 %v2403_v26 }
 0x719   :  { %2646 = vmatpush1.bf16.msra.mxu0 %v2491_v60  ;;  %v2531_v60 = vunpack.c.h.s8.bf16 %v2403_v26 }
 0x71a   :  { %2647 = vmatprep.subr.bf16.mxu0 %v2494_v51  ;;  %v2539_v51 = vpack.c.bf16 %v3796_v57, %v3796_v57 }
 0x71d   :  { %2648 = vmatpush1.bf16.msra.mxu0 %v2493_v19  ;;  %v2719_v19 = vld [vmem:[%s3853_s16] sm:$0x3]  ;;  %s2743_s16 = sshll.u32 %s3323_s15, 4  ;;  %s2744_s16 = int_to_ptr.vmem [resolvable:$true] %s2743_s16 }
 0x71e   :  { %2649 = vmatprep.subr.bf16.mxu0 %v2496_v53  ;;  %v2710_v53 = vrot.slane %v2705_v61, %v3509_v54  ;;  %v2728_v48 = vrot.slane %v2719_v19, %v3512_v55  ;;  %s3269_s22 = scalar_lea.vmem %s2744_s16, 256  ;;  %p3274_p3 = scmp.lt.s32.totalorder %s2744_s16, %s2744_s16 }
 0x71f   :  { %p3270_p2 = scmp.ne.s32.totalorder %s2744_s16, %s3269_s22  ;;  %p3275_p4 = scmp.lt.s32.totalorder %s3269_s22, %s3269_s22 }
 0x721   :  { %2650 = vmatpush1.bf16.msra.mxu0 %v2495_v62  ;;  %v2724_v62 = vrot.slane %v2719_v19, %v3509_v54  ;;  %p3276_p5 = por %p3275_p4, %p3274_p3 }
 0x722   :  { %2651 = vmatprep.subr.bf16.mxu0 %v2498_v63 }
 0x723   :  { %p3277_p6 = pnand %p3276_p5, %p3270_p2 }
 0x725   :  { %2652 = vmatpush1.bf16.msra.mxu0 %v2497_v0 }
 0x726   :  { %2653 = vmatprep.subr.bf16.mxu0 %v2500_v3 }
 0x729   :  { %2654 = vmatpush1.bf16.msra.mxu0 %v2499_v29 }
 0x72a   :  { %2664 = vmatprep.subr.bf16.mxu0 %v2502_v30 }
 0x72c   :  { %2656 = vmatmul.mubr.bf16.vlgmr.msra.gmra.mrb[12].mxu0 %v2537_v27 }
 0x72d   :  { %2665 = vmatpush1.bf16.msra.mxu0 %v2501_v32  ;;  %2696 = vmatprep.mubr.bf16.mxu0 %v2540_v7 }
 0x72e   :  { %2666 = vmatprep.subr.bf16.mxu0 %v2504_v34 }
 0x731   :  { %2667 = vmatpush1.bf16.msra.mxu0 %v2503_v42 }
 0x732   :  { %2668 = vmatprep.subr.bf16.mxu0 %v2506_v9 }
 0x735   :  { %2669 = vmatpush1.bf16.msra.mxu0 %v2505_v4 }
 0x736   :  { %2670 = vmatprep.subr.bf16.mxu0 %v2508_v14 }
 0x739   :  { %2671 = vmatpush1.bf16.msra.mxu0 %v2507_v16 }
 0x73a   :  { %2672 = vmatprep.subr.bf16.mxu0 %v2510_v17 }
 0x73d   :  { %2673 = vmatpush1.bf16.msra.mxu0 %v2509_v21 }
 0x73e   :  { %2674 = vmatprep.subr.bf16.mxu0 %v2512_v22 }
 0x741   :  { %2675 = vmatpush1.bf16.msra.mxu0 %v2511_v35 }
 0x742   :  { %2676 = vmatprep.subr.bf16.mxu0 %v2514_v18 }
 0x745   :  { %2677 = vmatpush1.bf16.msra.mxu0 %v2513_v24 }
 0x746   :  { %2678 = vmatprep.subr.bf16.mxu0 %v2516_v43 }
 0x749   :  { %2679 = vmatpush1.bf16.msra.mxu0 %v2515_v2 }
 0x74a   :  { %2680 = vmatprep.subr.bf16.mxu0 %v2518_v36 }
 0x74d   :  { %2681 = vmatpush1.bf16.msra.mxu0 %v2517_v45 }
 0x74e   :  { %2682 = vmatprep.subr.bf16.mxu0 %v2520_v49 }
 0x751   :  { %2683 = vmatpush1.bf16.msra.mxu0 %v2519_v40 }
 0x752   :  { %2684 = vmatprep.subr.bf16.mxu0 %v2522_v23 }
 0x755   :  { %2685 = vmatpush1.bf16.msra.mxu0 %v2521_v46 }
 0x756   :  { %2686 = vmatprep.subr.bf16.mxu0 %v2524_v31 }
 0x759   :  { %2687 = vmatpush1.bf16.msra.mxu0 %v2523_v50 }
 0x75a   :  { %2688 = vmatprep.subr.bf16.mxu0 %v2526_v6 }
 0x75d   :  { %2689 = vmatpush1.bf16.msra.mxu0 %v2525_v10 }
 0x75e   :  { %2690 = vmatprep.subr.bf16.mxu0 %v2528_v12 }
 0x761   :  { %2691 = vmatpush1.bf16.msra.mxu0 %v2527_v56 }
 0x762   :  { %2692 = vmatprep.subr.bf16.mxu0 %v2530_v20 }
 0x765   :  { %2693 = vmatpush1.bf16.msra.mxu0 %v2529_v39 }
 0x766   :  { %2694 = vmatprep.subr.bf16.mxu0 %v2532_v59 }
 0x769   :  { %2695 = vmatpush1.bf16.msra.mxu0 %v2531_v60 }
 0x76c   :  { %2697 = vmatmul.mubr.bf16.vlgmr.msra.gmra.mrb[12].mxu0 %v2539_v51 }
 0x83f   :  { %v2698_v63 = vpop.f32.mrb[12].mxu0 }
 0x840   :  { %v2717_v57 = vmul.f32 %v2710_v53, %v2698_v63  ;;  %v2700_v0 = vpop.f32.mrb[13].mxu0 }
 0x841   :  { %v2718_v3 = vmul.f32 %v2714_v52, %v2700_v0  ;;  %v2702_v5 = vpop.f32.mrb[14].mxu0 }
 0x842   :  { %v2731_v29 = vadd.f32 %v2724_v62, %v2717_v57  ;;  %v2703_v30 = vpop.f32.mrb[15].mxu0 }
 0x843   :  { %v2732_v25 = vadd.f32 %v2728_v48, %v2718_v3 }
 0x844   :  { %3067 = vtanh.f32 %v2731_v29 }
 0x845   :  { %3069 = vtanh.f32 %v2732_v25 }
 0x84e   :  { %v3068_v27 = vpop.eup %3067 }
 0x84f   :  { %v3070_v32 = vpop.eup %3069  ;;  %2735 = vst [vmem:[#allocation17] sm:$0xff] %v3068_v27 }
 0x850   :  { %2736 = vst [vmem:[#allocation17 + $0x8] sm:$0xff] %v3070_v32 }
 0x851   :  { %3280 = shalt.err (!%p3277_p6)
}
 0x852   :  { %s3281_s27 = scalar_lea.hbm %s3854_s17, 256 }
 0x853   :  { %p3282_p7 = scmp.ne.s32.totalorder %s3854_s17, %s3281_s27  ;;  %p3285_p8 = scmp.lt.u32.totalorder %s3281_s27, %s3854_s17 }
 0x855   :  { %p3287_p9 = pnand %p3285_p8, %p3282_p7 }
 0x857   :  { %3290 = shalt.err (!%p3287_p9)
}
 0x858   :  { %2746 = dma.vmem_to_hbm [thread:$0]  %s2744_s16, 256, %s3854_s17, [#allocation7]  }
 0x859   :  { %3303 = dma.done.wait [#allocation7], 256  }
 0x85a   :  { %3304 = vsyncadd [#allocation7], 4294967040 }
 0x85b   :  { %2750 = vsyncpa [#allocation6], 1 }
 0x85c   :  { %2751 = vsyncpa [#allocation9], 1 }
 0x85d   :  { %2752 = vsyncpa [#allocation12], 1 }
 0x85e   :  { %2753 = vsyncpa [#allocation15], 1 }
 0x85f   :  { %2754 = vsyncpa [#allocation7], 1 }
 0x860   :  { %2755 = vsyncmov [#allocation4] }
 0x863   :  { %s2756_s24 = vpop.sfrf %2755 }
 0x864   :  { %p2850_p10 = scmp.ne.s32.totalorder %s2756_s24, 0 }
 0x866   :  { %2760 = shalt.err (%p2850_p10)  }
 0x867   :  { %2762 = vsyncmov [#allocation4 + $0x1] }
 0x86a   :  { %s2763_s21 = vpop.sfrf %2762 }
 0x86b   :  { %p2851_p11 = scmp.ne.s32.totalorder %s2763_s21, 0 }
 0x86d   :  { %2767 = shalt.err (%p2851_p11)  }

</bundles_post_ra>
